<compile_context>
chip_gen: v5e
topology: v5e:2x2
jax: 0.10.0
libtpu: 0.0.40
codegen_flags: <defaults>
</compile_context>

<pallas_src>
import functools

import jax
import jax.numpy as jnp
from jax.experimental import pallas as pl
from jax.experimental.pallas import tpu as pltpu


def _leaky_relu(x, slope=0.01):
    # Equivalent to where(x>=0, x, slope*x) for 0 <= slope <= 1, one less op.
    return jnp.maximum(x, slope * x)


def residual_block_kernel(x_ref, w1_ref, b1_ref, w2_ref, b2_ref,
                          w3_ref, b3_ref, o_ref):
    x = x_ref[...]                                    # (TB, D) f32

    # Matmul operands in the weights' dtype (bf16 fast path on v6e/v7x),
    # f32 accumulation on the MXU; bias / activation / residual in f32.
    h = jnp.dot(x.astype(w1_ref.dtype), w1_ref[...],
                preferred_element_type=jnp.float32) + b1_ref[...]
    h = _leaky_relu(h)

    h = jnp.dot(h.astype(w2_ref.dtype), w2_ref[...],
                preferred_element_type=jnp.float32) + b2_ref[...]
    h = _leaky_relu(h)

    h = jnp.dot(h.astype(w3_ref.dtype), w3_ref[...],
                preferred_element_type=jnp.float32) + b3_ref[...]

    # Residual connection: y = x + layers(x)  (original f32 x, not the cast)
    o_ref[...] = (x + h).astype(o_ref.dtype)


def _choose_tb(B, block_b):
    """Batch tile: as large as allowed (amortize per-step overhead, long MXU
    M-stream) while keeping >= 2 grid steps when B allows (v7x has 2 TCs and
    the batch axis is 'parallel').  Multiple of 8 rows for (8,128) tiling."""
    tb = min(block_b, B)
    if tb >= B and B >= 16:
        tb = B // 2
    if tb != B:
        tb = max(8, (tb // 8) * 8)
    return tb


@functools.partial(jax.jit, static_argnames=("block_b",))
def residual_block(x, params, *, block_b=512):
    """Fused ResidualBlock forward.  x: (B, D) float32; D == W3 out dim.

    Weight matrices are used in whatever dtype they arrive in; call
    `prepare_params` once (outside jit / the training step) to cache bf16
    copies for the production MXU path.
    """
    w1, b1, w2, b2, w3, b3 = params
    B, D = x.shape
    H = w1.shape[1]
    assert w1.shape[0] == D and w3.shape[1] == D, "residual needs D_out == D_in"

    TB = _choose_tb(B, block_b)
    grid = (pl.cdiv(B, TB),)
    # NOTE: if B % TB != 0 the padded tail tile is still correct (output
    # stores are masked), but uninitialized rows flow through the matmuls.

    # Weights/biases: full-array blocks, constant index_map -> resident in
    # VMEM across all grid steps (no re-DMA per step).  At larger D, add
    # pipeline_mode=pl.Buffered(1) here to drop the redundant second buffer.
    def resident(a):
        return pl.BlockSpec(a.shape, lambda i: (0,) * a.ndim)

    # Advisory cost estimate so XLA schedules surrounding ops around the call.
    flops = 2 * B * (D * H + H * H + H * D)
    weight_bytes = sum(int(a.size) * a.dtype.itemsize
                       for a in (w1, b1, w2, b2, w3, b3))
    bytes_accessed = 2 * B * D * x.dtype.itemsize + weight_bytes

    return pl.pallas_call(
        residual_block_kernel,
        out_shape=jax.ShapeDtypeStruct((B, D), x.dtype),
        grid_spec=pl.GridSpec(
            grid=grid,
            in_specs=[
                pl.BlockSpec((TB, D), lambda i: (i, 0)),   # x tile (pipelined)
                resident(w1), resident(b1),
                resident(w2), resident(b2),
                resident(w3), resident(b3),
            ],
            out_specs=pl.BlockSpec((TB, D), lambda i: (i, 0)),
        ),
        compiler_params=pltpu.CompilerParams(
            dimension_semantics=("parallel",),      # batch tiles independent
            vmem_limit_bytes=32 * 1024 * 1024,       # above v5e's 16 MiB default
        ),
        cost_estimate=pl.CostEstimate(
            flops=flops, bytes_accessed=bytes_accessed, transcendentals=0),
    )(x, w1, b1, w2, b2, w3, b3)


def prepare_params(params, compute_dtype=jnp.bfloat16):
    """Cast weight matrices once, OUTSIDE the forward call (avoids a full HBM
    read+write convert on every call).  Biases stay f32 (added post-acc)."""
    w1, b1, w2, b2, w3, b3 = params
    return (w1.astype(compute_dtype), b1,
            w2.astype(compute_dtype), b2,
            w3.astype(compute_dtype), b3)


def init_params(key, dim):
    """torch.nn.Linear-style init (uniform +/- 1/sqrt(fan_in)); weights stored
    as (in_features, out_features).  Layer widths: D -> 2D -> 2D -> D."""
    dims = [(dim, dim * 2), (dim * 2, dim * 2), (dim * 2, dim)]
    params = []
    keys = jax.random.split(key, 2 * len(dims))
    for i, (fan_in, fan_out) in enumerate(dims):
        bound = 1.0 / jnp.sqrt(fan_in)
        w = jax.random.uniform(keys[2 * i], (fan_in, fan_out),
                               minval=-bound, maxval=bound, dtype=jnp.float32)
        b = jax.random.uniform(keys[2 * i + 1], (1, fan_out),
                               minval=-bound, maxval=bound, dtype=jnp.float32)
        params.extend([w, b])
    return tuple(params)


def residual_block_ref(x, params, compute_dtype=jnp.float32):
    """Pure-JAX reference mirroring the kernel's dtype path."""
    w1, b1, w2, b2, w3, b3 = params

    def lin(h, w, b):
        return jnp.dot(h.astype(compute_dtype), w.astype(compute_dtype),
                       preferred_element_type=jnp.float32) + b

    h = _leaky_relu(lin(x, w1, b1))
    h = _leaky_relu(lin(h, w2, b2))
    return x + lin(h, w3, b3)


if __name__ == "__main__":
    # Lane-dense feature dims (D=128, hidden=256) so every matmul operand and
    # the output store are unmasked.  batch=1024 with the default block_b=512
    # gives a 2-step "parallel" grid (both v7x TensorCores busy).
    dim = 128
    batch = 1024

    key = jax.random.PRNGKey(0)
    k_params, k_x = jax.random.split(key)
    params_f32 = init_params(k_params, dim)
    x = jax.random.normal(k_x, (batch, dim), dtype=jnp.float32)

    # 1) exact f32 path: tight correctness check of the fused kernel.
    out_f32 = jax.block_until_ready(residual_block(x, params_f32))
    ref_f32 = residual_block_ref(x, params_f32, compute_dtype=jnp.float32)
    assert out_f32.shape == (batch, dim), out_f32.shape
    assert jnp.allclose(out_f32, ref_f32, atol=1e-5, rtol=1e-5), \
        f"f32 max abs err {jnp.max(jnp.abs(out_f32 - ref_f32))}"

    # 2) production path: bf16 weights cached once outside the call
    #    (bf16 MXU operands, f32 accumulation, f32 residual/bias/activation).
    params_bf16 = prepare_params(params_f32, jnp.bfloat16)
    out_bf16 = jax.block_until_ready(residual_block(x, params_bf16))
    ref_bf16 = residual_block_ref(x, params_f32, compute_dtype=jnp.bfloat16)
    assert jnp.allclose(out_bf16, ref_bf16, atol=1e-2, rtol=1e-2), \
        f"bf16 max abs err {jnp.max(jnp.abs(out_bf16 - ref_bf16))}"

    print("KERNEL_OK")
</pallas_src>

<mosaic_0001>
module attributes {stable_mosaic.version = 11 : i64} {
  func.func @residual_block_kernel(%arg0: i32, %arg1: memref<512x128xf32, #tpu.memory_space<vmem>>, %arg2: memref<128x256xf32, #tpu.memory_space<vmem>>, %arg3: memref<1x256xf32, #tpu.memory_space<vmem>>, %arg4: memref<256x256xf32, #tpu.memory_space<vmem>>, %arg5: memref<1x256xf32, #tpu.memory_space<vmem>>, %arg6: memref<256x128xf32, #tpu.memory_space<vmem>>, %arg7: memref<1x128xf32, #tpu.memory_space<vmem>>, %arg8: memref<512x128xf32, #tpu.memory_space<vmem>>) attributes {dimension_semantics = [#tpu.dimension_semantics<parallel>], iteration_bounds = array<i64: 2>, scalar_prefetch = 0 : i64, scratch_operands = 0 : i64, tpu.core_type = #tpu.core_type<tc>, window_params = [{transform_indices = @transform_0, window_bounds = array<i64: 512, 128>}, {pipeline_mode = #tpu.pipeline_mode<synchronous>, transform_indices = @transform_1, window_bounds = array<i64: 128, 256>}, {pipeline_mode = #tpu.pipeline_mode<synchronous>, transform_indices = @transform_2, window_bounds = array<i64: 1, 256>}, {pipeline_mode = #tpu.pipeline_mode<synchronous>, transform_indices = @transform_3, window_bounds = array<i64: 256, 256>}, {pipeline_mode = #tpu.pipeline_mode<synchronous>, transform_indices = @transform_4, window_bounds = array<i64: 1, 256>}, {pipeline_mode = #tpu.pipeline_mode<synchronous>, transform_indices = @transform_5, window_bounds = array<i64: 256, 128>}, {pipeline_mode = #tpu.pipeline_mode<synchronous>, transform_indices = @transform_6, window_bounds = array<i64: 1, 128>}, {transform_indices = @transform_7, window_bounds = array<i64: 512, 128>}]} {
    %c0 = arith.constant 0 : index
    %c0_0 = arith.constant 0 : index
    %0 = vector.load %arg1[%c0, %c0_0] : memref<512x128xf32, #tpu.memory_space<vmem>>, vector<512x128xf32>
    %c0_1 = arith.constant 0 : index
    %c0_2 = arith.constant 0 : index
    %1 = vector.load %arg2[%c0_1, %c0_2] : memref<128x256xf32, #tpu.memory_space<vmem>>, vector<128x256xf32>
    %cst = arith.constant dense<0.000000e+00> : vector<512x256xf32>
    %2 = tpu.matmul %0, %1, %cst {dimension_numbers = #tpu.dot_dimension_numbers<[1], [0], [0], [1], [0, 0, 1, 1], [], []>} : vector<512x128xf32>, vector<128x256xf32>, vector<512x256xf32> -> vector<512x256xf32>
    %c0_3 = arith.constant 0 : index
    %c0_4 = arith.constant 0 : index
    %3 = vector.load %arg3[%c0_3, %c0_4] : memref<1x256xf32, #tpu.memory_space<vmem>>, vector<1x256xf32>
    %4 = vector.broadcast %3 : vector<1x256xf32> to vector<512x256xf32>
    %5 = arith.addf %2, %4 : vector<512x256xf32>
    %cst_5 = arith.constant 0.00999999977 : f32
    %6 = vector.broadcast %cst_5 : f32 to vector<512x256xf32>
    %7 = arith.mulf %6, %5 : vector<512x256xf32>
    %8 = arith.maximumf %5, %7 : vector<512x256xf32>
    %c0_6 = arith.constant 0 : index
    %c0_7 = arith.constant 0 : index
    %9 = vector.load %arg4[%c0_6, %c0_7] : memref<256x256xf32, #tpu.memory_space<vmem>>, vector<256x256xf32>
    %cst_8 = arith.constant dense<0.000000e+00> : vector<512x256xf32>
    %10 = tpu.matmul %8, %9, %cst_8 {dimension_numbers = #tpu.dot_dimension_numbers<[1], [0], [0], [1], [0, 0, 1, 1], [], []>} : vector<512x256xf32>, vector<256x256xf32>, vector<512x256xf32> -> vector<512x256xf32>
    %c0_9 = arith.constant 0 : index
    %c0_10 = arith.constant 0 : index
    %11 = vector.load %arg5[%c0_9, %c0_10] : memref<1x256xf32, #tpu.memory_space<vmem>>, vector<1x256xf32>
    %12 = vector.broadcast %11 : vector<1x256xf32> to vector<512x256xf32>
    %13 = arith.addf %10, %12 : vector<512x256xf32>
    %cst_11 = arith.constant 0.00999999977 : f32
    %14 = vector.broadcast %cst_11 : f32 to vector<512x256xf32>
    %15 = arith.mulf %14, %13 : vector<512x256xf32>
    %16 = arith.maximumf %13, %15 : vector<512x256xf32>
    %c0_12 = arith.constant 0 : index
    %c0_13 = arith.constant 0 : index
    %17 = vector.load %arg6[%c0_12, %c0_13] : memref<256x128xf32, #tpu.memory_space<vmem>>, vector<256x128xf32>
    %cst_14 = arith.constant dense<0.000000e+00> : vector<512x128xf32>
    %18 = tpu.matmul %16, %17, %cst_14 {dimension_numbers = #tpu.dot_dimension_numbers<[1], [0], [0], [1], [0, 0, 1, 1], [], []>} : vector<512x256xf32>, vector<256x128xf32>, vector<512x128xf32> -> vector<512x128xf32>
    %c0_15 = arith.constant 0 : index
    %c0_16 = arith.constant 0 : index
    %19 = vector.load %arg7[%c0_15, %c0_16] : memref<1x128xf32, #tpu.memory_space<vmem>>, vector<1x128xf32>
    %20 = vector.broadcast %19 : vector<1x128xf32> to vector<512x128xf32>
    %21 = arith.addf %18, %20 : vector<512x128xf32>
    %22 = arith.addf %0, %21 : vector<512x128xf32>
    %c0_17 = arith.constant 0 : index
    %c0_18 = arith.constant 0 : index
    %23 = vector.load %arg8[%c0_17, %c0_18] : memref<512x128xf32, #tpu.memory_space<vmem>>, vector<512x128xf32>
    tpu.vector_store %arg8[%c0_17, %c0_18], %22 {strides = array<i32>} : memref<512x128xf32, #tpu.memory_space<vmem>>, vector<512x128xf32>,
    return
  }
  func.func @transform_0(%arg0: i32) -> (i32, i32) {
    %c0_i32 = arith.constant 0 : i32
    %c0_i32_0 = arith.constant 0 : i32
    return %arg0, %c0_i32 : i32, i32
  }
  func.func @transform_1(%arg0: i32) -> (i32, i32) {
    %c0_i32 = arith.constant 0 : i32
    %c0_i32_0 = arith.constant 0 : i32
    %c0_i32_1 = arith.constant 0 : i32
    return %c0_i32, %c0_i32_0 : i32, i32
  }
  func.func @transform_2(%arg0: i32) -> (i32, i32) {
    %c0_i32 = arith.constant 0 : i32
    %c0_i32_0 = arith.constant 0 : i32
    %c0_i32_1 = arith.constant 0 : i32
    return %c0_i32, %c0_i32_0 : i32, i32
  }
  func.func @transform_3(%arg0: i32) -> (i32, i32) {
    %c0_i32 = arith.constant 0 : i32
    %c0_i32_0 = arith.constant 0 : i32
    %c0_i32_1 = arith.constant 0 : i32
    return %c0_i32, %c0_i32_0 : i32, i32
  }
  func.func @transform_4(%arg0: i32) -> (i32, i32) {
    %c0_i32 = arith.constant 0 : i32
    %c0_i32_0 = arith.constant 0 : i32
    %c0_i32_1 = arith.constant 0 : i32
    return %c0_i32, %c0_i32_0 : i32, i32
  }
  func.func @transform_5(%arg0: i32) -> (i32, i32) {
    %c0_i32 = arith.constant 0 : i32
    %c0_i32_0 = arith.constant 0 : i32
    %c0_i32_1 = arith.constant 0 : i32
    return %c0_i32, %c0_i32_0 : i32, i32
  }
  func.func @transform_6(%arg0: i32) -> (i32, i32) {
    %c0_i32 = arith.constant 0 : i32
    %c0_i32_0 = arith.constant 0 : i32
    %c0_i32_1 = arith.constant 0 : i32
    return %c0_i32, %c0_i32_0 : i32, i32
  }
  func.func @transform_7(%arg0: i32) -> (i32, i32) {
    %c0_i32 = arith.constant 0 : i32
    %c0_i32_0 = arith.constant 0 : i32
    return %arg0, %c0_i32 : i32, i32
  }
}

</mosaic_0001>

<bundles_post_ra>
// kernel: residual_block.1
= control target key start
LH: loop header
LB: loop body
LE: loop exit
PB: predicated region body
PF: predicated region fallthrough
CT: control target
= control target key end

     0   :  { %s4954_s0 = inlined_call_operand.hbm [shape: f32[1024,128], index: 0, kind: input, shape index: {}]   ;;  %s4955_s1 = inlined_call_operand.hbm [shape: f32[128,256], index: 1, kind: input, shape index: {}]   ;;  %s4956_s2 = inlined_call_operand.hbm [shape: f32[1,256], index: 2, kind: input, shape index: {}]   ;;  %s4957_s3 = inlined_call_operand.hbm [shape: f32[256,256], index: 3, kind: input, shape index: {}]   ;;  %s4958_s4 = inlined_call_operand.vmem [shape: f32[1,256], index: 4, kind: input, shape index: {}]   ;;  %s4959_s5 = inlined_call_operand.hbm [shape: f32[256,128], index: 5, kind: input, shape index: {}]   ;;  %s4960_s6 = inlined_call_operand.vmem [shape: f32[1,128], index: 6, kind: input, shape index: {}]   ;;  %s4961_s7 = inlined_call_operand.hbm [shape: f32[1024,128], index: 7, kind: output, shape index: {}]  }
   0x1   :  { %5069 = sst [smem:[#allocation112_spill]] %s4955_s1 }
   0x2   :  { %12 = vsyncpa [#allocation3], 0 }
   0x3   :  { %14 = vsyncpa [#allocation3 + $0x1], 0 }
   0x4   :  { %15 = vsyncpa [#allocation6], 0 }
   0x5   :  { %16 = vsyncpa [#allocation9], 0 }
   0x6   :  { %17 = vsyncpa [#allocation4], 0 }
   0x7   :  { %19 = vsyncpa [#allocation4 + $0x1], 0  ;;  %s3472_s24 = smov 0   ;;  %s3474_s25 = smov 0  }
   0x8   :  { %s3476_s26 = smov 0   ;;  %s3478_s27 = smov 0  }
   0x9 LB: > { %s3493_s28 = sadd.s32 4294967295, %s3420_s27   ;;  %s3012_s29 = sadd.s32 4294967294, %s3420_s27   ;;  %s3420_s27 = sphi %s3478_s27, %s5293_s27   ;;  %s3416_s26 = sphi %s3476_s26, %s5292_s26   ;;  %s3412_s25 = sphi %s3474_s25, %s5291_s25   ;;  %s3408_s24 = sphi %s3472_s24, %s5290_s24  }
   0xa   : > { %p45_p0 = scmp.ne.s32.totalorder %s3412_s25, %s3408_s24  ;;  %p46_p1 = scmp.eq.s32.totalorder %s3493_s28, 0 }
   0xb   : > { %p195_p2 = scmp.eq.s32.totalorder %s3493_s28, 1  ;;  %p201_p3 = scmp.eq.s32.totalorder %s3012_s29, 1 }
   0xc   : > { %p3502_p4 = por %p46_p1, %p45_p0  ;;  %p3013_p5 = scmp.ge.s32.totalorder %s3420_s27, 1 }
   0xd   : > { %p3507_p6 = por %p201_p3, %p45_p0  ;;  %p208_p7 = scmp.lt.s32.totalorder %s3420_s27, 3 }
   0xe   : > { %s5072_s1 = sld [smem:[#allocation112_spill]]  ;;  %s3422_s13 = smov [#allocation5]  }
   0xf   : > { %p3515_p8 = pnand %p3013_p5, %p208_p7  ;;  %s221_s14 = sshll.u32 %s3422_s13, 4  ;;  %s222_s14 = int_to_ptr.vmem [resolvable:$true] %s221_s14 }
  0x10   : > { %s245_s18 = sshll.u32 %s4957_s3, 4  ;;  %s3423_s19 = smov 256   ;;  %s246_s18 = int_to_ptr.hbm [resolvable:$true] %s245_s18 }
  0x11   : > { %p3056_p9 = pneg %p3515_p8  ;;  %s3424_s20 = smov 16  }
  0x12   : > { %s3425_s21 = smov [#allocation8]   ;;  %s234_s9 = sshll.u32 %s4956_s2, 4  ;;  %s235_s9 = int_to_ptr.hbm [resolvable:$true] %s234_s9 }
  0x13   : > { %p3523_p10 = pnand %p3056_p9, %p46_p1  ;;  %s247_s22 = sshll.u32 %s3425_s21, 4  ;;  %s248_s22 = int_to_ptr.vmem [resolvable:$true] %s247_s22 }
  0x14   : > { %s219_s11 = sshll.u32 %s5072_s1, 4  ;;  %s262_s16 = sshll.u32 %s4959_s5, 4  ;;  %s220_s11 = int_to_ptr.hbm [resolvable:$true] %s219_s11  ;;  %s263_s16 = int_to_ptr.hbm [resolvable:$true] %s262_s16 }
  0x15   : > { %3059 = dma.hbm_to_vmem [thread:$0]  (!%p3523_p10), %s220_s11, 4096, %s222_s14, [#allocation6], %s3423_s19, %s3423_s19, %s3424_s20  }
  0x16   : > { %3065 = dma.hbm_to_vmem [thread:$0]  (!%p3523_p10), %s246_s18, 8192, %s248_s22, [#allocation9], %s3423_s19, %s3423_s19, %s3424_s20  }
  0x17   : > { %s3426_s11 = smov [#allocation7]   ;;  %s3427_s17 = smov [#allocation10]  }
  0x18   : > { %s236_s14 = sshll.u32 %s3426_s11, 4  ;;  %s264_s18 = sshll.u32 %s3427_s17, 4  ;;  %s237_s14 = int_to_ptr.vmem [resolvable:$true] %s236_s14  ;;  %s265_s18 = int_to_ptr.vmem [resolvable:$true] %s264_s18 }
  0x19   : > { %3062 = dma.hbm_to_vmem [thread:$0]  (!%p3523_p10), %s235_s9, 32, %s237_s14, [#allocation6]  }
  0x1a   : > { %s4962_s19 = smov 128   ;;  %s4963_s20 = smov 8  }
  0x1b   : > { %3068 = dma.hbm_to_vmem [thread:$0]  (!%p3523_p10), %s263_s16, 4096, %s265_s18, [#allocation9], %s4962_s19, %s4962_s19, %s4963_s20  }
  0x1c   : > { %s3549_s21 = sadd.s32 1, %s3420_s27   ;;  %s32_s23 = sadd.s32 1, %s3416_s26 }
  0x1d   : > { %s29_s22 = ssub.s32 %s3420_s27, %s3549_s21  ;;  %p39_p13 = scmp.ne.s32.totalorder %s3416_s26, %s3412_s25 }
  0x1e   : > { %p30_p12 = scmp.eq.s32.totalorder %s29_s22, 0  ;;  %p40_p0 = scmp.eq.s32.totalorder %s3420_s27, 0 }
  0x1f   : > { %p3562_p5 = por %p195_p2, %p39_p13  ;;  %p3081_p7 = scmp.lt.s32.totalorder %s3420_s27, 2 }
  0x20   : > { %s3558_s29 = scalar_select %p30_p12, %s3416_s26, %s32_s23  }
  0x21   : > { %p41_p3 = por %p40_p0, %p39_p13  ;;  %s281_s15 = sand.u32 1, %s3416_s26  }
  0x22   : > { %s3019_s10 = sshll.u32 %s281_s15, 9  ;;  %s3034_s13 = sshll.u32 %s3420_s27, 9 }
  0x23   : > { %s290_s14 = scalar_lea.hbm %s4954_s0, %s3034_s13  ;;  %s285_s17 = scalar_lea.vmem [#allocation2], %s3019_s10 }
  0x24   : > { %s293_s18 = sshll.u32 %s285_s17, 4  ;;  %s291_s22 = sshll.u32 %s290_s14, 4  ;;  %s294_s18 = int_to_ptr.vmem [resolvable:$true] %s293_s18  ;;  %s292_s22 = int_to_ptr.hbm [resolvable:$true] %s291_s22 }
  0x25   : > { %p3572_p9 = pnand %p3081_p7, %p41_p3  ;;  %s282_s19 = scalar_lea.sflag [#allocation3], %s281_s15 }
  0x26   : > { %s3316_s20 = sshra.s32 %s292_s22, 4  ;;  %s3323_s16 = scalar_lea.hbm %s4954_s0, 1024  ;;  %s3317_s20 = int_to_ptr.hbm [resolvable:$true] %s3316_s20 }
  0x27   : > { %s3318_s1 = scalar_lea.hbm %s3317_s20, 512  ;;  %p3320_p10 = pneg %p3572_p9 }
  0x28   : > { %p3319_p2 = scmp.ne.s32.totalorder %s3317_s20, %s3318_s1  ;;  %p3324_p0 = scmp.lt.s32.totalorder %s3317_s20, %s4954_s0 }
  0x29   : > { %p3325_p3 = scmp.lt.s32.totalorder %s3323_s16, %s3318_s1 }
  0x2a   : > { %p3321_p12 = pnand %p3320_p10, %p3319_p2 }
  0x2b   : > { %p3326_p7 = por %p3325_p3, %p3324_p0 }
  0x2c   : > { %p3322_p13 = pneg %p3321_p12 }
  0x2e   : > { %p3327_p11 = pnand %p3326_p7, %p3322_p13 }
  0x30   : > { %3330 = shalt.err (!%p3327_p11)
}
  0x31   : > { %s5077_s15 = smov 8   ;;  %s5078_s17 = smov 128  }
  0x32   : > { %3072 = dma.hbm_to_vmem [thread:$0]  (!%p3572_p9), %s292_s22, 8192, %s294_s18, %s282_s19, %s5078_s17, %s5078_s17, %s5077_s15  }
  0x33   : > { %305 = sbr.rel (%p3515_p8) target bundleno = 1386 (0x56a), region = 48 }
  0x38   : > { %s3592_s13 = sand.u32 1, %s3412_s25  }
  0x39   : > { %s3023_s1 = sshll.u32 %s3592_s13, 9  ;;  %s308_s20 = scalar_lea.sflag [#allocation3], %s3592_s13 }
  0x3a   : > { %s3598_s10 = scalar_lea.vmem [#allocation2], %s3023_s1 }
  0x3b   : > { %3391 = dma.done.wait (%p3502_p4), %s308_s20, 8192  }
  0x3c   : > { %3393 = vsyncadd (%p3502_p4), %s308_s20, 4294959104 }
  0x3d   : > { %3395 = dma.done.wait (%p46_p1), [#allocation6], 4128  }
  0x3e   : > { %3397 = vsyncadd (%p46_p1), [#allocation6], 4294963168 }
  0x3f   : > { %3399 = dma.done.wait (%p46_p1), [#allocation9], 12288  }
  0x40   : > { %3401 = vsyncadd (%p46_p1), [#allocation9], 4294955008  ;;  %v459_v0 = vld [vmem:[#allocation5 + $0xf0] sm:$0xff]  ;;  %v460_v1 = vld [vmem:[#allocation5 + $0xf8] sm:$0xff]  ;;  %s4526_s16 = scalar_lea.vmem [#allocation11], %s3023_s1  ;;  %s3035_s15 = sshll.u32 %s3493_s28, 9 }
  0x41   : > { %v457_v2 = vld [vmem:[#allocation5 + $0xe0] sm:$0xff]  ;;  %467 = vmatpush.msra.mxu0 %v459_v0  ;;  %676 = vmatpush.msra.mxu1 %v460_v1  ;;  %v458_v3 = vld [vmem:[#allocation5 + $0xe8] sm:$0xff]  ;;  %v455_v4 = vld [vmem:[#allocation5 + $0xd0] sm:$0xff]  ;;  %s2897_s20 = scalar_lea.hbm %s4961_s7, %s3035_s15  ;;  %s2898_s30 = sshll.u32 %s4526_s16, 4  ;;  %s2899_s30 = int_to_ptr.vmem [resolvable:$true] %s2898_s30 }
  0x42   : > { %v456_v5 = vld [vmem:[#allocation5 + $0xd8] sm:$0xff]  ;;  %v453_v6 = vld [vmem:[#allocation5 + $0xc0] sm:$0xff]  ;;  %v454_v7 = vld [vmem:[#allocation5 + $0xc8] sm:$0xff]  ;;  %s2900_s12 = sshll.u32 %s2897_s20, 4  ;;  %s2886_s28 = scalar_lea.sflag [#allocation4], %s3592_s13  ;;  %s2901_s12 = int_to_ptr.hbm [resolvable:$true] %s2900_s12 }
  0x43   : > { %468 = vmatpush.msra.mxu0 %v457_v2  ;;  %677 = vmatpush.msra.mxu1 %v458_v3  ;;  %v451_v8 = vld [vmem:[#allocation5 + $0xb0] sm:$0xff]  ;;  %v452_v9 = vld [vmem:[#allocation5 + $0xb8] sm:$0xff]  ;;  %v449_v10 = vld [vmem:[#allocation5 + $0xa0] sm:$0xff]  ;;  %s3360_s19 = sshra.s32 %s2901_s12, 4  ;;  %s3366_s11 = scalar_lea.hbm %s4961_s7, 1024  ;;  %s3361_s19 = int_to_ptr.hbm [resolvable:$true] %s3360_s19 }
  0x44   : > { %v450_v11 = vld [vmem:[#allocation5 + $0xa8] sm:$0xff]  ;;  %v447_v12 = vld [vmem:[#allocation5 + $0x90] sm:$0xff]  ;;  %v448_v13 = vld [vmem:[#allocation5 + $0x98] sm:$0xff]  ;;  %s3362_s18 = scalar_lea.hbm %s3361_s19, 512  ;;  %p3367_p11 = scmp.lt.s32.totalorder %s3361_s19, %s4961_s7 }
  0x45   : > { %469 = vmatpush.msra.mxu0 %v455_v4  ;;  %678 = vmatpush.msra.mxu1 %v456_v5  ;;  %v445_v14 = vld [vmem:[#allocation5 + $0x80] sm:$0xff]  ;;  %v446_v15 = vld [vmem:[#allocation5 + $0x88] sm:$0xff]  ;;  %v443_v16 = vld [vmem:[#allocation5 + $0x70] sm:$0xff]  ;;  %p3363_p1 = scmp.ne.s32.totalorder %s3361_s19, %s3362_s18  ;;  %p3368_p9 = scmp.lt.s32.totalorder %s3366_s11, %s3362_s18 }
  0x46   : > { %v444_v17 = vld [vmem:[#allocation5 + $0x78] sm:$0xff]  ;;  %v441_v18 = vld [vmem:[#allocation5 + $0x60] sm:$0xff]  ;;  %v442_v19 = vld [vmem:[#allocation5 + $0x68] sm:$0xff] }
  0x47   : > { %470 = vmatpush.msra.mxu0 %v453_v6  ;;  %679 = vmatpush.msra.mxu1 %v454_v7  ;;  %v439_v20 = vld [vmem:[#allocation5 + $0x50] sm:$0xff]  ;;  %v440_v21 = vld [vmem:[#allocation5 + $0x58] sm:$0xff]  ;;  %v437_v22 = vld [vmem:[#allocation5 + $0x40] sm:$0xff]  ;;  %p3364_p4 = pnand %p3363_p1, %p3562_p5  ;;  %p3369_p2 = por %p3368_p9, %p3367_p11 }
  0x48   : > { %v438_v23 = vld [vmem:[#allocation5 + $0x48] sm:$0xff]  ;;  %v435_v24 = vld [vmem:[#allocation5 + $0x30] sm:$0xff]  ;;  %v436_v25 = vld [vmem:[#allocation5 + $0x38] sm:$0xff] }
  0x49   : > { %471 = vmatpush.msra.mxu0 %v451_v8  ;;  %680 = vmatpush.msra.mxu1 %v452_v9  ;;  %v433_v26 = vld [vmem:[#allocation5 + $0x20] sm:$0xff]  ;;  %v434_v27 = vld [vmem:[#allocation5 + $0x28] sm:$0xff]  ;;  %v431_v28 = vld [vmem:[#allocation5 + $0x10] sm:$0xff]  ;;  %p3365_p8 = pneg %p3364_p4 }
  0x4a   : > { %v432_v29 = vld [vmem:[#allocation5 + $0x18] sm:$0xff]  ;;  %v429_v30 = vld [vmem:[#allocation5] sm:$0xff]  ;;  %v430_v31 = vld [vmem:[#allocation5 + $0x8] sm:$0xff] }
  0x4b   : > { %472 = vmatpush.msra.mxu0 %v449_v10  ;;  %681 = vmatpush.msra.mxu1 %v450_v11  ;;  %v365_v32 = vld [vmem:[%s3598_s10] sm:$0xff]  ;;  %v1170_v35 = vld [vmem:[#allocation8 + $0xe8] sm:$0xff]  ;;  %v368_v39 = vld [vmem:[%s3598_s10 + $0x18] sm:$0xff]  ;;  %p3370_p10 = pnand %p3369_p2, %p3365_p8 }
  0x4c   : > { %v1172_v33 = vld [vmem:[#allocation8 + $0xf8] sm:$0xff]  ;;  %v1202_v36 = vld [vmem:[#allocation8 + $0x1e8] sm:$0xff]  ;;  %v1171_v49 = vld [vmem:[#allocation8 + $0xf0] sm:$0xff] }
  0x4d   : > { %473 = vmatpush.msra.mxu0 %v447_v12  ;;  %682 = vmatpush.msra.mxu1 %v448_v13  ;;  %v1204_v34 = vld [vmem:[#allocation8 + $0x1f8] sm:$0xff]  ;;  %v366_v37 = vld [vmem:[%s3598_s10 + $0x8] sm:$0xff]  ;;  %v367_v38 = vld [vmem:[%s3598_s10 + $0x10] sm:$0xff] }
  0x4e   : > { %v369_v40 = vld [vmem:[%s3598_s10 + $0x20] sm:$0xff]  ;;  %v370_v43 = vld [vmem:[%s3598_s10 + $0x28] sm:$0xff]  ;;  %v371_v44 = vld [vmem:[%s3598_s10 + $0x30] sm:$0xff]  ;;  %1211 = vmatpush.msra.mxu2 %v1171_v49 }
  0x4f   : > { %474 = vmatpush.msra.mxu0 %v445_v14  ;;  %683 = vmatpush.msra.mxu1 %v446_v15  ;;  %v1168_v41 = vld [vmem:[#allocation8 + $0xd8] sm:$0xff]  ;;  %v1166_v47 = vld [vmem:[#allocation8 + $0xc8] sm:$0xff]  ;;  %v1203_v50 = vld [vmem:[#allocation8 + $0x1f0] sm:$0xff] }
  0x50   : > { %v1200_v42 = vld [vmem:[#allocation8 + $0x1d8] sm:$0xff]  ;;  %v1198_v48 = vld [vmem:[#allocation8 + $0x1c8] sm:$0xff]  ;;  %v1169_v51 = vld [vmem:[#allocation8 + $0xe0] sm:$0xff]  ;;  %1420 = vmatpush.msra.mxu3 %v1203_v50 }
  0x51   : > { %475 = vmatpush.msra.mxu0 %v443_v16  ;;  %684 = vmatpush.msra.mxu1 %v444_v17  ;;  %v372_v45 = vld [vmem:[%s3598_s10 + $0x38] sm:$0xff]  ;;  %v373_v46 = vld [vmem:[%s3598_s10 + $0x40] sm:$0xff]  ;;  %v374_v53 = vld [vmem:[%s3598_s10 + $0x48] sm:$0xff] }
  0x52   : > { %v1201_v52 = vld [vmem:[#allocation8 + $0x1e0] sm:$0xff]  ;;  %1212 = vmatpush.msra.mxu2 %v1169_v51  ;;  %v1167_v54 = vld [vmem:[#allocation8 + $0xd0] sm:$0xff]  ;;  %v1164_v17 = vld [vmem:[#allocation8 + $0xb8] sm:$0xff] }
  0x53   : > { %476 = vmatpush.msra.mxu0 %v441_v18  ;;  %685 = vmatpush.msra.mxu1 %v442_v19  ;;  %v1199_v55 = vld [vmem:[#allocation8 + $0x1d0] sm:$0xff]  ;;  %v1165_v56 = vld [vmem:[#allocation8 + $0xc0] sm:$0xff] }
  0x54   : > { %1421 = vmatpush.msra.mxu3 %v1201_v52  ;;  %1213 = vmatpush.msra.mxu2 %v1167_v54  ;;  %v1197_v57 = vld [vmem:[#allocation8 + $0x1c0] sm:$0xff]  ;;  %v1163_v58 = vld [vmem:[#allocation8 + $0xb0] sm:$0xff] }
  0x55   : > { %477 = vmatpush.msra.mxu0 %v439_v20  ;;  %686 = vmatpush.msra.mxu1 %v440_v21  ;;  %v1195_v59 = vld [vmem:[#allocation8 + $0x1b0] sm:$0xff]  ;;  %v1161_v60 = vld [vmem:[#allocation8 + $0xa0] sm:$0xff]  ;;  %v1196_v20 = vld [vmem:[#allocation8 + $0x1b8] sm:$0xff] }
  0x56   : > { %1422 = vmatpush.msra.mxu3 %v1199_v55  ;;  %1214 = vmatpush.msra.mxu2 %v1165_v56  ;;  %v1193_v61 = vld [vmem:[#allocation8 + $0x1a0] sm:$0xff]  ;;  %v375_v62 = vld [vmem:[%s3598_s10 + $0x50] sm:$0xff]  ;;  %v376_v7 = vld [vmem:[%s3598_s10 + $0x58] sm:$0xff] }
  0x57   : > { %478 = vmatpush.msra.mxu0 %v437_v22  ;;  %687 = vmatpush.msra.mxu1 %v438_v23  ;;  %v1159_v63 = vld [vmem:[#allocation8 + $0x90] sm:$0xff]  ;;  %v1157_v1 = vld [vmem:[#allocation8 + $0x80] sm:$0xff]  ;;  %v2318_v23 = vld [vmem:[#allocation10 + $0x78] sm:$0xff] }
  0x58   : > { %1423 = vmatpush.msra.mxu3 %v1197_v57  ;;  %1215 = vmatpush.msra.mxu2 %v1163_v58  ;;  %v1191_v0 = vld [vmem:[#allocation8 + $0x190] sm:$0xff]  ;;  %v1189_v2 = vld [vmem:[#allocation8 + $0x180] sm:$0xff] }
  0x59   : > { %479 = vmatpush.msra.mxu0 %v435_v24  ;;  %688 = vmatpush.msra.mxu1 %v436_v25  ;;  %v1155_v3 = vld [vmem:[#allocation8 + $0x70] sm:$0xff]  ;;  %v1153_v5 = vld [vmem:[#allocation8 + $0x60] sm:$0xff]  ;;  %v2334_v25 = vld [vmem:[#allocation10 + $0xf8] sm:$0xff] }
  0x5a   : > { %1424 = vmatpush.msra.mxu3 %v1195_v59  ;;  %1216 = vmatpush.msra.mxu2 %v1161_v60  ;;  %v1187_v4 = vld [vmem:[#allocation8 + $0x170] sm:$0xff]  ;;  %v1185_v6 = vld [vmem:[#allocation8 + $0x160] sm:$0xff] }
  0x5b   : > { %480 = vmatpush.msra.mxu0 %v433_v26  ;;  %689 = vmatpush.msra.mxu1 %v434_v27  ;;  %v1151_v8 = vld [vmem:[#allocation8 + $0x50] sm:$0xff]  ;;  %v1149_v10 = vld [vmem:[#allocation8 + $0x40] sm:$0xff] }
  0x5c   : > { %1425 = vmatpush.msra.mxu3 %v1193_v61  ;;  %1217 = vmatpush.msra.mxu2 %v1159_v63  ;;  %v1183_v9 = vld [vmem:[#allocation8 + $0x150] sm:$0xff]  ;;  %v1181_v11 = vld [vmem:[#allocation8 + $0x140] sm:$0xff] }
  0x5d   : > { %481 = vmatpush.msra.mxu0 %v431_v28  ;;  %690 = vmatpush.msra.mxu1 %v432_v29  ;;  %v1147_v12 = vld [vmem:[#allocation8 + $0x30] sm:$0xff]  ;;  %v377_v14 = vld [vmem:[%s3598_s10 + $0x60] sm:$0xff]  ;;  %v378_v24 = vld [vmem:[%s3598_s10 + $0x68] sm:$0xff] }
  0x5e   : > { %1426 = vmatpush.msra.mxu3 %v1191_v0  ;;  %1218 = vmatpush.msra.mxu2 %v1157_v1  ;;  %v1179_v13 = vld [vmem:[#allocation8 + $0x130] sm:$0xff]  ;;  %v1145_v15 = vld [vmem:[#allocation8 + $0x20] sm:$0xff]  ;;  %v461_v28 = vld [vmem:[#allocation7] sm:$0x3] }
  0x5f   : > { %482 = vmatpush.msra.mxu0 %v429_v30  ;;  %691 = vmatpush.msra.mxu1 %v430_v31  ;;  %v1177_v16 = vld [vmem:[#allocation8 + $0x120] sm:$0xff]  ;;  %v1143_v18 = vld [vmem:[#allocation8 + $0x10] sm:$0xff]  ;;  %v3628_v29 = vperm.slane %v461_v28, 0  ;;  %v3630_v30 = vperm.slane %v461_v28, 1 }
  0x60   : > { %483 = vmatmul.f32.vlgmr.msra.gmra.mxu0 %v365_v32  ;;  %692 = vmatmul.f32.vlgmr.msra.gmra.mxu1 %v365_v32  ;;  %v1175_v19 = vld [vmem:[#allocation8 + $0x110] sm:$0xff]  ;;  %v1141_v21 = vld [vmem:[#allocation8] sm:$0xff] }
  0x61   : > { %1629 = vmatpush.msrb.mxu0 %v1172_v33  ;;  %1838 = vmatpush.msrb.mxu1 %v1204_v34  ;;  %v1173_v22 = vld [vmem:[#allocation8 + $0x100] sm:$0xff]  ;;  %v379_v26 = vld [vmem:[%s3598_s10 + $0x70] sm:$0xff]  ;;  %v380_v27 = vld [vmem:[%s3598_s10 + $0x78] sm:$0xff] }
  0x62   : > { %1427 = vmatpush.msra.mxu3 %v1189_v2  ;;  %1219 = vmatpush.msra.mxu2 %v1155_v3  ;;  %v381_v33 = vld [vmem:[%s3598_s10 + $0x80] sm:$0xff]  ;;  %v383_v55 = vld [vmem:[%s3598_s10 + $0x90] sm:$0xff]  ;;  %v384_v0 = vld [vmem:[%s3598_s10 + $0x98] sm:$0xff] }
  0x63   : > { %1630 = vmatpush.msrb.mxu0 %v1170_v35  ;;  %1839 = vmatpush.msrb.mxu1 %v1202_v36 }
  0x64   : > { %1428 = vmatpush.msra.mxu3 %v1187_v4  ;;  %1220 = vmatpush.msra.mxu2 %v1153_v5 }
  0x65   : > { %1631 = vmatpush.msrb.mxu0 %v1168_v41  ;;  %1840 = vmatpush.msrb.mxu1 %v1200_v42  ;;  %v2317_v42 = vld [vmem:[#allocation10 + $0x70] sm:$0xff] }
  0x66   : > { %1429 = vmatpush.msra.mxu3 %v1185_v6  ;;  %1221 = vmatpush.msra.mxu2 %v1151_v8 }
  0x67   : > { %1632 = vmatpush.msrb.mxu0 %v1166_v47  ;;  %1841 = vmatpush.msrb.mxu1 %v1198_v48  ;;  %v2333_v48 = vld [vmem:[#allocation10 + $0xf0] sm:$0xff] }
  0x68   : > { %486 = vmatmul.f32.gmra.mxu0 %v366_v37  ;;  %695 = vmatmul.f32.gmra.mxu1 %v366_v37 }
  0x69   : > { %1430 = vmatpush.msra.mxu3 %v1183_v9  ;;  %1222 = vmatpush.msra.mxu2 %v1149_v10  ;;  %v385_v9 = vld [vmem:[%s3598_s10 + $0xa0] sm:$0xff] }
  0x6a   : > { %1633 = vmatpush.msrb.mxu0 %v1164_v17  ;;  %1842 = vmatpush.msrb.mxu1 %v1196_v20 }
  0x6b   : > { %1431 = vmatpush.msra.mxu3 %v1181_v11  ;;  %1223 = vmatpush.msra.mxu2 %v1147_v12 }
  0x6d   : > { %1432 = vmatpush.msra.mxu3 %v1179_v13  ;;  %1224 = vmatpush.msra.mxu2 %v1145_v15  ;;  %v1192_v15 = vld [vmem:[#allocation8 + $0x198] sm:$0xff] }
  0x6f   : > { %1433 = vmatpush.msra.mxu3 %v1177_v16  ;;  %1225 = vmatpush.msra.mxu2 %v1143_v18  ;;  %v2316_v18 = vld [vmem:[#allocation10 + $0x68] sm:$0xff] }
  0x70   : > { %489 = vmatmul.f32.gmra.mxu0 %v367_v38  ;;  %698 = vmatmul.f32.gmra.mxu1 %v367_v38  ;;  %v1162_v38 = vld [vmem:[#allocation8 + $0xa8] sm:$0xff] }
  0x71   : > { %1434 = vmatpush.msra.mxu3 %v1175_v19  ;;  %1226 = vmatpush.msra.mxu2 %v1141_v21  ;;  %v386_v21 = vld [vmem:[%s3598_s10 + $0xa8] sm:$0xff] }
  0x72   : > { %1634 = vmatpush.msrb.mxu0 %v1162_v38 }
  0x73   : > { %1435 = vmatpush.msra.mxu3 %v1173_v22  ;;  %2339 = vmatpush.msrb.mxu2 %v2318_v23 }
  0x75   : > { %2548 = vmatpush.msrb.mxu3 %v2334_v25  ;;  %2340 = vmatpush.msrb.mxu2 %v2317_v42 }
  0x77   : > { %2549 = vmatpush.msrb.mxu3 %v2333_v48  ;;  %2341 = vmatpush.msrb.mxu2 %v2316_v18 }
  0x78   : > { %492 = vmatmul.f32.gmra.mxu0 %v368_v39  ;;  %701 = vmatmul.f32.gmra.mxu1 %v368_v39  ;;  %v1194_v39 = vld [vmem:[#allocation8 + $0x1a8] sm:$0xff] }
  0x79   : > { %1843 = vmatpush.msrb.mxu1 %v1194_v39 }
  0x7b   : > { %1844 = vmatpush.msrb.mxu1 %v1192_v15 }
  0x80   : > { %495 = vmatmul.f32.gmra.mxu0 %v369_v40  ;;  %704 = vmatmul.f32.gmra.mxu1 %v369_v40 }
  0x88   : > { %498 = vmatmul.f32.gmra.mxu0 %v370_v43  ;;  %707 = vmatmul.f32.gmra.mxu1 %v370_v43 }
  0x90   : > { %501 = vmatmul.f32.gmra.mxu0 %v371_v44  ;;  %710 = vmatmul.f32.gmra.mxu1 %v371_v44 }
  0x98   : > { %504 = vmatmul.f32.gmra.mxu0 %v372_v45  ;;  %713 = vmatmul.f32.gmra.mxu1 %v372_v45  ;;  %v382_v45 = vld [vmem:[%s3598_s10 + $0x88] sm:$0xff] }
  0xa0   : > { %507 = vmatmul.f32.gmra.mxu0 %v373_v46  ;;  %716 = vmatmul.f32.gmra.mxu1 %v373_v46 }
  0xa8   : > { %510 = vmatmul.f32.gmra.mxu0 %v374_v53  ;;  %719 = vmatmul.f32.gmra.mxu1 %v374_v53 }
  0xb0   : > { %513 = vmatmul.f32.gmra.mxu0 %v375_v62  ;;  %722 = vmatmul.f32.gmra.mxu1 %v375_v62 }
  0xb8   : > { %516 = vmatmul.f32.gmra.mxu0 %v376_v7  ;;  %725 = vmatmul.f32.gmra.mxu1 %v376_v7 }
  0xc0   : > { %519 = vmatmul.f32.gmra.mxu0 %v377_v14  ;;  %728 = vmatmul.f32.gmra.mxu1 %v377_v14  ;;  %v1160_v14 = vld [vmem:[#allocation8 + $0x98] sm:$0xff] }
  0xc1   : > { %1635 = vmatpush.msrb.mxu0 %v1160_v14 }
  0xc8   : > { %522 = vmatmul.f32.gmra.mxu0 %v378_v24  ;;  %731 = vmatmul.f32.gmra.mxu1 %v378_v24  ;;  %v2332_v24 = vld [vmem:[#allocation10 + $0xe8] sm:$0xff] }
  0xc9   : > { %2550 = vmatpush.msrb.mxu3 %v2332_v24 }
  0xd0   : > { %525 = vmatmul.f32.gmra.mxu0 %v379_v26  ;;  %734 = vmatmul.f32.gmra.mxu1 %v379_v26 }
  0xd8   : > { %528 = vmatmul.f32.gmra.mxu0 %v380_v27  ;;  %737 = vmatmul.f32.gmra.mxu1 %v380_v27 }
  0xdd   : > { %v484_v31 = vpop.f32.mrf.mxu0  ;;  %v693_v32 = vpop.f32.mrf.mxu1 }
  0xde   : > { %v485_v34 = vadd.f32 %v484_v31, %v3628_v29  ;;  %v694_v35 = vadd.f32 %v693_v32, %v3630_v30 }
  0xe0   : > { %531 = vmatmul.f32.gmra.mxu0 %v381_v33  ;;  %740 = vmatmul.f32.gmra.mxu1 %v381_v33  ;;  %v885_v36 = vmul.f32 0.01, %v485_v34  ;;  %v886_v37 = vmul.f32 0.01, %v694_v35  ;;  %v387_v33 = vld [vmem:[%s3598_s10 + $0xb0] sm:$0xff] }
  0xe2   : > { %v3635_v40 = vmax.f32 %v485_v34, %v885_v36  ;;  %v3637_v41 = vmax.f32 %v694_v35, %v886_v37 }
  0xe4   : > { %1227 = vmatmul.f32.vlgmr.msra.gmra.mxu2 %v3635_v40  ;;  %1436 = vmatmul.f32.vlgmr.msra.gmra.mxu3 %v3637_v41 }
  0xe5   : > { %v487_v43 = vpop.f32.mrf.mxu0  ;;  %v696_v44 = vpop.f32.mrf.mxu1 }
  0xe6   : > { %v488_v46 = vadd.f32 %v487_v43, %v3628_v29  ;;  %v697_v47 = vadd.f32 %v696_v44, %v3630_v30  ;;  %v388_v44 = vld [vmem:[%s3598_s10 + $0xb8] sm:$0xff] }
  0xe8   : > { %534 = vmatmul.f32.gmra.mxu0 %v382_v45  ;;  %743 = vmatmul.f32.gmra.mxu1 %v382_v45  ;;  %v887_v49 = vmul.f32 0.01, %v488_v46  ;;  %v888_v50 = vmul.f32 0.01, %v697_v47 }
  0xea   : > { %v3644_v51 = vmax.f32 %v488_v46, %v887_v49  ;;  %v3646_v52 = vmax.f32 %v697_v47, %v888_v50 }
  0xec   : > { %1230 = vmatmul.f32.gmra.mxu2 %v3644_v51  ;;  %1439 = vmatmul.f32.gmra.mxu3 %v3646_v52 }
  0xed   : > { %v490_v53 = vpop.f32.mrf.mxu0  ;;  %v699_v54 = vpop.f32.mrf.mxu1 }
  0xee   : > { %v491_v56 = vadd.f32 %v490_v53, %v3628_v29  ;;  %v700_v57 = vadd.f32 %v699_v54, %v3630_v30 }
  0xf0   : > { %537 = vmatmul.f32.gmra.mxu0 %v383_v55  ;;  %746 = vmatmul.f32.gmra.mxu1 %v383_v55  ;;  %v889_v58 = vmul.f32 0.01, %v491_v56  ;;  %v890_v59 = vmul.f32 0.01, %v700_v57  ;;  %v389_v55 = vld [vmem:[%s3598_s10 + $0xc0] sm:$0xff] }
  0xf2   : > { %v3653_v60 = vmax.f32 %v491_v56, %v889_v58  ;;  %v3655_v61 = vmax.f32 %v700_v57, %v890_v59 }
  0xf4   : > { %1233 = vmatmul.f32.gmra.mxu2 %v3653_v60  ;;  %1442 = vmatmul.f32.gmra.mxu3 %v3655_v61 }
  0xf5   : > { %v493_v62 = vpop.f32.mrf.mxu0  ;;  %v702_v63 = vpop.f32.mrf.mxu1 }
  0xf6   : > { %v494_v1 = vadd.f32 %v493_v62, %v3628_v29  ;;  %v703_v2 = vadd.f32 %v702_v63, %v3630_v30  ;;  %v1158_v62 = vld [vmem:[#allocation8 + $0x88] sm:$0xff] }
  0xf7   : > { %v1190_v63 = vld [vmem:[#allocation8 + $0x188] sm:$0xff]  ;;  %1636 = vmatpush.msrb.mxu0 %v1158_v62 }
  0xf8   : > { %540 = vmatmul.f32.gmra.mxu0 %v384_v0  ;;  %749 = vmatmul.f32.gmra.mxu1 %v384_v0  ;;  %v891_v3 = vmul.f32 0.01, %v494_v1  ;;  %v892_v4 = vmul.f32 0.01, %v703_v2 }
  0xf9   : > { %1845 = vmatpush.msrb.mxu1 %v1190_v63  ;;  %v394_v63 = vld [vmem:[%s3598_s10 + $0xe8] sm:$0xff] }
  0xfa   : > { %v3662_v5 = vmax.f32 %v494_v1, %v891_v3  ;;  %v3664_v6 = vmax.f32 %v703_v2, %v892_v4  ;;  %v2315_v2 = vld [vmem:[#allocation10 + $0x60] sm:$0xff] }
  0xfb   : > { %2342 = vmatpush.msrb.mxu2 %v2315_v2 }
  0xfc   : > { %1236 = vmatmul.f32.gmra.mxu2 %v3662_v5  ;;  %1445 = vmatmul.f32.gmra.mxu3 %v3664_v6 }
  0xfd   : > { %v496_v7 = vpop.f32.mrf.mxu0  ;;  %v705_v8 = vpop.f32.mrf.mxu1 }
  0xfe   : > { %v497_v10 = vadd.f32 %v496_v7, %v3628_v29  ;;  %v706_v11 = vadd.f32 %v705_v8, %v3630_v30  ;;  %v390_v7 = vld [vmem:[%s3598_s10 + $0xc8] sm:$0xff] }
 0x100   : > { %543 = vmatmul.f32.gmra.mxu0 %v385_v9  ;;  %752 = vmatmul.f32.gmra.mxu1 %v385_v9  ;;  %v893_v12 = vmul.f32 0.01, %v497_v10  ;;  %v894_v13 = vmul.f32 0.01, %v706_v11 }
 0x102   : > { %v3671_v16 = vmax.f32 %v497_v10, %v893_v12  ;;  %v3673_v17 = vmax.f32 %v706_v11, %v894_v13  ;;  %v2331_v10 = vld [vmem:[#allocation10 + $0xe0] sm:$0xff] }
 0x103   : > { %2551 = vmatpush.msrb.mxu3 %v2331_v10 }
 0x104   : > { %1239 = vmatmul.f32.gmra.mxu2 %v3671_v16  ;;  %1448 = vmatmul.f32.gmra.mxu3 %v3673_v17 }
 0x105   : > { %v499_v19 = vpop.f32.mrf.mxu0  ;;  %v708_v20 = vpop.f32.mrf.mxu1 }
 0x106   : > { %v500_v22 = vadd.f32 %v499_v19, %v3628_v29  ;;  %v709_v23 = vadd.f32 %v708_v20, %v3630_v30  ;;  %v391_v19 = vld [vmem:[%s3598_s10 + $0xd0] sm:$0xff] }
 0x108   : > { %546 = vmatmul.f32.gmra.mxu0 %v386_v21  ;;  %755 = vmatmul.f32.gmra.mxu1 %v386_v21  ;;  %v895_v25 = vmul.f32 0.01, %v500_v22  ;;  %v896_v26 = vmul.f32 0.01, %v709_v23 }
 0x10a   : > { %v3680_v27 = vmax.f32 %v500_v22, %v895_v25  ;;  %v3682_v28 = vmax.f32 %v709_v23, %v896_v26 }
 0x10c   : > { %1242 = vmatmul.f32.gmra.mxu2 %v3680_v27  ;;  %1451 = vmatmul.f32.gmra.mxu3 %v3682_v28 }
 0x10d   : > { %v502_v31 = vpop.f32.mrf.mxu0  ;;  %v711_v32 = vpop.f32.mrf.mxu1 }
 0x10e   : > { %v503_v34 = vadd.f32 %v502_v31, %v3628_v29  ;;  %v712_v35 = vadd.f32 %v711_v32, %v3630_v30  ;;  %v392_v32 = vld [vmem:[%s3598_s10 + $0xd8] sm:$0xff] }
 0x110   : > { %549 = vmatmul.f32.gmra.mxu0 %v387_v33  ;;  %758 = vmatmul.f32.gmra.mxu1 %v387_v33  ;;  %v897_v36 = vmul.f32 0.01, %v503_v34  ;;  %v898_v37 = vmul.f32 0.01, %v712_v35 }
 0x112   : > { %v3689_v38 = vmax.f32 %v503_v34, %v897_v36  ;;  %v3691_v39 = vmax.f32 %v712_v35, %v898_v37 }
 0x114   : > { %1245 = vmatmul.f32.gmra.mxu2 %v3689_v38  ;;  %1454 = vmatmul.f32.gmra.mxu3 %v3691_v39 }
 0x115   : > { %v505_v42 = vpop.f32.mrf.mxu0  ;;  %v714_v43 = vpop.f32.mrf.mxu1 }
 0x116   : > { %v506_v45 = vadd.f32 %v505_v42, %v3628_v29  ;;  %v715_v46 = vadd.f32 %v714_v43, %v3630_v30 }
 0x118   : > { %552 = vmatmul.f32.gmra.mxu0 %v388_v44  ;;  %761 = vmatmul.f32.gmra.mxu1 %v388_v44  ;;  %v899_v47 = vmul.f32 0.01, %v506_v45  ;;  %v900_v48 = vmul.f32 0.01, %v715_v46 }
 0x11a   : > { %v3698_v49 = vmax.f32 %v506_v45, %v899_v47  ;;  %v3700_v50 = vmax.f32 %v715_v46, %v900_v48  ;;  %v393_v45 = vld [vmem:[%s3598_s10 + $0xe0] sm:$0xff] }
 0x11c   : > { %1248 = vmatmul.f32.gmra.mxu2 %v3698_v49  ;;  %1457 = vmatmul.f32.gmra.mxu3 %v3700_v50 }
 0x11d   : > { %v508_v53 = vpop.f32.mrf.mxu0  ;;  %v717_v54 = vpop.f32.mrf.mxu1 }
 0x11e   : > { %v509_v56 = vadd.f32 %v508_v53, %v3628_v29  ;;  %v718_v57 = vadd.f32 %v717_v54, %v3630_v30  ;;  %v1156_v54 = vld [vmem:[#allocation8 + $0x78] sm:$0xff] }
 0x11f   : > { %1637 = vmatpush.msrb.mxu0 %v1156_v54 }
 0x120   : > { %555 = vmatmul.f32.gmra.mxu0 %v389_v55  ;;  %764 = vmatmul.f32.gmra.mxu1 %v389_v55  ;;  %v901_v58 = vmul.f32 0.01, %v509_v56  ;;  %v902_v59 = vmul.f32 0.01, %v718_v57  ;;  %v1188_v55 = vld [vmem:[#allocation8 + $0x178] sm:$0xff] }
 0x121   : > { %1846 = vmatpush.msrb.mxu1 %v1188_v55 }
 0x122   : > { %v3707_v0 = vmax.f32 %v509_v56, %v901_v58  ;;  %v3709_v1 = vmax.f32 %v718_v57, %v902_v59  ;;  %v2314_v58 = vld [vmem:[#allocation10 + $0x58] sm:$0xff] }
 0x123   : > { %2343 = vmatpush.msrb.mxu2 %v2314_v58  ;;  %v1205_v58 = vld [vmem:[%s4958_s4] sm:$0x3] }
 0x124   : > { %1251 = vmatmul.f32.gmra.mxu2 %v3707_v0  ;;  %1460 = vmatmul.f32.gmra.mxu3 %v3709_v1 }
 0x125   : > { %v511_v3 = vpop.f32.mrf.mxu0  ;;  %v720_v4 = vpop.f32.mrf.mxu1 }
 0x126   : > { %v512_v8 = vadd.f32 %v511_v3, %v3628_v29  ;;  %v721_v9 = vadd.f32 %v720_v4, %v3630_v30  ;;  %v2330_v4 = vld [vmem:[#allocation10 + $0xd8] sm:$0xff] }
 0x127   : > { %2552 = vmatpush.msrb.mxu3 %v2330_v4  ;;  %v398_v4 = vld [vmem:[%s3598_s10 + $0x108] sm:$0xff] }
 0x128   : > { %558 = vmatmul.f32.gmra.mxu0 %v390_v7  ;;  %767 = vmatmul.f32.gmra.mxu1 %v390_v7  ;;  %v903_v11 = vmul.f32 0.01, %v512_v8  ;;  %v904_v12 = vmul.f32 0.01, %v721_v9 }
 0x12a   : > { %v3716_v13 = vmax.f32 %v512_v8, %v903_v11  ;;  %v3718_v14 = vmax.f32 %v721_v9, %v904_v12 }
 0x12c   : > { %1254 = vmatmul.f32.gmra.mxu2 %v3716_v13  ;;  %1463 = vmatmul.f32.gmra.mxu3 %v3718_v14 }
 0x12d   : > { %v514_v15 = vpop.f32.mrf.mxu0  ;;  %v723_v18 = vpop.f32.mrf.mxu1 }
 0x12e   : > { %v515_v20 = vadd.f32 %v514_v15, %v3628_v29  ;;  %v724_v21 = vadd.f32 %v723_v18, %v3630_v30  ;;  %v395_v15 = vld [vmem:[%s3598_s10 + $0xf0] sm:$0xff] }
 0x130   : > { %561 = vmatmul.f32.gmra.mxu0 %v391_v19  ;;  %770 = vmatmul.f32.gmra.mxu1 %v391_v19  ;;  %v905_v22 = vmul.f32 0.01, %v515_v20  ;;  %v906_v23 = vmul.f32 0.01, %v724_v21 }
 0x132   : > { %v3725_v24 = vmax.f32 %v515_v20, %v905_v22  ;;  %v3727_v25 = vmax.f32 %v724_v21, %v906_v23 }
 0x134   : > { %1257 = vmatmul.f32.gmra.mxu2 %v3725_v24  ;;  %1466 = vmatmul.f32.gmra.mxu3 %v3727_v25 }
 0x135   : > { %v517_v26 = vpop.f32.mrf.mxu0  ;;  %v726_v31 = vpop.f32.mrf.mxu1 }
 0x136   : > { %v518_v33 = vadd.f32 %v517_v26, %v3628_v29  ;;  %v727_v34 = vadd.f32 %v726_v31, %v3630_v30 }
 0x138   : > { %564 = vmatmul.f32.gmra.mxu0 %v392_v32  ;;  %773 = vmatmul.f32.gmra.mxu1 %v392_v32  ;;  %v907_v35 = vmul.f32 0.01, %v518_v33  ;;  %v908_v36 = vmul.f32 0.01, %v727_v34  ;;  %v396_v32 = vld [vmem:[%s3598_s10 + $0xf8] sm:$0xff] }
 0x13a   : > { %v3734_v37 = vmax.f32 %v518_v33, %v907_v35  ;;  %v3736_v42 = vmax.f32 %v727_v34, %v908_v36 }
 0x13c   : > { %1260 = vmatmul.f32.gmra.mxu2 %v3734_v37  ;;  %1469 = vmatmul.f32.gmra.mxu3 %v3736_v42 }
 0x13d   : > { %v520_v43 = vpop.f32.mrf.mxu0  ;;  %v729_v44 = vpop.f32.mrf.mxu1 }
 0x13e   : > { %v521_v46 = vadd.f32 %v520_v43, %v3628_v29  ;;  %v730_v47 = vadd.f32 %v729_v44, %v3630_v30 }
 0x140   : > { %567 = vmatmul.f32.gmra.mxu0 %v393_v45  ;;  %776 = vmatmul.f32.gmra.mxu1 %v393_v45  ;;  %v909_v48 = vmul.f32 0.01, %v521_v46  ;;  %v910_v53 = vmul.f32 0.01, %v730_v47 }
 0x142   : > { %v3743_v56 = vmax.f32 %v521_v46, %v909_v48  ;;  %v3745_v57 = vmax.f32 %v730_v47, %v910_v53  ;;  %v397_v47 = vld [vmem:[%s3598_s10 + $0x100] sm:$0xff] }
 0x144   : > { %1263 = vmatmul.f32.gmra.mxu2 %v3743_v56  ;;  %1472 = vmatmul.f32.gmra.mxu3 %v3745_v57 }
 0x145   : > { %v523_v59 = vpop.f32.mrf.mxu0  ;;  %v732_v62 = vpop.f32.mrf.mxu1 }
 0x146   : > { %v524_v2 = vadd.f32 %v523_v59, %v3628_v29  ;;  %v733_v3 = vadd.f32 %v732_v62, %v3630_v30 }
 0x148   : > { %570 = vmatmul.f32.gmra.mxu0 %v394_v63  ;;  %779 = vmatmul.f32.gmra.mxu1 %v394_v63  ;;  %v911_v7 = vmul.f32 0.01, %v524_v2  ;;  %v912_v8 = vmul.f32 0.01, %v733_v3  ;;  %v3788_v63 = vperm.slane %v1205_v58, 0 }
 0x14a   : > { %v3752_v9 = vmax.f32 %v524_v2, %v911_v7  ;;  %v3754_v10 = vmax.f32 %v733_v3, %v912_v8 }
 0x14c   : > { %1266 = vmatmul.f32.gmra.mxu2 %v3752_v9  ;;  %1475 = vmatmul.f32.gmra.mxu3 %v3754_v10 }
 0x14d   : > { %v526_v11 = vpop.f32.mrf.mxu0  ;;  %v735_v12 = vpop.f32.mrf.mxu1 }
 0x14e   : > { %v527_v18 = vadd.f32 %v526_v11, %v3628_v29  ;;  %v736_v19 = vadd.f32 %v735_v12, %v3630_v30  ;;  %v1154_v11 = vld [vmem:[#allocation8 + $0x68] sm:$0xff] }
 0x14f   : > { %v1186_v12 = vld [vmem:[#allocation8 + $0x168] sm:$0xff]  ;;  %1638 = vmatpush.msrb.mxu0 %v1154_v11  ;;  %v400_v11 = vld [vmem:[%s3598_s10 + $0x118] sm:$0xff] }
 0x150   : > { %573 = vmatmul.f32.gmra.mxu0 %v395_v15  ;;  %782 = vmatmul.f32.gmra.mxu1 %v395_v15  ;;  %v913_v20 = vmul.f32 0.01, %v527_v18  ;;  %v914_v21 = vmul.f32 0.01, %v736_v19  ;;  %v2313_v15 = vld [vmem:[#allocation10 + $0x50] sm:$0xff] }
 0x151   : > { %1847 = vmatpush.msrb.mxu1 %v1186_v12  ;;  %2344 = vmatpush.msrb.mxu2 %v2313_v15 }
 0x152   : > { %v3761_v22 = vmax.f32 %v527_v18, %v913_v20  ;;  %v3763_v23 = vmax.f32 %v736_v19, %v914_v21  ;;  %v2329_v20 = vld [vmem:[#allocation10 + $0xd0] sm:$0xff] }
 0x153   : > { %2553 = vmatpush.msrb.mxu3 %v2329_v20 }
 0x154   : > { %1269 = vmatmul.f32.gmra.mxu2 %v3761_v22  ;;  %1478 = vmatmul.f32.gmra.mxu3 %v3763_v23 }
 0x155   : > { %v529_v26 = vpop.f32.mrf.mxu0  ;;  %v738_v31 = vpop.f32.mrf.mxu1 }
 0x156   : > { %v530_v33 = vadd.f32 %v529_v26, %v3628_v29  ;;  %v739_v34 = vadd.f32 %v738_v31, %v3630_v30 }
 0x158   : > { %576 = vmatmul.f32.gmra.mxu0 %v396_v32  ;;  %785 = vmatmul.f32.gmra.mxu1 %v396_v32  ;;  %v915_v35 = vmul.f32 0.01, %v530_v33  ;;  %v916_v36 = vmul.f32 0.01, %v739_v34 }
 0x15a   : > { %v3770_v43 = vmax.f32 %v530_v33, %v915_v35  ;;  %v3772_v44 = vmax.f32 %v739_v34, %v916_v36 }
 0x15c   : > { %1272 = vmatmul.f32.gmra.mxu2 %v3770_v43  ;;  %1481 = vmatmul.f32.gmra.mxu3 %v3772_v44 }
 0x15d   : > { %v532_v45 = vpop.f32.mrf.mxu0  ;;  %v741_v46 = vpop.f32.mrf.mxu1 }
 0x15e   : > { %v533_v48 = vadd.f32 %v532_v45, %v3628_v29  ;;  %v742_v53 = vadd.f32 %v741_v46, %v3630_v30  ;;  %v399_v45 = vld [vmem:[%s3598_s10 + $0x110] sm:$0xff] }
 0x160   : > { %579 = vmatmul.f32.gmra.mxu0 %v397_v47  ;;  %788 = vmatmul.f32.gmra.mxu1 %v397_v47  ;;  %v917_v54 = vmul.f32 0.01, %v533_v48  ;;  %v918_v55 = vmul.f32 0.01, %v742_v53 }
 0x162   : > { %v3782_v59 = vmax.f32 %v533_v48, %v917_v54  ;;  %v3784_v62 = vmax.f32 %v742_v53, %v918_v55 }
 0x164   : > { %1275 = vmatmul.f32.gmra.mxu2 %v3782_v59  ;;  %1484 = vmatmul.f32.gmra.mxu3 %v3784_v62 }
 0x165   : > { %v535_v2 = vpop.f32.mrf.mxu0  ;;  %v744_v3 = vpop.f32.mrf.mxu1 }
 0x166   : > { %v536_v7 = vadd.f32 %v535_v2, %v3628_v29  ;;  %v745_v8 = vadd.f32 %v744_v3, %v3630_v30 }
 0x167   : > { %v1228_v18 = vpop.f32.mrf.mxu2  ;;  %v1437_v19 = vpop.f32.mrf.mxu3 }
 0x168   : > { %v1229_v21 = vadd.f32 %v1228_v18, %v3788_v63  ;;  %582 = vmatmul.f32.gmra.mxu0 %v398_v4  ;;  %791 = vmatmul.f32.gmra.mxu1 %v398_v4  ;;  %v919_v26 = vmul.f32 0.01, %v536_v7  ;;  %v920_v31 = vmul.f32 0.01, %v745_v8 }
 0x16a   : > { %v3794_v32 = vadd.f32 %v1437_v19, %v1229_v21  ;;  %v3796_v33 = vmax.f32 %v536_v7, %v919_v26  ;;  %v3798_v34 = vmax.f32 %v745_v8, %v920_v31 }
 0x16c   : > { %1278 = vmatmul.f32.gmra.mxu2 %v3796_v33  ;;  %1487 = vmatmul.f32.gmra.mxu3 %v3798_v34 }
 0x16d   : > { %v538_v35 = vpop.f32.mrf.mxu0  ;;  %v747_v36 = vpop.f32.mrf.mxu1 }
 0x16e   : > { %v539_v46 = vadd.f32 %v538_v35, %v3628_v29  ;;  %v748_v47 = vadd.f32 %v747_v36, %v3630_v30 }
 0x16f   : > { %v1231_v48 = vpop.f32.mrf.mxu2  ;;  %v1440_v53 = vpop.f32.mrf.mxu3 }
 0x170   : > { %v1232_v54 = vadd.f32 %v1231_v48, %v3788_v63  ;;  %585 = vmatmul.f32.gmra.mxu0 %v399_v45  ;;  %794 = vmatmul.f32.gmra.mxu1 %v399_v45  ;;  %v921_v55 = vmul.f32 0.01, %v539_v46  ;;  %v922_v58 = vmul.f32 0.01, %v748_v47 }
 0x172   : > { %v3806_v2 = vadd.f32 %v1440_v53, %v1232_v54  ;;  %v3808_v3 = vmax.f32 %v539_v46, %v921_v55  ;;  %v3810_v4 = vmax.f32 %v748_v47, %v922_v58  ;;  %v401_v47 = vld [vmem:[%s3598_s10 + $0x120] sm:$0xff] }
 0x174   : > { %1281 = vmatmul.f32.gmra.mxu2 %v3808_v3  ;;  %1490 = vmatmul.f32.gmra.mxu3 %v3810_v4 }
 0x175   : > { %v541_v7 = vpop.f32.mrf.mxu0  ;;  %v750_v8 = vpop.f32.mrf.mxu1 }
 0x176   : > { %v542_v12 = vadd.f32 %v541_v7, %v3628_v29  ;;  %v751_v15 = vadd.f32 %v750_v8, %v3630_v30 }
 0x177   : > { %v1234_v18 = vpop.f32.mrf.mxu2  ;;  %v1443_v19 = vpop.f32.mrf.mxu3 }
 0x178   : > { %v1235_v20 = vadd.f32 %v1234_v18, %v3788_v63  ;;  %588 = vmatmul.f32.gmra.mxu0 %v400_v11  ;;  %797 = vmatmul.f32.gmra.mxu1 %v400_v11  ;;  %v923_v21 = vmul.f32 0.01, %v542_v12  ;;  %v924_v26 = vmul.f32 0.01, %v751_v15 }
 0x17a   : > { %v3818_v31 = vadd.f32 %v1443_v19, %v1235_v20  ;;  %v3820_v35 = vmax.f32 %v542_v12, %v923_v21  ;;  %v3822_v36 = vmax.f32 %v751_v15, %v924_v26  ;;  %v402_v20 = vld [vmem:[%s3598_s10 + $0x128] sm:$0xff] }
 0x17c   : > { %1284 = vmatmul.f32.gmra.mxu2 %v3820_v35  ;;  %1493 = vmatmul.f32.gmra.mxu3 %v3822_v36 }
 0x17d   : > { %v544_v45 = vpop.f32.mrf.mxu0  ;;  %v753_v46 = vpop.f32.mrf.mxu1 }
 0x17e   : > { %v545_v48 = vadd.f32 %v544_v45, %v3628_v29  ;;  %v754_v53 = vadd.f32 %v753_v46, %v3630_v30  ;;  %v1152_v45 = vld [vmem:[#allocation8 + $0x58] sm:$0xff] }
 0x17f   : > { %v1237_v54 = vpop.f32.mrf.mxu2  ;;  %v1446_v55 = vpop.f32.mrf.mxu3  ;;  %v1184_v46 = vld [vmem:[#allocation8 + $0x158] sm:$0xff]  ;;  %1639 = vmatpush.msrb.mxu0 %v1152_v45 }
 0x180   : > { %v1238_v58 = vadd.f32 %v1237_v54, %v3788_v63  ;;  %591 = vmatmul.f32.gmra.mxu0 %v401_v47  ;;  %800 = vmatmul.f32.gmra.mxu1 %v401_v47  ;;  %v925_v7 = vmul.f32 0.01, %v545_v48  ;;  %v926_v8 = vmul.f32 0.01, %v754_v53  ;;  %v2312_v47 = vld [vmem:[#allocation10 + $0x48] sm:$0xff] }
 0x181   : > { %1848 = vmatpush.msrb.mxu1 %v1184_v46  ;;  %2345 = vmatpush.msrb.mxu2 %v2312_v47 }
 0x182   : > { %v3830_v11 = vadd.f32 %v1446_v55, %v1238_v58  ;;  %v3832_v12 = vmax.f32 %v545_v48, %v925_v7  ;;  %v3834_v15 = vmax.f32 %v754_v53, %v926_v8 }
 0x184   : > { %5079 = vst [vmem:[#allocation16_spill] sm:$0xff] %v3832_v12  ;;  %1287 = vmatmul.f32.gmra.mxu2 %v3832_v12  ;;  %1496 = vmatmul.f32.gmra.mxu3 %v3834_v15 }
 0x185   : > { %5080 = vst [vmem:[#allocation17_spill] sm:$0xff] %v3834_v15  ;;  %v547_v18 = vpop.f32.mrf.mxu0  ;;  %v756_v19 = vpop.f32.mrf.mxu1 }
 0x186   : > { %v548_v21 = vadd.f32 %v547_v18, %v3628_v29  ;;  %v757_v26 = vadd.f32 %v756_v19, %v3630_v30  ;;  %v2328_v19 = vld [vmem:[#allocation10 + $0xc8] sm:$0xff] }
 0x187   : > { %v1240_v54 = vpop.f32.mrf.mxu2  ;;  %v1449_v55 = vpop.f32.mrf.mxu3  ;;  %2554 = vmatpush.msrb.mxu3 %v2328_v19 }
 0x188   : > { %v1241_v48 = vadd.f32 %v1240_v54, %v3788_v63  ;;  %594 = vmatmul.f32.gmra.mxu0 %v402_v20  ;;  %803 = vmatmul.f32.gmra.mxu1 %v402_v20  ;;  %v927_v53 = vmul.f32 0.01, %v548_v21  ;;  %v928_v58 = vmul.f32 0.01, %v757_v26  ;;  %v403_v54 = vld [vmem:[%s3598_s10 + $0x130] sm:$0xff] }
 0x18a   : > { %v3842_v7 = vadd.f32 %v1449_v55, %v1241_v48  ;;  %v3844_v8 = vmax.f32 %v548_v21, %v927_v53  ;;  %v3846_v18 = vmax.f32 %v757_v26, %v928_v58 }
 0x18c   : > { %5081 = vst [vmem:[#allocation18_spill] sm:$0xff] %v3842_v7  ;;  %1290 = vmatmul.f32.gmra.mxu2 %v3844_v8  ;;  %1499 = vmatmul.f32.gmra.mxu3 %v3846_v18  ;;  %v1182_v7 = vld [vmem:[#allocation8 + $0x148] sm:$0xff] }
 0x18d   : > { %5082 = vst [vmem:[#allocation19_spill] sm:$0xff] %v3844_v8  ;;  %v550_v45 = vpop.f32.mrf.mxu0  ;;  %v759_v46 = vpop.f32.mrf.mxu1  ;;  %v404_v8 = vld [vmem:[%s3598_s10 + $0x138] sm:$0xff]  ;;  %1849 = vmatpush.msrb.mxu1 %v1182_v7 }
 0x18e   : > { %5083 = vst [vmem:[#allocation20_spill] sm:$0xff] %v3846_v18  ;;  %v551_v20 = vadd.f32 %v550_v45, %v3628_v29  ;;  %v760_v47 = vadd.f32 %v759_v46, %v3630_v30 }
 0x18f   : > { %v1243_v55 = vpop.f32.mrf.mxu2  ;;  %v1452_v48 = vpop.f32.mrf.mxu3 }
 0x190   : > { %v1244_v21 = vadd.f32 %v1243_v55, %v3788_v63  ;;  %597 = vmatmul.f32.gmra.mxu0 %v403_v54  ;;  %806 = vmatmul.f32.gmra.mxu1 %v403_v54  ;;  %v929_v26 = vmul.f32 0.01, %v551_v20  ;;  %v930_v53 = vmul.f32 0.01, %v760_v47 }
 0x192   : > { %v3854_v58 = vadd.f32 %v1452_v48, %v1244_v21  ;;  %v3856_v19 = vmax.f32 %v551_v20, %v929_v26  ;;  %v3858_v18 = vmax.f32 %v760_v47, %v930_v53 }
 0x194   : > { %5084 = vst [vmem:[#allocation21_spill] sm:$0xff] %v3854_v58  ;;  %1293 = vmatmul.f32.gmra.mxu2 %v3856_v19  ;;  %1502 = vmatmul.f32.gmra.mxu3 %v3858_v18 }
 0x195   : > { %5085 = vst [vmem:[#allocation22_spill] sm:$0xff] %v3856_v19  ;;  %v553_v45 = vpop.f32.mrf.mxu0  ;;  %v762_v46 = vpop.f32.mrf.mxu1 }
 0x196   : > { %5086 = vst [vmem:[#allocation23_spill] sm:$0xff] %v3858_v18  ;;  %v554_v15 = vadd.f32 %v553_v45, %v3628_v29  ;;  %v763_v54 = vadd.f32 %v762_v46, %v3630_v30  ;;  %v405_v18 = vld [vmem:[%s3598_s10 + $0x140] sm:$0xff] }
 0x197   : > { %v1246_v55 = vpop.f32.mrf.mxu2  ;;  %v1455_v12 = vpop.f32.mrf.mxu3 }
 0x198   : > { %v1247_v48 = vadd.f32 %v1246_v55, %v3788_v63  ;;  %600 = vmatmul.f32.gmra.mxu0 %v404_v8  ;;  %809 = vmatmul.f32.gmra.mxu1 %v404_v8  ;;  %v931_v20 = vmul.f32 0.01, %v554_v15  ;;  %v932_v47 = vmul.f32 0.01, %v763_v54 }
 0x19a   : > { %v3866_v21 = vadd.f32 %v1455_v12, %v1247_v48  ;;  %v3868_v26 = vmax.f32 %v554_v15, %v931_v20  ;;  %v3870_v53 = vmax.f32 %v763_v54, %v932_v47 }
 0x19c   : > { %5087 = vst [vmem:[#allocation24_spill] sm:$0xff] %v3866_v21  ;;  %1296 = vmatmul.f32.gmra.mxu2 %v3868_v26  ;;  %1505 = vmatmul.f32.gmra.mxu3 %v3870_v53 }
 0x19d   : > { %5088 = vst [vmem:[#allocation25_spill] sm:$0xff] %v3868_v26  ;;  %v556_v45 = vpop.f32.mrf.mxu0  ;;  %v765_v46 = vpop.f32.mrf.mxu1 }
 0x19e   : > { %5089 = vst [vmem:[#allocation26_spill] sm:$0xff] %v3870_v53  ;;  %v557_v19 = vadd.f32 %v556_v45, %v3628_v29  ;;  %v766_v8 = vadd.f32 %v765_v46, %v3630_v30  ;;  %v406_v53 = vld [vmem:[%s3598_s10 + $0x148] sm:$0xff] }
 0x19f   : > { %v1249_v55 = vpop.f32.mrf.mxu2  ;;  %v1458_v58 = vpop.f32.mrf.mxu3 }
 0x1a0   : > { %v933_v12 = vmul.f32 0.01, %v557_v19  ;;  %v934_v48 = vmul.f32 0.01, %v766_v8  ;;  %v1250_v15 = vadd.f32 %v1249_v55, %v3788_v63  ;;  %603 = vmatmul.f32.gmra.mxu0 %v405_v18  ;;  %812 = vmatmul.f32.gmra.mxu1 %v405_v18  ;;  %v1150_v55 = vld [vmem:[#allocation8 + $0x48] sm:$0xff]  ;;  %v2311_v18 = vld [vmem:[#allocation10 + $0x40] sm:$0xff] }
 0x1a1   : > { %1640 = vmatpush.msrb.mxu0 %v1150_v55  ;;  %2346 = vmatpush.msrb.mxu2 %v2311_v18 }
 0x1a2   : > { %v3878_v54 = vmax.f32 %v557_v19, %v933_v12  ;;  %v3880_v20 = vmax.f32 %v766_v8, %v934_v48  ;;  %v3882_v47 = vadd.f32 %v1458_v58, %v1250_v15 }
 0x1a4   : > { %5090 = vst [vmem:[#allocation27_spill] sm:$0xff] %v3878_v54  ;;  %1299 = vmatmul.f32.gmra.mxu2 %v3878_v54  ;;  %1508 = vmatmul.f32.gmra.mxu3 %v3880_v20  ;;  %v407_v54 = vld [vmem:[%s3598_s10 + $0x150] sm:$0xff] }
 0x1a5   : > { %5091 = vst [vmem:[#allocation28_spill] sm:$0xff] %v3880_v20  ;;  %v559_v45 = vpop.f32.mrf.mxu0  ;;  %v768_v46 = vpop.f32.mrf.mxu1  ;;  %v2327_v20 = vld [vmem:[#allocation10 + $0xc0] sm:$0xff] }
 0x1a6   : > { %5092 = vst [vmem:[#allocation29_spill] sm:$0xff] %v3882_v47  ;;  %v560_v26 = vadd.f32 %v559_v45, %v3628_v29  ;;  %v769_v21 = vadd.f32 %v768_v46, %v3630_v30  ;;  %2555 = vmatpush.msrb.mxu3 %v2327_v20  ;;  %v1180_v47 = vld [vmem:[#allocation8 + $0x138] sm:$0xff] }
 0x1a7   : > { %v1252_v19 = vpop.f32.mrf.mxu2  ;;  %v1461_v12 = vpop.f32.mrf.mxu3  ;;  %1850 = vmatpush.msrb.mxu1 %v1180_v47 }
 0x1a8   : > { %v935_v58 = vmul.f32 0.01, %v560_v26  ;;  %v936_v8 = vmul.f32 0.01, %v769_v21  ;;  %v1253_v48 = vadd.f32 %v1252_v19, %v3788_v63  ;;  %606 = vmatmul.f32.gmra.mxu0 %v406_v53  ;;  %815 = vmatmul.f32.gmra.mxu1 %v406_v53 }
 0x1aa   : > { %v3890_v15 = vmax.f32 %v560_v26, %v935_v58  ;;  %v3892_v45 = vmax.f32 %v769_v21, %v936_v8  ;;  %v3894_v46 = vadd.f32 %v1461_v12, %v1253_v48 }
 0x1ac   : > { %5093 = vst [vmem:[#allocation30_spill] sm:$0xff] %v3890_v15  ;;  %1302 = vmatmul.f32.gmra.mxu2 %v3890_v15  ;;  %1511 = vmatmul.f32.gmra.mxu3 %v3892_v45 }
 0x1ad   : > { %5094 = vst [vmem:[#allocation31_spill] sm:$0xff] %v3892_v45  ;;  %v562_v7 = vpop.f32.mrf.mxu0  ;;  %v771_v55 = vpop.f32.mrf.mxu1  ;;  %v408_v45 = vld [vmem:[%s3598_s10 + $0x158] sm:$0xff] }
 0x1ae   : > { %5095 = vst [vmem:[#allocation32_spill] sm:$0xff] %v3894_v46  ;;  %v563_v19 = vadd.f32 %v562_v7, %v3628_v29  ;;  %v772_v53 = vadd.f32 %v771_v55, %v3630_v30 }
 0x1af   : > { %v1255_v26 = vpop.f32.mrf.mxu2  ;;  %v1464_v18 = vpop.f32.mrf.mxu3 }
 0x1b0   : > { %v937_v21 = vmul.f32 0.01, %v563_v19  ;;  %v938_v58 = vmul.f32 0.01, %v772_v53  ;;  %v1256_v12 = vadd.f32 %v1255_v26, %v3788_v63  ;;  %609 = vmatmul.f32.gmra.mxu0 %v407_v54  ;;  %818 = vmatmul.f32.gmra.mxu1 %v407_v54 }
 0x1b2   : > { %v3902_v20 = vmax.f32 %v563_v19, %v937_v21  ;;  %v3904_v8 = vmax.f32 %v772_v53, %v938_v58  ;;  %v3906_v48 = vadd.f32 %v1464_v18, %v1256_v12 }
 0x1b4   : > { %5096 = vst [vmem:[#allocation33_spill] sm:$0xff] %v3902_v20  ;;  %1305 = vmatmul.f32.gmra.mxu2 %v3902_v20  ;;  %1514 = vmatmul.f32.gmra.mxu3 %v3904_v8 }
 0x1b5   : > { %5097 = vst [vmem:[#allocation34_spill] sm:$0xff] %v3904_v8  ;;  %v565_v7 = vpop.f32.mrf.mxu0  ;;  %v774_v55 = vpop.f32.mrf.mxu1  ;;  %v409_v8 = vld [vmem:[%s3598_s10 + $0x160] sm:$0xff] }
 0x1b6   : > { %5098 = vst [vmem:[#allocation35_spill] sm:$0xff] %v3906_v48  ;;  %v566_v15 = vadd.f32 %v565_v7, %v3628_v29  ;;  %v775_v26 = vadd.f32 %v774_v55, %v3630_v30 }
 0x1b7   : > { %v1258_v46 = vpop.f32.mrf.mxu2  ;;  %v1467_v54 = vpop.f32.mrf.mxu3 }
 0x1b8   : > { %v939_v19 = vmul.f32 0.01, %v566_v15  ;;  %v940_v21 = vmul.f32 0.01, %v775_v26  ;;  %v1259_v53 = vadd.f32 %v1258_v46, %v3788_v63  ;;  %612 = vmatmul.f32.gmra.mxu0 %v408_v45  ;;  %821 = vmatmul.f32.gmra.mxu1 %v408_v45 }
 0x1ba   : > { %v3914_v18 = vmax.f32 %v566_v15, %v939_v19  ;;  %v3916_v58 = vmax.f32 %v775_v26, %v940_v21  ;;  %v3918_v12 = vadd.f32 %v1467_v54, %v1259_v53 }
 0x1bc   : > { %5099 = vst [vmem:[#allocation36_spill] sm:$0xff] %v3914_v18  ;;  %1308 = vmatmul.f32.gmra.mxu2 %v3914_v18  ;;  %1517 = vmatmul.f32.gmra.mxu3 %v3916_v58 }
 0x1bd   : > { %5100 = vst [vmem:[#allocation37_spill] sm:$0xff] %v3916_v58  ;;  %v568_v7 = vpop.f32.mrf.mxu0  ;;  %v777_v55 = vpop.f32.mrf.mxu1  ;;  %v410_v58 = vld [vmem:[%s3598_s10 + $0x168] sm:$0xff] }
 0x1be   : > { %5101 = vst [vmem:[#allocation38_spill] sm:$0xff] %v3918_v12  ;;  %v569_v20 = vadd.f32 %v568_v7, %v3628_v29  ;;  %v778_v46 = vadd.f32 %v777_v55, %v3630_v30 }
 0x1bf   : > { %v1261_v48 = vpop.f32.mrf.mxu2  ;;  %v1470_v45 = vpop.f32.mrf.mxu3 }
 0x1c0   : > { %v941_v15 = vmul.f32 0.01, %v569_v20  ;;  %v942_v19 = vmul.f32 0.01, %v778_v46  ;;  %v1262_v26 = vadd.f32 %v1261_v48, %v3788_v63  ;;  %615 = vmatmul.f32.gmra.mxu0 %v409_v8  ;;  %824 = vmatmul.f32.gmra.mxu1 %v409_v8  ;;  %v1148_v48 = vld [vmem:[#allocation8 + $0x38] sm:$0xff] }
 0x1c1   : > { %v2310_v8 = vld [vmem:[#allocation10 + $0x38] sm:$0xff]  ;;  %1641 = vmatpush.msrb.mxu0 %v1148_v48 }
 0x1c2   : > { %v3926_v54 = vmax.f32 %v569_v20, %v941_v15  ;;  %v3928_v21 = vmax.f32 %v778_v46, %v942_v19  ;;  %v3930_v53 = vadd.f32 %v1470_v45, %v1262_v26  ;;  %2347 = vmatpush.msrb.mxu2 %v2310_v8 }
 0x1c4   : > { %5102 = vst [vmem:[#allocation39_spill] sm:$0xff] %v3926_v54  ;;  %1311 = vmatmul.f32.gmra.mxu2 %v3926_v54  ;;  %1520 = vmatmul.f32.gmra.mxu3 %v3928_v21  ;;  %v411_v54 = vld [vmem:[%s3598_s10 + $0x170] sm:$0xff] }
 0x1c5   : > { %5103 = vst [vmem:[#allocation40_spill] sm:$0xff] %v3928_v21  ;;  %v571_v7 = vpop.f32.mrf.mxu0  ;;  %v780_v55 = vpop.f32.mrf.mxu1  ;;  %v2326_v21 = vld [vmem:[#allocation10 + $0xb8] sm:$0xff] }
 0x1c6   : > { %5104 = vst [vmem:[#allocation41_spill] sm:$0xff] %v3930_v53  ;;  %v572_v18 = vadd.f32 %v571_v7, %v3628_v29  ;;  %v781_v12 = vadd.f32 %v780_v55, %v3630_v30  ;;  %2556 = vmatpush.msrb.mxu3 %v2326_v21  ;;  %v1178_v53 = vld [vmem:[#allocation8 + $0x128] sm:$0xff] }
 0x1c7   : > { %v1264_v20 = vpop.f32.mrf.mxu2  ;;  %v1473_v15 = vpop.f32.mrf.mxu3  ;;  %1851 = vmatpush.msrb.mxu1 %v1178_v53 }
 0x1c8   : > { %v943_v46 = vmul.f32 0.01, %v572_v18  ;;  %v944_v45 = vmul.f32 0.01, %v781_v12  ;;  %v1265_v19 = vadd.f32 %v1264_v20, %v3788_v63  ;;  %618 = vmatmul.f32.gmra.mxu0 %v410_v58  ;;  %827 = vmatmul.f32.gmra.mxu1 %v410_v58 }
 0x1ca   : > { %v3938_v26 = vmax.f32 %v572_v18, %v943_v46  ;;  %v3940_v7 = vmax.f32 %v781_v12, %v944_v45  ;;  %v3942_v55 = vadd.f32 %v1473_v15, %v1265_v19 }
 0x1cc   : > { %5105 = vst [vmem:[#allocation42_spill] sm:$0xff] %v3938_v26  ;;  %1314 = vmatmul.f32.gmra.mxu2 %v3938_v26  ;;  %1523 = vmatmul.f32.gmra.mxu3 %v3940_v7 }
 0x1cd   : > { %5106 = vst [vmem:[#allocation43_spill] sm:$0xff] %v3940_v7  ;;  %v574_v47 = vpop.f32.mrf.mxu0  ;;  %v783_v48 = vpop.f32.mrf.mxu1  ;;  %v412_v7 = vld [vmem:[%s3598_s10 + $0x178] sm:$0xff] }
 0x1ce   : > { %5107 = vst [vmem:[#allocation44_spill] sm:$0xff] %v3942_v55  ;;  %v575_v20 = vadd.f32 %v574_v47, %v3628_v29  ;;  %v784_v58 = vadd.f32 %v783_v48, %v3630_v30 }
 0x1cf   : > { %v1267_v18 = vpop.f32.mrf.mxu2  ;;  %v1476_v8 = vpop.f32.mrf.mxu3 }
 0x1d0   : > { %v945_v12 = vmul.f32 0.01, %v575_v20  ;;  %v946_v46 = vmul.f32 0.01, %v784_v58  ;;  %v1268_v15 = vadd.f32 %v1267_v18, %v3788_v63  ;;  %621 = vmatmul.f32.gmra.mxu0 %v411_v54  ;;  %830 = vmatmul.f32.gmra.mxu1 %v411_v54 }
 0x1d2   : > { %v3950_v21 = vmax.f32 %v575_v20, %v945_v12  ;;  %v3952_v45 = vmax.f32 %v784_v58, %v946_v46  ;;  %v3954_v19 = vadd.f32 %v1476_v8, %v1268_v15 }
 0x1d4   : > { %5108 = vst [vmem:[#allocation45_spill] sm:$0xff] %v3950_v21  ;;  %1317 = vmatmul.f32.gmra.mxu2 %v3950_v21  ;;  %1526 = vmatmul.f32.gmra.mxu3 %v3952_v45 }
 0x1d5   : > { %5109 = vst [vmem:[#allocation46_spill] sm:$0xff] %v3952_v45  ;;  %v577_v47 = vpop.f32.mrf.mxu0  ;;  %v786_v48 = vpop.f32.mrf.mxu1  ;;  %v413_v45 = vld [vmem:[%s3598_s10 + $0x180] sm:$0xff] }
 0x1d6   : > { %5110 = vst [vmem:[#allocation47_spill] sm:$0xff] %v3954_v19  ;;  %v578_v26 = vadd.f32 %v577_v47, %v3628_v29  ;;  %v787_v18 = vadd.f32 %v786_v48, %v3630_v30 }
 0x1d7   : > { %v1270_v55 = vpop.f32.mrf.mxu2  ;;  %v1479_v54 = vpop.f32.mrf.mxu3 }
 0x1d8   : > { %v947_v20 = vmul.f32 0.01, %v578_v26  ;;  %v948_v12 = vmul.f32 0.01, %v787_v18  ;;  %v1271_v58 = vadd.f32 %v1270_v55, %v3788_v63  ;;  %624 = vmatmul.f32.gmra.mxu0 %v412_v7  ;;  %833 = vmatmul.f32.gmra.mxu1 %v412_v7 }
 0x1da   : > { %v3962_v8 = vmax.f32 %v578_v26, %v947_v20  ;;  %v3964_v46 = vmax.f32 %v787_v18, %v948_v12  ;;  %v3966_v15 = vadd.f32 %v1479_v54, %v1271_v58 }
 0x1dc   : > { %5111 = vst [vmem:[#allocation48_spill] sm:$0xff] %v3962_v8  ;;  %1320 = vmatmul.f32.gmra.mxu2 %v3962_v8  ;;  %1529 = vmatmul.f32.gmra.mxu3 %v3964_v46 }
 0x1dd   : > { %5112 = vst [vmem:[#allocation49_spill] sm:$0xff] %v3964_v46  ;;  %v580_v47 = vpop.f32.mrf.mxu0  ;;  %v789_v48 = vpop.f32.mrf.mxu1  ;;  %v414_v46 = vld [vmem:[%s3598_s10 + $0x188] sm:$0xff] }
 0x1de   : > { %5113 = vst [vmem:[#allocation50_spill] sm:$0xff] %v3966_v15  ;;  %v581_v21 = vadd.f32 %v580_v47, %v3628_v29  ;;  %v790_v55 = vadd.f32 %v789_v48, %v3630_v30 }
 0x1df   : > { %v1273_v19 = vpop.f32.mrf.mxu2  ;;  %v1482_v7 = vpop.f32.mrf.mxu3 }
 0x1e0   : > { %v949_v26 = vmul.f32 0.01, %v581_v21  ;;  %v950_v20 = vmul.f32 0.01, %v790_v55  ;;  %v1274_v18 = vadd.f32 %v1273_v19, %v3788_v63  ;;  %627 = vmatmul.f32.gmra.mxu0 %v413_v45  ;;  %836 = vmatmul.f32.gmra.mxu1 %v413_v45  ;;  %v1146_v19 = vld [vmem:[#allocation8 + $0x28] sm:$0xff]  ;;  %v2309_v45 = vld [vmem:[#allocation10 + $0x30] sm:$0xff] }
 0x1e1   : > { %1642 = vmatpush.msrb.mxu0 %v1146_v19  ;;  %2348 = vmatpush.msrb.mxu2 %v2309_v45 }
 0x1e2   : > { %v3974_v54 = vmax.f32 %v581_v21, %v949_v26  ;;  %v3976_v12 = vmax.f32 %v790_v55, %v950_v20  ;;  %v3978_v58 = vadd.f32 %v1482_v7, %v1274_v18 }
 0x1e4   : > { %5114 = vst [vmem:[#allocation51_spill] sm:$0xff] %v3974_v54  ;;  %1323 = vmatmul.f32.gmra.mxu2 %v3974_v54  ;;  %1532 = vmatmul.f32.gmra.mxu3 %v3976_v12  ;;  %v415_v54 = vld [vmem:[%s3598_s10 + $0x190] sm:$0xff] }
 0x1e5   : > { %5115 = vst [vmem:[#allocation52_spill] sm:$0xff] %v3976_v12  ;;  %v583_v47 = vpop.f32.mrf.mxu0  ;;  %v792_v48 = vpop.f32.mrf.mxu1  ;;  %v2325_v12 = vld [vmem:[#allocation10 + $0xb0] sm:$0xff] }
 0x1e6   : > { %5116 = vst [vmem:[#allocation53_spill] sm:$0xff] %v3978_v58  ;;  %v584_v8 = vadd.f32 %v583_v47, %v3628_v29  ;;  %v793_v15 = vadd.f32 %v792_v48, %v3630_v30  ;;  %2557 = vmatpush.msrb.mxu3 %v2325_v12  ;;  %v1176_v58 = vld [vmem:[#allocation8 + $0x118] sm:$0xff] }
 0x1e7   : > { %v1276_v21 = vpop.f32.mrf.mxu2  ;;  %v1485_v26 = vpop.f32.mrf.mxu3  ;;  %1852 = vmatpush.msrb.mxu1 %v1176_v58 }
 0x1e8   : > { %v951_v55 = vmul.f32 0.01, %v584_v8  ;;  %v952_v7 = vmul.f32 0.01, %v793_v15  ;;  %v1277_v20 = vadd.f32 %v1276_v21, %v3788_v63  ;;  %630 = vmatmul.f32.gmra.mxu0 %v414_v46  ;;  %839 = vmatmul.f32.gmra.mxu1 %v414_v46 }
 0x1ea   : > { %v3986_v18 = vmax.f32 %v584_v8, %v951_v55  ;;  %v3988_v47 = vmax.f32 %v793_v15, %v952_v7  ;;  %v3990_v48 = vadd.f32 %v1485_v26, %v1277_v20 }
 0x1ec   : > { %5117 = vst [vmem:[#allocation54_spill] sm:$0xff] %v3986_v18  ;;  %1326 = vmatmul.f32.gmra.mxu2 %v3986_v18  ;;  %1535 = vmatmul.f32.gmra.mxu3 %v3988_v47 }
 0x1ed   : > { %5118 = vst [vmem:[#allocation55_spill] sm:$0xff] %v3988_v47  ;;  %v586_v53 = vpop.f32.mrf.mxu0  ;;  %v795_v19 = vpop.f32.mrf.mxu1  ;;  %v416_v47 = vld [vmem:[%s3598_s10 + $0x198] sm:$0xff] }
 0x1ee   : > { %5119 = vst [vmem:[#allocation56_spill] sm:$0xff] %v3990_v48  ;;  %v587_v21 = vadd.f32 %v586_v53, %v3628_v29  ;;  %v796_v46 = vadd.f32 %v795_v19, %v3630_v30 }
 0x1ef   : > { %v1279_v8 = vpop.f32.mrf.mxu2  ;;  %v1488_v45 = vpop.f32.mrf.mxu3 }
 0x1f0   : > { %v953_v15 = vmul.f32 0.01, %v587_v21  ;;  %v954_v55 = vmul.f32 0.01, %v796_v46  ;;  %v1280_v26 = vadd.f32 %v1279_v8, %v3788_v63  ;;  %633 = vmatmul.f32.gmra.mxu0 %v415_v54  ;;  %842 = vmatmul.f32.gmra.mxu1 %v415_v54 }
 0x1f2   : > { %v3998_v12 = vmax.f32 %v587_v21, %v953_v15  ;;  %v4000_v7 = vmax.f32 %v796_v46, %v954_v55  ;;  %v4002_v20 = vadd.f32 %v1488_v45, %v1280_v26 }
 0x1f4   : > { %5120 = vst [vmem:[#allocation57_spill] sm:$0xff] %v3998_v12  ;;  %1329 = vmatmul.f32.gmra.mxu2 %v3998_v12  ;;  %1538 = vmatmul.f32.gmra.mxu3 %v4000_v7 }
 0x1f5   : > { %5121 = vst [vmem:[#allocation58_spill] sm:$0xff] %v4000_v7  ;;  %v589_v53 = vpop.f32.mrf.mxu0  ;;  %v798_v19 = vpop.f32.mrf.mxu1  ;;  %v417_v7 = vld [vmem:[%s3598_s10 + $0x1a0] sm:$0xff] }
 0x1f6   : > { %5122 = vst [vmem:[#allocation59_spill] sm:$0xff] %v4002_v20  ;;  %v590_v18 = vadd.f32 %v589_v53, %v3628_v29  ;;  %v799_v8 = vadd.f32 %v798_v19, %v3630_v30 }
 0x1f7   : > { %v1282_v48 = vpop.f32.mrf.mxu2  ;;  %v1491_v54 = vpop.f32.mrf.mxu3 }
 0x1f8   : > { %v955_v21 = vmul.f32 0.01, %v590_v18  ;;  %v956_v15 = vmul.f32 0.01, %v799_v8  ;;  %v1283_v46 = vadd.f32 %v1282_v48, %v3788_v63  ;;  %636 = vmatmul.f32.gmra.mxu0 %v416_v47  ;;  %845 = vmatmul.f32.gmra.mxu1 %v416_v47 }
 0x1fa   : > { %v4010_v45 = vmax.f32 %v590_v18, %v955_v21  ;;  %v4012_v55 = vmax.f32 %v799_v8, %v956_v15  ;;  %v4014_v26 = vadd.f32 %v1491_v54, %v1283_v46 }
 0x1fc   : > { %5123 = vst [vmem:[#allocation60_spill] sm:$0xff] %v4010_v45  ;;  %1332 = vmatmul.f32.gmra.mxu2 %v4010_v45  ;;  %1541 = vmatmul.f32.gmra.mxu3 %v4012_v55 }
 0x1fd   : > { %5124 = vst [vmem:[#allocation61_spill] sm:$0xff] %v4012_v55  ;;  %v592_v53 = vpop.f32.mrf.mxu0  ;;  %v801_v19 = vpop.f32.mrf.mxu1  ;;  %v418_v55 = vld [vmem:[%s3598_s10 + $0x1a8] sm:$0xff] }
 0x1fe   : > { %5125 = vst [vmem:[#allocation62_spill] sm:$0xff] %v4014_v26  ;;  %v593_v12 = vadd.f32 %v592_v53, %v3628_v29  ;;  %v802_v48 = vadd.f32 %v801_v19, %v3630_v30 }
 0x1ff   : > { %v1285_v20 = vpop.f32.mrf.mxu2  ;;  %v1494_v47 = vpop.f32.mrf.mxu3 }
 0x200   : > { %v957_v18 = vmul.f32 0.01, %v593_v12  ;;  %v958_v21 = vmul.f32 0.01, %v802_v48  ;;  %v1286_v8 = vadd.f32 %v1285_v20, %v3788_v63  ;;  %639 = vmatmul.f32.gmra.mxu0 %v417_v7  ;;  %848 = vmatmul.f32.gmra.mxu1 %v417_v7  ;;  %v1144_v20 = vld [vmem:[#allocation8 + $0x18] sm:$0xff]  ;;  %v2308_v7 = vld [vmem:[#allocation10 + $0x28] sm:$0xff] }
 0x201   : > { %1643 = vmatpush.msrb.mxu0 %v1144_v20  ;;  %2349 = vmatpush.msrb.mxu2 %v2308_v7 }
 0x202   : > { %v4022_v54 = vmax.f32 %v593_v12, %v957_v18  ;;  %v4024_v15 = vmax.f32 %v802_v48, %v958_v21  ;;  %v4026_v46 = vadd.f32 %v1494_v47, %v1286_v8 }
 0x204   : > { %5126 = vst [vmem:[#allocation63_spill] sm:$0xff] %v4022_v54  ;;  %1335 = vmatmul.f32.gmra.mxu2 %v4022_v54  ;;  %1544 = vmatmul.f32.gmra.mxu3 %v4024_v15  ;;  %v419_v54 = vld [vmem:[%s3598_s10 + $0x1b0] sm:$0xff] }
 0x205   : > { %5127 = vst [vmem:[#allocation64_spill] sm:$0xff] %v4024_v15  ;;  %v595_v53 = vpop.f32.mrf.mxu0  ;;  %v804_v19 = vpop.f32.mrf.mxu1  ;;  %v2324_v15 = vld [vmem:[#allocation10 + $0xa8] sm:$0xff] }
 0x206   : > { %5128 = vst [vmem:[#allocation65_spill] sm:$0xff] %v4026_v46  ;;  %v596_v45 = vadd.f32 %v595_v53, %v3628_v29  ;;  %v805_v26 = vadd.f32 %v804_v19, %v3630_v30  ;;  %2558 = vmatpush.msrb.mxu3 %v2324_v15  ;;  %v1174_v46 = vld [vmem:[#allocation8 + $0x108] sm:$0xff] }
 0x207   : > { %v1288_v12 = vpop.f32.mrf.mxu2  ;;  %v1497_v18 = vpop.f32.mrf.mxu3  ;;  %1853 = vmatpush.msrb.mxu1 %v1174_v46 }
 0x208   : > { %v959_v48 = vmul.f32 0.01, %v596_v45  ;;  %v960_v47 = vmul.f32 0.01, %v805_v26  ;;  %v1289_v21 = vadd.f32 %v1288_v12, %v3788_v63  ;;  %642 = vmatmul.f32.gmra.mxu0 %v418_v55  ;;  %851 = vmatmul.f32.gmra.mxu1 %v418_v55 }
 0x20a   : > { %v4034_v8 = vmax.f32 %v596_v45, %v959_v48  ;;  %v4036_v53 = vmax.f32 %v805_v26, %v960_v47  ;;  %v4038_v19 = vadd.f32 %v1497_v18, %v1289_v21 }
 0x20c   : > { %5129 = vst [vmem:[#allocation66_spill] sm:$0xff] %v4034_v8  ;;  %1338 = vmatmul.f32.gmra.mxu2 %v4034_v8  ;;  %1547 = vmatmul.f32.gmra.mxu3 %v4036_v53 }
 0x20d   : > { %5130 = vst [vmem:[#allocation67_spill] sm:$0xff] %v4036_v53  ;;  %v598_v58 = vpop.f32.mrf.mxu0  ;;  %v807_v20 = vpop.f32.mrf.mxu1  ;;  %v420_v53 = vld [vmem:[%s3598_s10 + $0x1b8] sm:$0xff] }
 0x20e   : > { %5131 = vst [vmem:[#allocation68_spill] sm:$0xff] %v4038_v19  ;;  %v599_v12 = vadd.f32 %v598_v58, %v3628_v29  ;;  %v808_v55 = vadd.f32 %v807_v20, %v3630_v30 }
 0x20f   : > { %v1291_v45 = vpop.f32.mrf.mxu2  ;;  %v1500_v7 = vpop.f32.mrf.mxu3 }
 0x210   : > { %v961_v26 = vmul.f32 0.01, %v599_v12  ;;  %v962_v48 = vmul.f32 0.01, %v808_v55  ;;  %v1292_v18 = vadd.f32 %v1291_v45, %v3788_v63  ;;  %645 = vmatmul.f32.gmra.mxu0 %v419_v54  ;;  %854 = vmatmul.f32.gmra.mxu1 %v419_v54 }
 0x212   : > { %v4046_v15 = vmax.f32 %v599_v12, %v961_v26  ;;  %v4048_v47 = vmax.f32 %v808_v55, %v962_v48  ;;  %v4050_v21 = vadd.f32 %v1500_v7, %v1292_v18 }
 0x214   : > { %5132 = vst [vmem:[#allocation69_spill] sm:$0xff] %v4046_v15  ;;  %1341 = vmatmul.f32.gmra.mxu2 %v4046_v15  ;;  %1550 = vmatmul.f32.gmra.mxu3 %v4048_v47 }
 0x215   : > { %5133 = vst [vmem:[#allocation70_spill] sm:$0xff] %v4048_v47  ;;  %v601_v58 = vpop.f32.mrf.mxu0  ;;  %v810_v20 = vpop.f32.mrf.mxu1  ;;  %v421_v47 = vld [vmem:[%s3598_s10 + $0x1c0] sm:$0xff] }
 0x216   : > { %5134 = vst [vmem:[#allocation71_spill] sm:$0xff] %v4050_v21  ;;  %v602_v8 = vadd.f32 %v601_v58, %v3628_v29  ;;  %v811_v45 = vadd.f32 %v810_v20, %v3630_v30 }
 0x217   : > { %v1294_v19 = vpop.f32.mrf.mxu2  ;;  %v1503_v54 = vpop.f32.mrf.mxu3 }
 0x218   : > { %v963_v12 = vmul.f32 0.01, %v602_v8  ;;  %v964_v26 = vmul.f32 0.01, %v811_v45  ;;  %v1295_v55 = vadd.f32 %v1294_v19, %v3788_v63  ;;  %648 = vmatmul.f32.gmra.mxu0 %v420_v53  ;;  %857 = vmatmul.f32.gmra.mxu1 %v420_v53 }
 0x21a   : > { %v4058_v7 = vmax.f32 %v602_v8, %v963_v12  ;;  %v4060_v48 = vmax.f32 %v811_v45, %v964_v26  ;;  %v4062_v18 = vadd.f32 %v1503_v54, %v1295_v55 }
 0x21c   : > { %5135 = vst [vmem:[#allocation72_spill] sm:$0xff] %v4058_v7  ;;  %1344 = vmatmul.f32.gmra.mxu2 %v4058_v7  ;;  %1553 = vmatmul.f32.gmra.mxu3 %v4060_v48 }
 0x21d   : > { %5136 = vst [vmem:[#allocation73_spill] sm:$0xff] %v4060_v48  ;;  %v604_v58 = vpop.f32.mrf.mxu0  ;;  %v813_v20 = vpop.f32.mrf.mxu1  ;;  %v422_v48 = vld [vmem:[%s3598_s10 + $0x1c8] sm:$0xff] }
 0x21e   : > { %5137 = vst [vmem:[#allocation74_spill] sm:$0xff] %v4062_v18  ;;  %v605_v15 = vadd.f32 %v604_v58, %v3628_v29  ;;  %v814_v19 = vadd.f32 %v813_v20, %v3630_v30 }
 0x21f   : > { %v1297_v21 = vpop.f32.mrf.mxu2  ;;  %v1506_v53 = vpop.f32.mrf.mxu3 }
 0x220   : > { %v965_v8 = vmul.f32 0.01, %v605_v15  ;;  %v966_v12 = vmul.f32 0.01, %v814_v19  ;;  %v1298_v45 = vadd.f32 %v1297_v21, %v3788_v63  ;;  %651 = vmatmul.f32.gmra.mxu0 %v421_v47  ;;  %860 = vmatmul.f32.gmra.mxu1 %v421_v47  ;;  %v1142_v21 = vld [vmem:[#allocation8 + $0x8] sm:$0xff]  ;;  %v2307_v47 = vld [vmem:[#allocation10 + $0x20] sm:$0xff] }
 0x221   : > { %1644 = vmatpush.msrb.mxu0 %v1142_v21  ;;  %2350 = vmatpush.msrb.mxu2 %v2307_v47 }
 0x222   : > { %v4070_v54 = vmax.f32 %v605_v15, %v965_v8  ;;  %v4072_v26 = vmax.f32 %v814_v19, %v966_v12  ;;  %v4074_v55 = vadd.f32 %v1506_v53, %v1298_v45 }
 0x224   : > { %5138 = vst [vmem:[#allocation75_spill] sm:$0xff] %v4070_v54  ;;  %1347 = vmatmul.f32.gmra.mxu2 %v4070_v54  ;;  %1556 = vmatmul.f32.gmra.mxu3 %v4072_v26  ;;  %v423_v54 = vld [vmem:[%s3598_s10 + $0x1d0] sm:$0xff] }
 0x225   : > { %5139 = vst [vmem:[#allocation76_spill] sm:$0xff] %v4072_v26  ;;  %v607_v58 = vpop.f32.mrf.mxu0  ;;  %v816_v20 = vpop.f32.mrf.mxu1  ;;  %v2323_v26 = vld [vmem:[#allocation10 + $0xa0] sm:$0xff] }
 0x226   : > { %5140 = vst [vmem:[#allocation77_spill] sm:$0xff] %v4074_v55  ;;  %v608_v7 = vadd.f32 %v607_v58, %v3628_v29  ;;  %v817_v18 = vadd.f32 %v816_v20, %v3630_v30  ;;  %2559 = vmatpush.msrb.mxu3 %v2323_v26 }
 0x227   : > { %v1300_v15 = vpop.f32.mrf.mxu2  ;;  %v1509_v8 = vpop.f32.mrf.mxu3 }
 0x228   : > { %v967_v19 = vmul.f32 0.01, %v608_v7  ;;  %v968_v53 = vmul.f32 0.01, %v817_v18  ;;  %v1301_v12 = vadd.f32 %v1300_v15, %v3788_v63  ;;  %654 = vmatmul.f32.gmra.mxu0 %v422_v48  ;;  %863 = vmatmul.f32.gmra.mxu1 %v422_v48 }
 0x22a   : > { %v4082_v45 = vmax.f32 %v608_v7, %v967_v19  ;;  %v4084_v58 = vmax.f32 %v817_v18, %v968_v53  ;;  %v4086_v20 = vadd.f32 %v1509_v8, %v1301_v12 }
 0x22c   : > { %5141 = vst [vmem:[#allocation78_spill] sm:$0xff] %v4082_v45  ;;  %1350 = vmatmul.f32.gmra.mxu2 %v4082_v45  ;;  %1559 = vmatmul.f32.gmra.mxu3 %v4084_v58 }
 0x22d   : > { %5142 = vst [vmem:[#allocation79_spill] sm:$0xff] %v4084_v58  ;;  %v610_v46 = vpop.f32.mrf.mxu0  ;;  %v819_v21 = vpop.f32.mrf.mxu1  ;;  %v424_v58 = vld [vmem:[%s3598_s10 + $0x1d8] sm:$0xff] }
 0x22e   : > { %5143 = vst [vmem:[#allocation80_spill] sm:$0xff] %v4086_v20  ;;  %v611_v15 = vadd.f32 %v610_v46, %v3628_v29  ;;  %v820_v48 = vadd.f32 %v819_v21, %v3630_v30 }
 0x22f   : > { %v1303_v7 = vpop.f32.mrf.mxu2  ;;  %v1512_v47 = vpop.f32.mrf.mxu3 }
 0x230   : > { %v969_v18 = vmul.f32 0.01, %v611_v15  ;;  %v970_v19 = vmul.f32 0.01, %v820_v48  ;;  %v1304_v8 = vadd.f32 %v1303_v7, %v3788_v63  ;;  %657 = vmatmul.f32.gmra.mxu0 %v423_v54  ;;  %866 = vmatmul.f32.gmra.mxu1 %v423_v54 }
 0x232   : > { %v4094_v26 = vmax.f32 %v611_v15, %v969_v18  ;;  %v4096_v53 = vmax.f32 %v820_v48, %v970_v19  ;;  %v4098_v12 = vadd.f32 %v1512_v47, %v1304_v8 }
 0x234   : > { %5144 = vst [vmem:[#allocation81_spill] sm:$0xff] %v4094_v26  ;;  %1353 = vmatmul.f32.gmra.mxu2 %v4094_v26  ;;  %1562 = vmatmul.f32.gmra.mxu3 %v4096_v53 }
 0x235   : > { %5145 = vst [vmem:[#allocation82_spill] sm:$0xff] %v4096_v53  ;;  %v613_v46 = vpop.f32.mrf.mxu0  ;;  %v822_v21 = vpop.f32.mrf.mxu1  ;;  %v425_v53 = vld [vmem:[%s3598_s10 + $0x1e0] sm:$0xff] }
 0x236   : > { %5146 = vst [vmem:[#allocation83_spill] sm:$0xff] %v4098_v12  ;;  %v614_v45 = vadd.f32 %v613_v46, %v3628_v29  ;;  %v823_v7 = vadd.f32 %v822_v21, %v3630_v30 }
 0x237   : > { %v1306_v20 = vpop.f32.mrf.mxu2  ;;  %v1515_v54 = vpop.f32.mrf.mxu3 }
 0x238   : > { %v971_v15 = vmul.f32 0.01, %v614_v45  ;;  %v972_v18 = vmul.f32 0.01, %v823_v7  ;;  %v1307_v48 = vadd.f32 %v1306_v20, %v3788_v63  ;;  %660 = vmatmul.f32.gmra.mxu0 %v424_v58  ;;  %869 = vmatmul.f32.gmra.mxu1 %v424_v58 }
 0x23a   : > { %v4106_v47 = vmax.f32 %v614_v45, %v971_v15  ;;  %v4108_v19 = vmax.f32 %v823_v7, %v972_v18  ;;  %v4110_v8 = vadd.f32 %v1515_v54, %v1307_v48 }
 0x23c   : > { %5147 = vst [vmem:[#allocation84_spill] sm:$0xff] %v4106_v47  ;;  %1356 = vmatmul.f32.gmra.mxu2 %v4106_v47  ;;  %1565 = vmatmul.f32.gmra.mxu3 %v4108_v19 }
 0x23d   : > { %5148 = vst [vmem:[#allocation85_spill] sm:$0xff] %v4108_v19  ;;  %v616_v46 = vpop.f32.mrf.mxu0  ;;  %v825_v21 = vpop.f32.mrf.mxu1  ;;  %v426_v19 = vld [vmem:[%s3598_s10 + $0x1e8] sm:$0xff] }
 0x23e   : > { %5149 = vst [vmem:[#allocation86_spill] sm:$0xff] %v4110_v8  ;;  %v617_v26 = vadd.f32 %v616_v46, %v3628_v29  ;;  %v826_v20 = vadd.f32 %v825_v21, %v3630_v30 }
 0x23f   : > { %v1309_v12 = vpop.f32.mrf.mxu2  ;;  %v1518_v58 = vpop.f32.mrf.mxu3 }
 0x240   : > { %v973_v45 = vmul.f32 0.01, %v617_v26  ;;  %v974_v15 = vmul.f32 0.01, %v826_v20  ;;  %v1310_v7 = vadd.f32 %v1309_v12, %v3788_v63  ;;  %663 = vmatmul.f32.gmra.mxu0 %v425_v53  ;;  %872 = vmatmul.f32.gmra.mxu1 %v425_v53  ;;  %v2306_v12 = vld [vmem:[#allocation10 + $0x18] sm:$0xff] }
 0x241   : > { %2351 = vmatpush.msrb.mxu2 %v2306_v12 }
 0x242   : > { %v4118_v54 = vmax.f32 %v617_v26, %v973_v45  ;;  %v4120_v18 = vmax.f32 %v826_v20, %v974_v15  ;;  %v4122_v48 = vadd.f32 %v1518_v58, %v1310_v7 }
 0x244   : > { %5150 = vst [vmem:[#allocation87_spill] sm:$0xff] %v4118_v54  ;;  %1359 = vmatmul.f32.gmra.mxu2 %v4118_v54  ;;  %1568 = vmatmul.f32.gmra.mxu3 %v4120_v18 }
 0x245   : > { %5151 = vst [vmem:[#allocation88_spill] sm:$0xff] %v4120_v18  ;;  %v619_v46 = vpop.f32.mrf.mxu0  ;;  %v828_v21 = vpop.f32.mrf.mxu1  ;;  %v427_v18 = vld [vmem:[%s3598_s10 + $0x1f0] sm:$0xff] }
 0x246   : > { %5152 = vst [vmem:[#allocation89_spill] sm:$0xff] %v4122_v48  ;;  %v620_v47 = vadd.f32 %v619_v46, %v3628_v29  ;;  %v829_v8 = vadd.f32 %v828_v21, %v3630_v30  ;;  %v2322_v46 = vld [vmem:[#allocation10 + $0x98] sm:$0xff] }
 0x247   : > { %v1312_v55 = vpop.f32.mrf.mxu2  ;;  %v1521_v53 = vpop.f32.mrf.mxu3  ;;  %2560 = vmatpush.msrb.mxu3 %v2322_v46 }
 0x248   : > { %v975_v26 = vmul.f32 0.01, %v620_v47  ;;  %v976_v20 = vmul.f32 0.01, %v829_v8  ;;  %v1313_v58 = vadd.f32 %v1312_v55, %v3788_v63  ;;  %666 = vmatmul.f32.gmra.mxu0 %v426_v19  ;;  %875 = vmatmul.f32.gmra.mxu1 %v426_v19 }
 0x24a   : > { %v4130_v45 = vmax.f32 %v620_v47, %v975_v26  ;;  %v4132_v15 = vmax.f32 %v829_v8, %v976_v20  ;;  %v4134_v7 = vadd.f32 %v1521_v53, %v1313_v58 }
 0x24c   : > { %5153 = vst [vmem:[#allocation90_spill] sm:$0xff] %v4130_v45  ;;  %1362 = vmatmul.f32.gmra.mxu2 %v4130_v45  ;;  %1571 = vmatmul.f32.gmra.mxu3 %v4132_v15 }
 0x24d   : > { %5154 = vst [vmem:[#allocation91_spill] sm:$0xff] %v4132_v15  ;;  %v622_v21 = vpop.f32.mrf.mxu0  ;;  %v831_v12 = vpop.f32.mrf.mxu1  ;;  %v428_v15 = vld [vmem:[%s3598_s10 + $0x1f8] sm:$0xff] }
 0x24e   : > { %5155 = vst [vmem:[#allocation92_spill] sm:$0xff] %v4134_v7  ;;  %v623_v54 = vadd.f32 %v622_v21, %v3628_v29  ;;  %v832_v55 = vadd.f32 %v831_v12, %v3630_v30 }
 0x24f   : > { %v1315_v47 = vpop.f32.mrf.mxu2  ;;  %v1524_v19 = vpop.f32.mrf.mxu3 }
 0x250   : > { %v977_v8 = vmul.f32 0.01, %v623_v54  ;;  %v978_v26 = vmul.f32 0.01, %v832_v55  ;;  %v1316_v53 = vadd.f32 %v1315_v47, %v3788_v63  ;;  %669 = vmatmul.f32.gmra.mxu0 %v427_v18  ;;  %878 = vmatmul.f32.gmra.mxu1 %v427_v18 }
 0x252   : > { %v4142_v20 = vmax.f32 %v623_v54, %v977_v8  ;;  %v4144_v58 = vmax.f32 %v832_v55, %v978_v26  ;;  %v4146_v46 = vadd.f32 %v1524_v19, %v1316_v53 }
 0x254   : > { %5156 = vst [vmem:[#allocation93_spill] sm:$0xff] %v4142_v20  ;;  %1365 = vmatmul.f32.gmra.mxu2 %v4142_v20  ;;  %1574 = vmatmul.f32.gmra.mxu3 %v4144_v58 }
 0x255   : > { %5157 = vst [vmem:[#allocation94_spill] sm:$0xff] %v4144_v58  ;;  %v625_v21 = vpop.f32.mrf.mxu0  ;;  %v834_v12 = vpop.f32.mrf.mxu1 }
 0x256   : > { %5158 = vst [vmem:[#allocation95_spill] sm:$0xff] %v4146_v46  ;;  %v626_v45 = vadd.f32 %v625_v21, %v3628_v29  ;;  %v835_v7 = vadd.f32 %v834_v12, %v3630_v30 }
 0x257   : > { %v1318_v47 = vpop.f32.mrf.mxu2  ;;  %v1527_v48 = vpop.f32.mrf.mxu3 }
 0x258   : > { %v979_v18 = vmul.f32 0.01, %v626_v45  ;;  %v980_v54 = vmul.f32 0.01, %v835_v7  ;;  %v1319_v55 = vadd.f32 %v1318_v47, %v3788_v63  ;;  %672 = vmatmul.f32.gmra.mxu0 %v428_v15  ;;  %881 = vmatmul.f32.gmra.mxu1 %v428_v15 }
 0x25a   : > { %v4154_v19 = vmax.f32 %v626_v45, %v979_v18  ;;  %v4156_v8 = vmax.f32 %v835_v7, %v980_v54  ;;  %v4158_v26 = vadd.f32 %v1527_v48, %v1319_v55 }
 0x25c   : > { %5159 = vst [vmem:[#allocation96_spill] sm:$0xff] %v4156_v8  ;;  %1368 = vmatmul.f32.gmra.mxu2 %v4154_v19  ;;  %1577 = vmatmul.f32.gmra.mxu3 %v4156_v8 }
 0x25d   : > { %v628_v53 = vpop.f32.mrf.mxu0  ;;  %v837_v21 = vpop.f32.mrf.mxu1 }
 0x25e   : > { %v629_v12 = vadd.f32 %v628_v53, %v3628_v29  ;;  %v838_v58 = vadd.f32 %v837_v21, %v3630_v30  ;;  %v2305_v21 = vld [vmem:[#allocation10 + $0x10] sm:$0xff] }
 0x25f   : > { %v1321_v20 = vpop.f32.mrf.mxu2  ;;  %v1530_v47 = vpop.f32.mrf.mxu3  ;;  %2352 = vmatpush.msrb.mxu2 %v2305_v21 }
 0x260   : > { %v981_v46 = vmul.f32 0.01, %v629_v12  ;;  %v982_v15 = vmul.f32 0.01, %v838_v58  ;;  %v1322_v45 = vadd.f32 %v1321_v20, %v3788_v63  ;;  %1645 = vmatmul.f32.vlgmr.msrb.gmra.mxu0 %v3635_v40  ;;  %1854 = vmatmul.f32.vlgmr.msrb.gmra.mxu1 %v3637_v41 }
 0x262   : > { %v4167_v48 = vmax.f32 %v629_v12, %v981_v46  ;;  %v4169_v7 = vmax.f32 %v838_v58, %v982_v15  ;;  %v4171_v18 = vadd.f32 %v1530_v47, %v1322_v45  ;;  %v2321_v45 = vld [vmem:[#allocation10 + $0x90] sm:$0xff] }
 0x263   : > { %2561 = vmatpush.msrb.mxu3 %v2321_v45 }
 0x264   : > { %1371 = vmatmul.f32.gmra.mxu2 %v4167_v48  ;;  %1580 = vmatmul.f32.gmra.mxu3 %v4169_v7 }
 0x265   : > { %v631_v54 = vpop.f32.mrf.mxu0  ;;  %v840_v55 = vpop.f32.mrf.mxu1 }
 0x266   : > { %v632_v53 = vadd.f32 %v631_v54, %v3628_v29  ;;  %v841_v20 = vadd.f32 %v840_v55, %v3630_v30 }
 0x267   : > { %v1324_v40 = vpop.f32.mrf.mxu2  ;;  %v1533_v8 = vpop.f32.mrf.mxu3 }
 0x268   : > { %v983_v41 = vmul.f32 0.01, %v632_v53  ;;  %v984_v46 = vmul.f32 0.01, %v841_v20  ;;  %v1325_v58 = vadd.f32 %v1324_v40, %v3788_v63  ;;  %1648 = vmatmul.f32.gmra.mxu0 %v3644_v51  ;;  %1857 = vmatmul.f32.gmra.mxu1 %v3646_v52 }
 0x26a   : > { %v4180_v12 = vmax.f32 %v632_v53, %v983_v41  ;;  %v4182_v47 = vmax.f32 %v841_v20, %v984_v46  ;;  %v4184_v15 = vadd.f32 %v1533_v8, %v1325_v58 }
 0x26c   : > { %5160 = vst [vmem:[#allocation97_spill] sm:$0xff] %v4180_v12  ;;  %1374 = vmatmul.f32.gmra.mxu2 %v4180_v12  ;;  %1583 = vmatmul.f32.gmra.mxu3 %v4182_v47 }
 0x26d   : > { %5161 = vst [vmem:[#allocation98_spill] sm:$0xff] %v4182_v47  ;;  %v634_v54 = vpop.f32.mrf.mxu0  ;;  %v843_v55 = vpop.f32.mrf.mxu1 }
 0x26e   : > { %v635_v21 = vadd.f32 %v634_v54, %v3628_v29  ;;  %v844_v51 = vadd.f32 %v843_v55, %v3630_v30 }
 0x26f   : > { %v1327_v40 = vpop.f32.mrf.mxu2  ;;  %v1536_v52 = vpop.f32.mrf.mxu3 }
 0x270   : > { %v985_v53 = vmul.f32 0.01, %v635_v21  ;;  %v986_v41 = vmul.f32 0.01, %v844_v51  ;;  %v1328_v20 = vadd.f32 %v1327_v40, %v3788_v63  ;;  %1651 = vmatmul.f32.gmra.mxu0 %v3653_v60  ;;  %1860 = vmatmul.f32.gmra.mxu1 %v3655_v61 }
 0x272   : > { %v4193_v8 = vmax.f32 %v635_v21, %v985_v53  ;;  %v4195_v46 = vmax.f32 %v844_v51, %v986_v41  ;;  %v4197_v58 = vadd.f32 %v1536_v52, %v1328_v20 }
 0x274   : > { %5162 = vst [vmem:[#allocation99_spill] sm:$0xff] %v4195_v46  ;;  %1377 = vmatmul.f32.gmra.mxu2 %v4193_v8  ;;  %1586 = vmatmul.f32.gmra.mxu3 %v4195_v46 }
 0x275   : > { %v637_v45 = vpop.f32.mrf.mxu0  ;;  %v846_v54 = vpop.f32.mrf.mxu1 }
 0x276   : > { %v638_v55 = vadd.f32 %v637_v45, %v3628_v29  ;;  %v847_v40 = vadd.f32 %v846_v54, %v3630_v30 }
 0x277   : > { %v1330_v47 = vpop.f32.mrf.mxu2  ;;  %v1539_v60 = vpop.f32.mrf.mxu3 }
 0x278   : > { %v987_v12 = vmul.f32 0.01, %v638_v55  ;;  %v988_v61 = vmul.f32 0.01, %v847_v40  ;;  %v1331_v21 = vadd.f32 %v1330_v47, %v3788_v63  ;;  %1654 = vmatmul.f32.gmra.mxu0 %v3662_v5  ;;  %1863 = vmatmul.f32.gmra.mxu1 %v3664_v6 }
 0x27a   : > { %v4206_v51 = vmax.f32 %v638_v55, %v987_v12  ;;  %v4208_v52 = vmax.f32 %v847_v40, %v988_v61  ;;  %v4210_v53 = vadd.f32 %v1539_v60, %v1331_v21 }
 0x27c   : > { %5163 = vst [vmem:[#allocation100_spill] sm:$0xff] %v4208_v52  ;;  %1380 = vmatmul.f32.gmra.mxu2 %v4206_v51  ;;  %1589 = vmatmul.f32.gmra.mxu3 %v4208_v52 }
 0x27d   : > { %v640_v41 = vpop.f32.mrf.mxu0  ;;  %v849_v20 = vpop.f32.mrf.mxu1 }
 0x27e   : > { %v641_v45 = vadd.f32 %v640_v41, %v3628_v29  ;;  %v850_v47 = vadd.f32 %v849_v20, %v3630_v30 }
 0x27f   : > { %v1333_v54 = vpop.f32.mrf.mxu2  ;;  %v1542_v5 = vpop.f32.mrf.mxu3 }
 0x280   : > { %v989_v46 = vmul.f32 0.01, %v641_v45  ;;  %v990_v6 = vmul.f32 0.01, %v850_v47  ;;  %v1334_v12 = vadd.f32 %v1333_v54, %v3788_v63  ;;  %1657 = vmatmul.f32.gmra.mxu0 %v3671_v16  ;;  %1866 = vmatmul.f32.gmra.mxu1 %v3673_v17  ;;  %v2304_v54 = vld [vmem:[#allocation10 + $0x8] sm:$0xff] }
 0x281   : > { %2353 = vmatpush.msrb.mxu2 %v2304_v54 }
 0x282   : > { %v4219_v55 = vmax.f32 %v641_v45, %v989_v46  ;;  %v4221_v40 = vmax.f32 %v850_v47, %v990_v6  ;;  %v4223_v60 = vadd.f32 %v1542_v5, %v1334_v12  ;;  %v2320_v12 = vld [vmem:[#allocation10 + $0x88] sm:$0xff] }
 0x283   : > { %2562 = vmatpush.msrb.mxu3 %v2320_v12 }
 0x284   : > { %1383 = vmatmul.f32.gmra.mxu2 %v4219_v55  ;;  %1592 = vmatmul.f32.gmra.mxu3 %v4221_v40 }
 0x285   : > { %v643_v61 = vpop.f32.mrf.mxu0  ;;  %v852_v21 = vpop.f32.mrf.mxu1 }
 0x286   : > { %v644_v41 = vadd.f32 %v643_v61, %v3628_v29  ;;  %v853_v20 = vadd.f32 %v852_v21, %v3630_v30 }
 0x287   : > { %v1336_v16 = vpop.f32.mrf.mxu2  ;;  %v1545_v52 = vpop.f32.mrf.mxu3 }
 0x288   : > { %v991_v17 = vmul.f32 0.01, %v644_v41  ;;  %v992_v46 = vmul.f32 0.01, %v853_v20  ;;  %v1337_v45 = vadd.f32 %v1336_v16, %v3788_v63  ;;  %1660 = vmatmul.f32.gmra.mxu0 %v3680_v27  ;;  %1869 = vmatmul.f32.gmra.mxu1 %v3682_v28 }
 0x28a   : > { %v4232_v47 = vmax.f32 %v644_v41, %v991_v17  ;;  %v4234_v5 = vmax.f32 %v853_v20, %v992_v46  ;;  %v4236_v6 = vadd.f32 %v1545_v52, %v1337_v45 }
 0x28c   : > { %5164 = vst [vmem:[#allocation101_spill] sm:$0xff] %v4232_v47  ;;  %1386 = vmatmul.f32.gmra.mxu2 %v4232_v47  ;;  %1595 = vmatmul.f32.gmra.mxu3 %v4234_v5 }
 0x28d   : > { %5165 = vst [vmem:[#allocation102_spill] sm:$0xff] %v4234_v5  ;;  %v646_v61 = vpop.f32.mrf.mxu0  ;;  %v855_v21 = vpop.f32.mrf.mxu1 }
 0x28e   : > { %v647_v54 = vadd.f32 %v646_v61, %v3628_v29  ;;  %v856_v27 = vadd.f32 %v855_v21, %v3630_v30 }
 0x28f   : > { %v1339_v16 = vpop.f32.mrf.mxu2  ;;  %v1548_v28 = vpop.f32.mrf.mxu3 }
 0x290   : > { %v993_v41 = vmul.f32 0.01, %v647_v54  ;;  %v994_v17 = vmul.f32 0.01, %v856_v27  ;;  %v1340_v20 = vadd.f32 %v1339_v16, %v3788_v63  ;;  %1663 = vmatmul.f32.gmra.mxu0 %v3689_v38  ;;  %1872 = vmatmul.f32.gmra.mxu1 %v3691_v39 }
 0x292   : > { %v4245_v52 = vmax.f32 %v647_v54, %v993_v41  ;;  %v4247_v46 = vmax.f32 %v856_v27, %v994_v17  ;;  %v4249_v45 = vadd.f32 %v1548_v28, %v1340_v20 }
 0x294   : > { %5166 = vst [vmem:[#allocation103_spill] sm:$0xff] %v4247_v46  ;;  %1389 = vmatmul.f32.gmra.mxu2 %v4245_v52  ;;  %1598 = vmatmul.f32.gmra.mxu3 %v4247_v46 }
 0x295   : > { %v649_v12 = vpop.f32.mrf.mxu0  ;;  %v858_v61 = vpop.f32.mrf.mxu1 }
 0x296   : > { %v650_v21 = vadd.f32 %v649_v12, %v3628_v29  ;;  %v859_v16 = vadd.f32 %v858_v61, %v3630_v30 }
 0x297   : > { %v1342_v5 = vpop.f32.mrf.mxu2  ;;  %v1551_v38 = vpop.f32.mrf.mxu3 }
 0x298   : > { %v995_v47 = vmul.f32 0.01, %v650_v21  ;;  %v996_v39 = vmul.f32 0.01, %v859_v16  ;;  %v1343_v54 = vadd.f32 %v1342_v5, %v3788_v63  ;;  %1666 = vmatmul.f32.gmra.mxu0 %v3698_v49  ;;  %1875 = vmatmul.f32.gmra.mxu1 %v3700_v50 }
 0x29a   : > { %v4258_v27 = vmax.f32 %v650_v21, %v995_v47  ;;  %v4260_v28 = vmax.f32 %v859_v16, %v996_v39  ;;  %v4262_v41 = vadd.f32 %v1551_v38, %v1343_v54 }
 0x29c   : > { %5167 = vst [vmem:[#allocation104_spill] sm:$0xff] %v4260_v28  ;;  %1392 = vmatmul.f32.gmra.mxu2 %v4258_v27  ;;  %1601 = vmatmul.f32.gmra.mxu3 %v4260_v28 }
 0x29d   : > { %v652_v17 = vpop.f32.mrf.mxu0  ;;  %v861_v20 = vpop.f32.mrf.mxu1 }
 0x29e   : > { %v653_v12 = vadd.f32 %v652_v17, %v3628_v29  ;;  %v862_v5 = vadd.f32 %v861_v20, %v3630_v30 }
 0x29f   : > { %v1345_v61 = vpop.f32.mrf.mxu2  ;;  %v1554_v49 = vpop.f32.mrf.mxu3 }
 0x2a0   : > { %v997_v46 = vmul.f32 0.01, %v653_v12  ;;  %v998_v50 = vmul.f32 0.01, %v862_v5  ;;  %v1346_v47 = vadd.f32 %v1345_v61, %v3788_v63  ;;  %1669 = vmatmul.f32.gmra.mxu0 %v3707_v0  ;;  %1878 = vmatmul.f32.gmra.mxu1 %v3709_v1  ;;  %v2303_v61 = vld [vmem:[#allocation10] sm:$0xff] }
 0x2a1   : > { %2354 = vmatpush.msrb.mxu2 %v2303_v61 }
 0x2a2   : > { %v4271_v21 = vmax.f32 %v653_v12, %v997_v46  ;;  %v4273_v16 = vmax.f32 %v862_v5, %v998_v50  ;;  %v4275_v38 = vadd.f32 %v1554_v49, %v1346_v47  ;;  %v2319_v47 = vld [vmem:[#allocation10 + $0x80] sm:$0xff] }
 0x2a3   : > { %2563 = vmatpush.msrb.mxu3 %v2319_v47 }
 0x2a4   : > { %1395 = vmatmul.f32.gmra.mxu2 %v4271_v21  ;;  %1604 = vmatmul.f32.gmra.mxu3 %v4273_v16 }
 0x2a5   : > { %v655_v39 = vpop.f32.mrf.mxu0  ;;  %v864_v54 = vpop.f32.mrf.mxu1 }
 0x2a6   : > { %v656_v17 = vadd.f32 %v655_v39, %v3628_v29  ;;  %v865_v20 = vadd.f32 %v864_v54, %v3630_v30 }
 0x2a7   : > { %v1348_v0 = vpop.f32.mrf.mxu2  ;;  %v1557_v28 = vpop.f32.mrf.mxu3 }
 0x2a8   : > { %v999_v1 = vmul.f32 0.01, %v656_v17  ;;  %v1000_v46 = vmul.f32 0.01, %v865_v20  ;;  %v1349_v12 = vadd.f32 %v1348_v0, %v3788_v63  ;;  %1672 = vmatmul.f32.gmra.mxu0 %v3716_v13  ;;  %1881 = vmatmul.f32.gmra.mxu1 %v3718_v14 }
 0x2aa   : > { %v4284_v5 = vmax.f32 %v656_v17, %v999_v1  ;;  %v4286_v49 = vmax.f32 %v865_v20, %v1000_v46  ;;  %v4288_v50 = vadd.f32 %v1557_v28, %v1349_v12 }
 0x2ac   : > { %5168 = vst [vmem:[#allocation105_spill] sm:$0xff] %v4284_v5  ;;  %1398 = vmatmul.f32.gmra.mxu2 %v4284_v5  ;;  %1607 = vmatmul.f32.gmra.mxu3 %v4286_v49 }
 0x2ad   : > { %5169 = vst [vmem:[#allocation106_spill] sm:$0xff] %v4286_v49  ;;  %v658_v39 = vpop.f32.mrf.mxu0  ;;  %v867_v54 = vpop.f32.mrf.mxu1 }
 0x2ae   : > { %v659_v61 = vadd.f32 %v658_v39, %v3628_v29  ;;  %v868_v13 = vadd.f32 %v867_v54, %v3630_v30 }
 0x2af   : > { %v1351_v0 = vpop.f32.mrf.mxu2  ;;  %v1560_v14 = vpop.f32.mrf.mxu3 }
 0x2b0   : > { %v1001_v17 = vmul.f32 0.01, %v659_v61  ;;  %v1002_v1 = vmul.f32 0.01, %v868_v13  ;;  %v1352_v20 = vadd.f32 %v1351_v0, %v3788_v63  ;;  %1675 = vmatmul.f32.gmra.mxu0 %v3725_v24  ;;  %1884 = vmatmul.f32.gmra.mxu1 %v3727_v25 }
 0x2b2   : > { %v4297_v28 = vmax.f32 %v659_v61, %v1001_v17  ;;  %v4299_v46 = vmax.f32 %v868_v13, %v1002_v1  ;;  %v4301_v12 = vadd.f32 %v1560_v14, %v1352_v20 }
 0x2b4   : > { %5170 = vst [vmem:[#allocation107_spill] sm:$0xff] %v4299_v46  ;;  %1401 = vmatmul.f32.gmra.mxu2 %v4297_v28  ;;  %1610 = vmatmul.f32.gmra.mxu3 %v4299_v46 }
 0x2b5   : > { %v661_v47 = vpop.f32.mrf.mxu0  ;;  %v870_v39 = vpop.f32.mrf.mxu1 }
 0x2b6   : > { %v662_v54 = vadd.f32 %v661_v47, %v3628_v29  ;;  %v871_v0 = vadd.f32 %v870_v39, %v3630_v30 }
 0x2b7   : > { %v1354_v49 = vpop.f32.mrf.mxu2  ;;  %v1563_v24 = vpop.f32.mrf.mxu3 }
 0x2b8   : > { %v1003_v5 = vmul.f32 0.01, %v662_v54  ;;  %v1004_v25 = vmul.f32 0.01, %v871_v0  ;;  %v1355_v61 = vadd.f32 %v1354_v49, %v3788_v63  ;;  %1678 = vmatmul.f32.gmra.mxu0 %v3734_v37  ;;  %1887 = vmatmul.f32.gmra.mxu1 %v3736_v42 }
 0x2ba   : > { %v4310_v13 = vmax.f32 %v662_v54, %v1003_v5  ;;  %v4312_v14 = vmax.f32 %v871_v0, %v1004_v25  ;;  %v4314_v17 = vadd.f32 %v1563_v24, %v1355_v61 }
 0x2bc   : > { %5171 = vst [vmem:[#allocation108_spill] sm:$0xff] %v4312_v14  ;;  %1404 = vmatmul.f32.gmra.mxu2 %v4310_v13  ;;  %1613 = vmatmul.f32.gmra.mxu3 %v4312_v14 }
 0x2bd   : > { %v664_v1 = vpop.f32.mrf.mxu0  ;;  %v873_v20 = vpop.f32.mrf.mxu1 }
 0x2be   : > { %v665_v47 = vadd.f32 %v664_v1, %v3628_v29  ;;  %v874_v49 = vadd.f32 %v873_v20, %v3630_v30 }
 0x2bf   : > { %v1357_v39 = vpop.f32.mrf.mxu2  ;;  %v1566_v37 = vpop.f32.mrf.mxu3 }
 0x2c0   : > { %v1005_v46 = vmul.f32 0.01, %v665_v47  ;;  %v1006_v42 = vmul.f32 0.01, %v874_v49  ;;  %v1358_v5 = vadd.f32 %v1357_v39, %v3788_v63  ;;  %1681 = vmatmul.f32.gmra.mxu0 %v3743_v56  ;;  %1890 = vmatmul.f32.gmra.mxu1 %v3745_v57 }
 0x2c2   : > { %v4323_v54 = vmax.f32 %v665_v47, %v1005_v46  ;;  %v4325_v0 = vmax.f32 %v874_v49, %v1006_v42  ;;  %v4327_v24 = vadd.f32 %v1566_v37, %v1358_v5 }
 0x2c4   : > { %5172 = vst [vmem:[#allocation109_spill] sm:$0xff] %v4325_v0  ;;  %1407 = vmatmul.f32.gmra.mxu2 %v4323_v54  ;;  %1616 = vmatmul.f32.gmra.mxu3 %v4325_v0 }
 0x2c5   : > { %v667_v25 = vpop.f32.mrf.mxu0  ;;  %v876_v61 = vpop.f32.mrf.mxu1 }
 0x2c6   : > { %v668_v1 = vadd.f32 %v667_v25, %v3628_v29  ;;  %v877_v20 = vadd.f32 %v876_v61, %v3630_v30 }
 0x2c7   : > { %v1360_v39 = vpop.f32.mrf.mxu2  ;;  %v1569_v56 = vpop.f32.mrf.mxu3 }
 0x2c8   : > { %v1007_v14 = vmul.f32 0.01, %v668_v1  ;;  %v1008_v57 = vmul.f32 0.01, %v877_v20  ;;  %v1361_v46 = vadd.f32 %v1360_v39, %v3788_v63  ;;  %1684 = vmatmul.f32.gmra.mxu0 %v3752_v9  ;;  %1893 = vmatmul.f32.gmra.mxu1 %v3754_v10 }
 0x2ca   : > { %v4336_v47 = vmax.f32 %v668_v1, %v1007_v14  ;;  %v4338_v49 = vmax.f32 %v877_v20, %v1008_v57  ;;  %v4340_v37 = vadd.f32 %v1569_v56, %v1361_v46 }
 0x2cc   : > { %5173 = vst [vmem:[#allocation110_spill] sm:$0xff] %v4338_v49  ;;  %1410 = vmatmul.f32.gmra.mxu2 %v4336_v47  ;;  %1619 = vmatmul.f32.gmra.mxu3 %v4338_v49 }
 0x2cd   : > { %v670_v42 = vpop.f32.mrf.mxu0  ;;  %v879_v5 = vpop.f32.mrf.mxu1 }
 0x2ce   : > { %v671_v25 = vadd.f32 %v670_v42, %v3628_v29  ;;  %v880_v61 = vadd.f32 %v879_v5, %v3630_v30 }
 0x2cf   : > { %v1363_v39 = vpop.f32.mrf.mxu2  ;;  %v1572_v9 = vpop.f32.mrf.mxu3 }
 0x2d0   : > { %v1009_v0 = vmul.f32 0.01, %v671_v25  ;;  %v1010_v10 = vmul.f32 0.01, %v880_v61  ;;  %v1364_v14 = vadd.f32 %v1363_v39, %v3788_v63  ;;  %1687 = vmatmul.f32.gmra.mxu0 %v3761_v22  ;;  %1896 = vmatmul.f32.gmra.mxu1 %v3763_v23 }
 0x2d2   : > { %v4349_v1 = vmax.f32 %v671_v25, %v1009_v0  ;;  %v4351_v20 = vmax.f32 %v880_v61, %v1010_v10  ;;  %v4353_v56 = vadd.f32 %v1572_v9, %v1364_v14 }
 0x2d4   : > { %1413 = vmatmul.f32.gmra.mxu2 %v4349_v1  ;;  %1622 = vmatmul.f32.gmra.mxu3 %v4351_v20 }
 0x2d5   : > { %v673_v57 = vpop.f32.mrf.mxu0  ;;  %v882_v46 = vpop.f32.mrf.mxu1 }
 0x2d6   : > { %v674_v42 = vadd.f32 %v673_v57, %v3628_v29  ;;  %v883_v5 = vadd.f32 %v882_v46, %v3630_v30  ;;  %v3130_v29 = vld [vmem:[%s4958_s4] sm:$0x3] }
 0x2d7   : > { %v1366_v39 = vpop.f32.mrf.mxu2  ;;  %v1575_v22 = vpop.f32.mrf.mxu3  ;;  %v4371_v30 = vperm.slane %v3130_v29, 1 }
 0x2d8   : > { %v1011_v49 = vmul.f32 0.01, %v674_v42  ;;  %v1012_v23 = vmul.f32 0.01, %v883_v5  ;;  %v1367_v0 = vadd.f32 %v1366_v39, %v3788_v63  ;;  %1690 = vmatmul.f32.gmra.mxu0 %v3770_v43  ;;  %1899 = vmatmul.f32.gmra.mxu1 %v3772_v44  ;;  %v2047_v44 = vmul.f32 0.01, %v3794_v32 }
 0x2da   : > { %v4362_v25 = vmax.f32 %v674_v42, %v1011_v49  ;;  %v4364_v61 = vmax.f32 %v883_v5, %v1012_v23  ;;  %v4366_v9 = vadd.f32 %v1575_v22, %v1367_v0  ;;  %v2175_v5 = vmax.f32 %v3794_v32, %v2047_v44 }
 0x2dc   : > { %5174 = vst [vmem:[#allocation111_spill] sm:$0xff] %v4364_v61  ;;  %1416 = vmatmul.f32.gmra.mxu2 %v4362_v25  ;;  %1625 = vmatmul.f32.gmra.mxu3 %v4364_v61 }
 0x2dd   : > { %v1646_v10 = vpop.f32.mrf.mxu0  ;;  %v1855_v43 = vpop.f32.mrf.mxu1 }
 0x2de   : > { %v1647_v49 = vadd.f32 %v1646_v10, %v4371_v30  ;;  %v2049_v10 = vmul.f32 0.01, %v3806_v2 }
 0x2df   : > { %v1369_v14 = vpop.f32.mrf.mxu2  ;;  %v1578_v57 = vpop.f32.mrf.mxu3 }
 0x2e0   : > { %v1856_v46 = vadd.f32 %v1855_v43, %v1647_v49  ;;  %v1370_v42 = vadd.f32 %v1369_v14, %v3788_v63  ;;  %1693 = vmatmul.f32.gmra.mxu0 %v3782_v59  ;;  %1902 = vmatmul.f32.gmra.mxu1 %v3784_v62  ;;  %v2177_v62 = vmax.f32 %v3806_v2, %v2049_v10 }
 0x2e2   : > { %v2048_v39 = vmul.f32 0.01, %v1856_v46  ;;  %v4381_v22 = vadd.f32 %v1578_v57, %v1370_v42 }
 0x2e4   : > { %v2176_v23 = vmax.f32 %v1856_v46, %v2048_v39  ;;  %2355 = vmatmul.f32.vlgmr.msrb.gmra.mxu2 %v2175_v5  ;;  %v2051_v5 = vmul.f32 0.01, %v3818_v31 }
 0x2e5   : > { %v1649_v0 = vpop.f32.mrf.mxu0  ;;  %v1858_v29 = vpop.f32.mrf.mxu1 }
 0x2e6   : > { %v1650_v61 = vadd.f32 %v1649_v0, %v4371_v30  ;;  %2564 = vmatmul.f32.vlgmr.msrb.gmra.mxu3 %v2176_v23 }
 0x2e7   : > { %v1372_v43 = vpop.f32.mrf.mxu2  ;;  %v1581_v49 = vpop.f32.mrf.mxu3 }
 0x2e8   : > { %v1859_v14 = vadd.f32 %v1858_v29, %v1650_v61  ;;  %v1373_v59 = vadd.f32 %v1372_v43, %v3788_v63  ;;  %1696 = vmatmul.f32.gmra.mxu0 %v3796_v33  ;;  %1905 = vmatmul.f32.gmra.mxu1 %v3798_v34  ;;  %v2179_v34 = vmax.f32 %v3818_v31, %v2051_v5 }
 0x2ea   : > { %v2050_v32 = vmul.f32 0.01, %v1859_v14  ;;  %v4389_v44 = vadd.f32 %v1581_v49, %v1373_v59 }
 0x2ec   : > { %v2178_v57 = vmax.f32 %v1859_v14, %v2050_v32  ;;  %2358 = vmatmul.f32.gmra.mxu2 %v2177_v62  ;;  %v2053_v14 = vmul.f32 0.01, %v3830_v11 }
 0x2ed   : > { %v1652_v46 = vpop.f32.mrf.mxu0  ;;  %v1861_v42 = vpop.f32.mrf.mxu1 }
 0x2ee   : > { %v1653_v39 = vadd.f32 %v1652_v46, %v4371_v30  ;;  %2567 = vmatmul.f32.gmra.mxu3 %v2178_v57 }
 0x2ef   : > { %v1375_v61 = vpop.f32.mrf.mxu2  ;;  %v1584_v23 = vpop.f32.mrf.mxu3 }
 0x2f0   : > { %v1862_v0 = vadd.f32 %v1861_v42, %v1653_v39  ;;  %v1376_v33 = vadd.f32 %v1375_v61, %v3788_v63  ;;  %1699 = vmatmul.f32.gmra.mxu0 %v3808_v3  ;;  %1908 = vmatmul.f32.gmra.mxu1 %v3810_v4  ;;  %v2181_v4 = vmax.f32 %v3830_v11, %v2053_v14  ;;  %v5175_v61 = vld [vmem:[#allocation18_spill] sm:$0xff]  ;;  %v5177_v11 = vld [vmem:[#allocation17_spill] sm:$0xff] }
 0x2f2   : > { %v2052_v2 = vmul.f32 0.01, %v1862_v0  ;;  %v4397_v29 = vadd.f32 %v1584_v23, %v1376_v33  ;;  %v2055_v23 = vmul.f32 0.01, %v5175_v61 }
 0x2f4   : > { %v2180_v10 = vmax.f32 %v1862_v0, %v2052_v2  ;;  %2361 = vmatmul.f32.gmra.mxu2 %v2179_v34 }
 0x2f5   : > { %v1655_v43 = vpop.f32.mrf.mxu0  ;;  %v1864_v49 = vpop.f32.mrf.mxu1 }
 0x2f6   : > { %v1656_v59 = vadd.f32 %v1655_v43, %v4371_v30  ;;  %2570 = vmatmul.f32.gmra.mxu3 %v2180_v10  ;;  %v2183_v10 = vmax.f32 %v5175_v61, %v2055_v23  ;;  %v5180_v61 = vld [vmem:[#allocation20_spill] sm:$0xff] }
 0x2f7   : > { %v1378_v62 = vpop.f32.mrf.mxu2  ;;  %v1587_v32 = vpop.f32.mrf.mxu3 }
 0x2f8   : > { %v1865_v57 = vadd.f32 %v1864_v49, %v1656_v59  ;;  %v1379_v3 = vadd.f32 %v1378_v62, %v3788_v63  ;;  %1702 = vmatmul.f32.gmra.mxu0 %v3820_v35  ;;  %1911 = vmatmul.f32.gmra.mxu1 %v3822_v36  ;;  %v5176_v36 = vld [vmem:[#allocation16_spill] sm:$0xff] }
 0x2fa   : > { %v2054_v31 = vmul.f32 0.01, %v1865_v57  ;;  %v4405_v46 = vadd.f32 %v1587_v32, %v1379_v3  ;;  %v5178_v32 = vld [vmem:[#allocation21_spill] sm:$0xff] }
 0x2fc   : > { %v2182_v42 = vmax.f32 %v1865_v57, %v2054_v31  ;;  %2364 = vmatmul.f32.gmra.mxu2 %v2181_v4  ;;  %v2057_v57 = vmul.f32 0.01, %v5178_v32 }
 0x2fd   : > { %v1658_v5 = vpop.f32.mrf.mxu0  ;;  %v1867_v39 = vpop.f32.mrf.mxu1 }
 0x2fe   : > { %v1659_v0 = vadd.f32 %v1658_v5, %v4371_v30  ;;  %2573 = vmatmul.f32.gmra.mxu3 %v2182_v42  ;;  %v2185_v23 = vmax.f32 %v5178_v32, %v2057_v57  ;;  %v5183_v32 = vld [vmem:[#allocation23_spill] sm:$0xff] }
 0x2ff   : > { %v1381_v33 = vpop.f32.mrf.mxu2  ;;  %v1590_v34 = vpop.f32.mrf.mxu3 }
 0x300   : > { %v1868_v2 = vadd.f32 %v1867_v39, %v1659_v0  ;;  %v1382_v35 = vadd.f32 %v1381_v33, %v3788_v63  ;;  %1705 = vmatmul.f32.gmra.mxu0 %v5176_v36  ;;  %1914 = vmatmul.f32.gmra.mxu1 %v5177_v11  ;;  %v5179_v39 = vld [vmem:[#allocation19_spill] sm:$0xff]  ;;  %v5181_v36 = vld [vmem:[#allocation24_spill] sm:$0xff] }
 0x301   : > { %v2059_v11 = vmul.f32 0.01, %v5181_v36 }
 0x302   : > { %v2056_v43 = vmul.f32 0.01, %v1868_v2  ;;  %v4413_v49 = vadd.f32 %v1590_v34, %v1382_v35 }
 0x303   : > { %v2187_v57 = vmax.f32 %v5181_v36, %v2059_v11  ;;  %v5186_v36 = vld [vmem:[#allocation26_spill] sm:$0xff] }
 0x304   : > { %v2184_v14 = vmax.f32 %v1868_v2, %v2056_v43  ;;  %2367 = vmatmul.f32.gmra.mxu2 %v2183_v10 }
 0x305   : > { %v1661_v59 = vpop.f32.mrf.mxu0  ;;  %v1870_v62 = vpop.f32.mrf.mxu1 }
 0x306   : > { %v1662_v3 = vadd.f32 %v1661_v59, %v4371_v30  ;;  %2576 = vmatmul.f32.gmra.mxu3 %v2184_v14 }
 0x307   : > { %v1384_v4 = vpop.f32.mrf.mxu2  ;;  %v1593_v31 = vpop.f32.mrf.mxu3 }
 0x308   : > { %v1871_v42 = vadd.f32 %v1870_v62, %v1662_v3  ;;  %v1385_v5 = vadd.f32 %v1384_v4, %v3788_v63  ;;  %1708 = vmatmul.f32.gmra.mxu0 %v5179_v39  ;;  %1917 = vmatmul.f32.gmra.mxu1 %v5180_v61  ;;  %v5182_v3 = vld [vmem:[#allocation22_spill] sm:$0xff]  ;;  %v5184_v61 = vld [vmem:[#allocation29_spill] sm:$0xff] }
 0x30a   : > { %v2058_v0 = vmul.f32 0.01, %v1871_v42  ;;  %v4421_v33 = vadd.f32 %v1593_v31, %v1385_v5 }
 0x30c   : > { %v2186_v34 = vmax.f32 %v1871_v42, %v2058_v0  ;;  %2370 = vmatmul.f32.gmra.mxu2 %v2185_v23  ;;  %v2061_v23 = vmul.f32 0.01, %v5184_v61 }
 0x30d   : > { %v1664_v2 = vpop.f32.mrf.mxu0  ;;  %v1873_v35 = vpop.f32.mrf.mxu1 }
 0x30e   : > { %v1665_v10 = vadd.f32 %v1664_v2, %v4371_v30  ;;  %2579 = vmatmul.f32.gmra.mxu3 %v2186_v34  ;;  %v2189_v11 = vmax.f32 %v5184_v61, %v2061_v23  ;;  %v5189_v61 = vld [vmem:[#allocation28_spill] sm:$0xff] }
 0x30f   : > { %v1387_v43 = vpop.f32.mrf.mxu2  ;;  %v1596_v14 = vpop.f32.mrf.mxu3 }
 0x310   : > { %v1874_v59 = vadd.f32 %v1873_v35, %v1665_v10  ;;  %v1388_v62 = vadd.f32 %v1387_v43, %v3788_v63  ;;  %1711 = vmatmul.f32.gmra.mxu0 %v5182_v3  ;;  %1920 = vmatmul.f32.gmra.mxu1 %v5183_v32  ;;  %v5185_v43 = vld [vmem:[#allocation25_spill] sm:$0xff] }
 0x312   : > { %v2060_v4 = vmul.f32 0.01, %v1874_v59  ;;  %v4429_v31 = vadd.f32 %v1596_v14, %v1388_v62 }
 0x314   : > { %v2188_v42 = vmax.f32 %v1874_v59, %v2060_v4  ;;  %2373 = vmatmul.f32.gmra.mxu2 %v2187_v57  ;;  %v5187_v57 = vld [vmem:[#allocation32_spill] sm:$0xff] }
 0x315   : > { %v1667_v5 = vpop.f32.mrf.mxu0  ;;  %v1876_v39 = vpop.f32.mrf.mxu1  ;;  %v2063_v4 = vmul.f32 0.01, %v5187_v57 }
 0x316   : > { %v1668_v0 = vadd.f32 %v1667_v5, %v4371_v30  ;;  %2582 = vmatmul.f32.gmra.mxu3 %v2188_v42 }
 0x317   : > { %v1390_v34 = vpop.f32.mrf.mxu2  ;;  %v1599_v2 = vpop.f32.mrf.mxu3  ;;  %v2191_v23 = vmax.f32 %v5187_v57, %v2063_v4  ;;  %v5193_v57 = vld [vmem:[#allocation31_spill] sm:$0xff] }
 0x318   : > { %v1877_v35 = vadd.f32 %v1876_v39, %v1668_v0  ;;  %v1391_v10 = vadd.f32 %v1390_v34, %v3788_v63  ;;  %1714 = vmatmul.f32.gmra.mxu0 %v5185_v43  ;;  %1923 = vmatmul.f32.gmra.mxu1 %v5186_v36  ;;  %v5188_v43 = vld [vmem:[#allocation27_spill] sm:$0xff] }
 0x31a   : > { %v2062_v14 = vmul.f32 0.01, %v1877_v35  ;;  %v4437_v59 = vadd.f32 %v1599_v2, %v1391_v10 }
 0x31c   : > { %v2190_v62 = vmax.f32 %v1877_v35, %v2062_v14  ;;  %2376 = vmatmul.f32.gmra.mxu2 %v2189_v11  ;;  %v5191_v14 = vld [vmem:[#allocation35_spill] sm:$0xff] }
 0x31d   : > { %v1670_v3 = vpop.f32.mrf.mxu0  ;;  %v1879_v32 = vpop.f32.mrf.mxu1 }
 0x31e   : > { %v1671_v42 = vadd.f32 %v1670_v3, %v4371_v30  ;;  %2585 = vmatmul.f32.gmra.mxu3 %v2190_v62  ;;  %v2065_v62 = vmul.f32 0.01, %v5191_v14 }
 0x31f   : > { %v1393_v5 = vpop.f32.mrf.mxu2  ;;  %v1602_v39 = vpop.f32.mrf.mxu3 }
 0x320   : > { %v1880_v0 = vadd.f32 %v1879_v32, %v1671_v42  ;;  %v1394_v34 = vadd.f32 %v1393_v5, %v3788_v63  ;;  %1717 = vmatmul.f32.gmra.mxu0 %v5188_v43  ;;  %1926 = vmatmul.f32.gmra.mxu1 %v5189_v61  ;;  %v5192_v61 = vld [vmem:[#allocation30_spill] sm:$0xff]  ;;  %v2193_v4 = vmax.f32 %v5191_v14, %v2065_v62 }
 0x321   : > { %v5197_v14 = vld [vmem:[#allocation34_spill] sm:$0xff] }
 0x322   : > { %v2064_v2 = vmul.f32 0.01, %v1880_v0  ;;  %v4445_v35 = vadd.f32 %v1602_v39, %v1394_v34 }
 0x324   : > { %5190 = vst [vmem:[#allocation18_spill] sm:$0xff] %v4445_v35  ;;  %v2192_v10 = vmax.f32 %v1880_v0, %v2064_v2  ;;  %2379 = vmatmul.f32.gmra.mxu2 %v2191_v23 }
 0x325   : > { %v1673_v36 = vpop.f32.mrf.mxu0  ;;  %v1882_v11 = vpop.f32.mrf.mxu1 }
 0x326   : > { %v1674_v3 = vadd.f32 %v1673_v36, %v4371_v30  ;;  %2588 = vmatmul.f32.gmra.mxu3 %v2192_v10  ;;  %v5195_v36 = vld [vmem:[#allocation38_spill] sm:$0xff] }
 0x327   : > { %v1396_v32 = vpop.f32.mrf.mxu2  ;;  %v1605_v42 = vpop.f32.mrf.mxu3  ;;  %v2067_v10 = vmul.f32 0.01, %v5195_v36 }
 0x328   : > { %v1883_v5 = vadd.f32 %v1882_v11, %v1674_v3  ;;  %v1397_v43 = vadd.f32 %v1396_v32, %v3788_v63  ;;  %1720 = vmatmul.f32.gmra.mxu0 %v5192_v61  ;;  %1929 = vmatmul.f32.gmra.mxu1 %v5193_v57  ;;  %v5196_v57 = vld [vmem:[#allocation33_spill] sm:$0xff] }
 0x329   : > { %v2195_v62 = vmax.f32 %v5195_v36, %v2067_v10  ;;  %v5201_v36 = vld [vmem:[#allocation37_spill] sm:$0xff] }
 0x32a   : > { %v2066_v39 = vmul.f32 0.01, %v1883_v5  ;;  %v4453_v0 = vadd.f32 %v1605_v42, %v1397_v43 }
 0x32c   : > { %5194 = vst [vmem:[#allocation16_spill] sm:$0xff] %v4453_v0  ;;  %v2194_v34 = vmax.f32 %v1883_v5, %v2066_v39  ;;  %2382 = vmatmul.f32.gmra.mxu2 %v2193_v4 }
 0x32d   : > { %v1676_v23 = vpop.f32.mrf.mxu0  ;;  %v1885_v2 = vpop.f32.mrf.mxu1 }
 0x32e   : > { %v1677_v35 = vadd.f32 %v1676_v23, %v4371_v30  ;;  %2591 = vmatmul.f32.gmra.mxu3 %v2194_v34  ;;  %v5199_v23 = vld [vmem:[#allocation41_spill] sm:$0xff] }
 0x32f   : > { %v1399_v11 = vpop.f32.mrf.mxu2  ;;  %v1608_v3 = vpop.f32.mrf.mxu3  ;;  %v2069_v34 = vmul.f32 0.01, %v5199_v23 }
 0x330   : > { %v1886_v32 = vadd.f32 %v1885_v2, %v1677_v35  ;;  %v1400_v61 = vadd.f32 %v1399_v11, %v3788_v63  ;;  %1723 = vmatmul.f32.gmra.mxu0 %v5196_v57  ;;  %1932 = vmatmul.f32.gmra.mxu1 %v5197_v14  ;;  %v5200_v14 = vld [vmem:[#allocation36_spill] sm:$0xff] }
 0x331   : > { %v2197_v10 = vmax.f32 %v5199_v23, %v2069_v34  ;;  %v5205_v23 = vld [vmem:[#allocation40_spill] sm:$0xff] }
 0x332   : > { %v2068_v42 = vmul.f32 0.01, %v1886_v32  ;;  %v4461_v5 = vadd.f32 %v1608_v3, %v1400_v61 }
 0x334   : > { %5198 = vst [vmem:[#allocation17_spill] sm:$0xff] %v4461_v5  ;;  %v2196_v43 = vmax.f32 %v1886_v32, %v2068_v42  ;;  %2385 = vmatmul.f32.gmra.mxu2 %v2195_v62 }
 0x335   : > { %v1679_v4 = vpop.f32.mrf.mxu0  ;;  %v1888_v39 = vpop.f32.mrf.mxu1 }
 0x336   : > { %v1680_v0 = vadd.f32 %v1679_v4, %v4371_v30  ;;  %2594 = vmatmul.f32.gmra.mxu3 %v2196_v43  ;;  %v5203_v4 = vld [vmem:[#allocation44_spill] sm:$0xff] }
 0x337   : > { %v1402_v35 = vpop.f32.mrf.mxu2  ;;  %v1611_v2 = vpop.f32.mrf.mxu3  ;;  %v2071_v43 = vmul.f32 0.01, %v5203_v4 }
 0x338   : > { %v1889_v11 = vadd.f32 %v1888_v39, %v1680_v0  ;;  %v1403_v57 = vadd.f32 %v1402_v35, %v3788_v63  ;;  %1726 = vmatmul.f32.gmra.mxu0 %v5200_v14  ;;  %1935 = vmatmul.f32.gmra.mxu1 %v5201_v36  ;;  %v5204_v36 = vld [vmem:[#allocation39_spill] sm:$0xff] }
 0x339   : > { %v2199_v34 = vmax.f32 %v5203_v4, %v2071_v43  ;;  %v5209_v4 = vld [vmem:[#allocation43_spill] sm:$0xff] }
 0x33a   : > { %v2070_v3 = vmul.f32 0.01, %v1889_v11  ;;  %v4469_v32 = vadd.f32 %v1611_v2, %v1403_v57 }
 0x33c   : > { %5202 = vst [vmem:[#allocation21_spill] sm:$0xff] %v4469_v32  ;;  %v2198_v61 = vmax.f32 %v1889_v11, %v2070_v3  ;;  %2388 = vmatmul.f32.gmra.mxu2 %v2197_v10 }
 0x33d   : > { %v1682_v62 = vpop.f32.mrf.mxu0  ;;  %v1891_v42 = vpop.f32.mrf.mxu1 }
 0x33e   : > { %v1683_v5 = vadd.f32 %v1682_v62, %v4371_v30  ;;  %2597 = vmatmul.f32.gmra.mxu3 %v2198_v61  ;;  %v5207_v62 = vld [vmem:[#allocation47_spill] sm:$0xff] }
 0x33f   : > { %v1405_v0 = vpop.f32.mrf.mxu2  ;;  %v1614_v39 = vpop.f32.mrf.mxu3  ;;  %v2073_v61 = vmul.f32 0.01, %v5207_v62 }
 0x340   : > { %v1892_v35 = vadd.f32 %v1891_v42, %v1683_v5  ;;  %v1406_v14 = vadd.f32 %v1405_v0, %v3788_v63  ;;  %1729 = vmatmul.f32.gmra.mxu0 %v5204_v36  ;;  %1938 = vmatmul.f32.gmra.mxu1 %v5205_v23  ;;  %v5208_v23 = vld [vmem:[#allocation42_spill] sm:$0xff] }
 0x341   : > { %v2201_v43 = vmax.f32 %v5207_v62, %v2073_v61  ;;  %v5213_v62 = vld [vmem:[#allocation46_spill] sm:$0xff] }
 0x342   : > { %v2072_v2 = vmul.f32 0.01, %v1892_v35  ;;  %v4477_v11 = vadd.f32 %v1614_v39, %v1406_v14 }
 0x344   : > { %5206 = vst [vmem:[#allocation19_spill] sm:$0xff] %v4477_v11  ;;  %v2200_v57 = vmax.f32 %v1892_v35, %v2072_v2  ;;  %2391 = vmatmul.f32.gmra.mxu2 %v2199_v34 }
 0x345   : > { %v1685_v10 = vpop.f32.mrf.mxu0  ;;  %v1894_v3 = vpop.f32.mrf.mxu1 }
 0x346   : > { %v1686_v32 = vadd.f32 %v1685_v10, %v4371_v30  ;;  %2600 = vmatmul.f32.gmra.mxu3 %v2200_v57  ;;  %v5211_v10 = vld [vmem:[#allocation50_spill] sm:$0xff] }
 0x347   : > { %v1408_v5 = vpop.f32.mrf.mxu2  ;;  %v1617_v42 = vpop.f32.mrf.mxu3  ;;  %v2075_v57 = vmul.f32 0.01, %v5211_v10 }
 0x348   : > { %v1895_v0 = vadd.f32 %v1894_v3, %v1686_v32  ;;  %v1409_v36 = vadd.f32 %v1408_v5, %v3788_v63  ;;  %1732 = vmatmul.f32.gmra.mxu0 %v5208_v23  ;;  %1941 = vmatmul.f32.gmra.mxu1 %v5209_v4  ;;  %v5212_v4 = vld [vmem:[#allocation45_spill] sm:$0xff] }
 0x349   : > { %v2203_v61 = vmax.f32 %v5211_v10, %v2075_v57  ;;  %v5217_v10 = vld [vmem:[#allocation49_spill] sm:$0xff] }
 0x34a   : > { %v2074_v39 = vmul.f32 0.01, %v1895_v0  ;;  %v4485_v35 = vadd.f32 %v1617_v42, %v1409_v36 }
 0x34c   : > { %5210 = vst [vmem:[#allocation20_spill] sm:$0xff] %v4485_v35  ;;  %v2202_v14 = vmax.f32 %v1895_v0, %v2074_v39  ;;  %2394 = vmatmul.f32.gmra.mxu2 %v2201_v43 }
 0x34d   : > { %v1688_v34 = vpop.f32.mrf.mxu0  ;;  %v1897_v2 = vpop.f32.mrf.mxu1 }
 0x34e   : > { %v1689_v11 = vadd.f32 %v1688_v34, %v4371_v30  ;;  %2603 = vmatmul.f32.gmra.mxu3 %v2202_v14  ;;  %v5215_v34 = vld [vmem:[#allocation53_spill] sm:$0xff] }
 0x34f   : > { %v1411_v32 = vpop.f32.mrf.mxu2  ;;  %v1620_v3 = vpop.f32.mrf.mxu3  ;;  %v2077_v14 = vmul.f32 0.01, %v5215_v34 }
 0x350   : > { %v1898_v5 = vadd.f32 %v1897_v2, %v1689_v11  ;;  %v1412_v23 = vadd.f32 %v1411_v32, %v3788_v63  ;;  %1735 = vmatmul.f32.gmra.mxu0 %v5212_v4  ;;  %1944 = vmatmul.f32.gmra.mxu1 %v5213_v62  ;;  %v5216_v62 = vld [vmem:[#allocation48_spill] sm:$0xff] }
 0x351   : > { %v2205_v57 = vmax.f32 %v5215_v34, %v2077_v14 }
 0x352   : > { %v2076_v42 = vmul.f32 0.01, %v1898_v5  ;;  %v4493_v0 = vadd.f32 %v1620_v3, %v1412_v23 }
 0x354   : > { %5214 = vst [vmem:[#allocation24_spill] sm:$0xff] %v4493_v0  ;;  %v2204_v36 = vmax.f32 %v1898_v5, %v2076_v42  ;;  %2397 = vmatmul.f32.gmra.mxu2 %v2203_v61 }
 0x355   : > { %v1691_v43 = vpop.f32.mrf.mxu0  ;;  %v1900_v39 = vpop.f32.mrf.mxu1 }
 0x356   : > { %v1692_v35 = vadd.f32 %v1691_v43, %v4371_v30  ;;  %2606 = vmatmul.f32.gmra.mxu3 %v2204_v36  ;;  %v5219_v43 = vld [vmem:[#allocation56_spill] sm:$0xff] }
 0x357   : > { %v1414_v11 = vpop.f32.mrf.mxu2  ;;  %v1623_v2 = vpop.f32.mrf.mxu3  ;;  %v2079_v36 = vmul.f32 0.01, %v5219_v43 }
 0x358   : > { %v1901_v32 = vadd.f32 %v1900_v39, %v1692_v35  ;;  %v1415_v4 = vadd.f32 %v1414_v11, %v3788_v63  ;;  %1738 = vmatmul.f32.gmra.mxu0 %v5216_v62  ;;  %1947 = vmatmul.f32.gmra.mxu1 %v5217_v10  ;;  %v5220_v62 = vld [vmem:[#allocation51_spill] sm:$0xff]  ;;  %v5221_v10 = vld [vmem:[#allocation52_spill] sm:$0xff] }
 0x359   : > { %v2207_v14 = vmax.f32 %v5219_v43, %v2079_v36 }
 0x35a   : > { %v2078_v3 = vmul.f32 0.01, %v1901_v32  ;;  %v4501_v5 = vadd.f32 %v1623_v2, %v1415_v4 }
 0x35c   : > { %5218 = vst [vmem:[#allocation22_spill] sm:$0xff] %v4501_v5  ;;  %v2206_v23 = vmax.f32 %v1901_v32, %v2078_v3  ;;  %2400 = vmatmul.f32.gmra.mxu2 %v2205_v57  ;;  %v4514_v57 = vld [vmem:[%s4960_s6] ss:$0 sm:$0xff]  ;;  %v5226_v5 = vld [vmem:[#allocation62_spill] sm:$0xff] }
 0x35d   : > { %v1694_v61 = vpop.f32.mrf.mxu0  ;;  %v1903_v42 = vpop.f32.mrf.mxu1  ;;  %v5223_v3 = vld [vmem:[#allocation59_spill] sm:$0xff] }
 0x35e   : > { %v1695_v0 = vadd.f32 %v1694_v61, %v4371_v30  ;;  %2609 = vmatmul.f32.gmra.mxu3 %v2206_v23  ;;  %v2081_v23 = vmul.f32 0.01, %v5223_v3 }
 0x35f   : > { %v1417_v35 = vpop.f32.mrf.mxu2  ;;  %v1626_v34 = vpop.f32.mrf.mxu3 }
 0x360   : > { %v1904_v39 = vadd.f32 %v1903_v42, %v1695_v0  ;;  %v1418_v11 = vadd.f32 %v1417_v35, %v3788_v63  ;;  %1741 = vmatmul.f32.gmra.mxu0 %v5220_v62  ;;  %1950 = vmatmul.f32.gmra.mxu1 %v5221_v10  ;;  %v5224_v35 = vld [vmem:[#allocation54_spill] sm:$0xff]  ;;  %v2209_v62 = vmax.f32 %v5223_v3, %v2081_v23 }
 0x362   : > { %v2080_v2 = vmul.f32 0.01, %v1904_v39  ;;  %v4509_v32 = vadd.f32 %v1626_v34, %v1418_v11 }
 0x364   : > { %5222 = vst [vmem:[#allocation23_spill] sm:$0xff] %v4509_v32  ;;  %v2208_v4 = vmax.f32 %v1904_v39, %v2080_v2  ;;  %2403 = vmatmul.f32.gmra.mxu2 %v2207_v14  ;;  %v5225_v39 = vld [vmem:[#allocation55_spill] sm:$0xff] }
 0x365   : > { %v1697_v0 = vpop.f32.mrf.mxu0  ;;  %v1906_v63 = vpop.f32.mrf.mxu1  ;;  %v3131_v2 = vld [vmem:[%s3598_s10] sm:$0xff] }
 0x366   : > { %v1698_v61 = vadd.f32 %v1697_v0, %v4371_v30  ;;  %2612 = vmatmul.f32.gmra.mxu3 %v2208_v4 }
 0x367   : > { %v2356_v42 = vpop.f32.mrf.mxu2 }
 0x368   : > { %v1907_v43 = vadd.f32 %v1906_v63, %v1698_v61  ;;  %v2357_v36 = vadd.f32 %v4514_v57, %v2356_v42  ;;  %1744 = vmatmul.f32.gmra.mxu0 %v5224_v35  ;;  %1953 = vmatmul.f32.gmra.mxu1 %v5225_v39  ;;  %v2083_v63 = vmul.f32 0.01, %v5226_v5 }
 0x369   : > { %v2565_v11 = vpop.f32.mrf.mxu3 }
 0x36a   : > { %v2082_v10 = vmul.f32 0.01, %v1907_v43  ;;  %v2566_v34 = vadd.f32 %v2565_v11, %v2357_v36  ;;  %v5228_v36 = vld [vmem:[#allocation58_spill] sm:$0xff]  ;;  %v2211_v39 = vmax.f32 %v5226_v5, %v2083_v63  ;;  %v5230_v63 = vld [vmem:[#allocation60_spill] sm:$0xff] }
 0x36c   : > { %v2210_v14 = vmax.f32 %v1907_v43, %v2082_v10  ;;  %v2757_v32 = vadd.f32 %v3131_v2, %v2566_v34  ;;  %2406 = vmatmul.f32.gmra.mxu2 %v2209_v62  ;;  %v5227_v43 = vld [vmem:[#allocation57_spill] sm:$0xff] }
 0x36d   : > { %v1700_v0 = vpop.f32.mrf.mxu0  ;;  %v1909_v4 = vpop.f32.mrf.mxu1  ;;  %v3132_v34 = vld [vmem:[%s3598_s10 + $0x8] sm:$0xff] }
 0x36e   : > { %2821 = vst [vmem:[%s4526_s16] sm:$0xff] %v2757_v32  ;;  %v1701_v61 = vadd.f32 %v1700_v0, %v4371_v30  ;;  %2615 = vmatmul.f32.gmra.mxu3 %v2210_v14  ;;  %v5229_v0 = vld [vmem:[#allocation65_spill] sm:$0xff] }
 0x36f   : > { %v2359_v3 = vpop.f32.mrf.mxu2 }
 0x370   : > { %v1910_v23 = vadd.f32 %v1909_v4, %v1701_v61  ;;  %v2360_v42 = vadd.f32 %v4514_v57, %v2359_v3  ;;  %1747 = vmatmul.f32.gmra.mxu0 %v5227_v43  ;;  %1956 = vmatmul.f32.gmra.mxu1 %v5228_v36  ;;  %v2085_v4 = vmul.f32 0.01, %v5229_v0 }
 0x371   : > { %v2568_v35 = vpop.f32.mrf.mxu3 }
 0x372   : > { %v2084_v11 = vmul.f32 0.01, %v1910_v23  ;;  %v2569_v62 = vadd.f32 %v2568_v35, %v2360_v42  ;;  %v2213_v36 = vmax.f32 %v5229_v0, %v2085_v4  ;;  %v5233_v4 = vld [vmem:[#allocation63_spill] sm:$0xff] }
 0x374   : > { %v2212_v10 = vmax.f32 %v1910_v23, %v2084_v11  ;;  %v2758_v32 = vadd.f32 %v3132_v34, %v2569_v62  ;;  %2409 = vmatmul.f32.gmra.mxu2 %v2211_v39  ;;  %v5231_v23 = vld [vmem:[#allocation61_spill] sm:$0xff] }
 0x375   : > { %v1703_v2 = vpop.f32.mrf.mxu0  ;;  %v1912_v14 = vpop.f32.mrf.mxu1  ;;  %v3133_v62 = vld [vmem:[%s3598_s10 + $0x10] sm:$0xff] }
 0x376   : > { %2822 = vst [vmem:[%s4526_s16 + $0x8] sm:$0xff] %v2758_v32  ;;  %v1704_v61 = vadd.f32 %v1703_v2, %v4371_v30  ;;  %2618 = vmatmul.f32.gmra.mxu3 %v2212_v10  ;;  %v5232_v2 = vld [vmem:[#allocation68_spill] sm:$0xff] }
 0x377   : > { %v2362_v3 = vpop.f32.mrf.mxu2 }
 0x378   : > { %v1913_v43 = vadd.f32 %v1912_v14, %v1704_v61  ;;  %v2363_v5 = vadd.f32 %v4514_v57, %v2362_v3  ;;  %1750 = vmatmul.f32.gmra.mxu0 %v5230_v63  ;;  %1959 = vmatmul.f32.gmra.mxu1 %v5231_v23  ;;  %v2087_v14 = vmul.f32 0.01, %v5232_v2 }
 0x379   : > { %v2571_v42 = vpop.f32.mrf.mxu3 }
 0x37a   : > { %v2086_v35 = vmul.f32 0.01, %v1913_v43  ;;  %v2572_v39 = vadd.f32 %v2571_v42, %v2363_v5  ;;  %v2215_v23 = vmax.f32 %v5232_v2, %v2087_v14  ;;  %v5236_v14 = vld [vmem:[#allocation66_spill] sm:$0xff] }
 0x37c   : > { %v2214_v11 = vmax.f32 %v1913_v43, %v2086_v35  ;;  %v2759_v34 = vadd.f32 %v3133_v62, %v2572_v39  ;;  %2412 = vmatmul.f32.gmra.mxu2 %v2213_v36  ;;  %v5234_v43 = vld [vmem:[#allocation64_spill] sm:$0xff]  ;;  %v3134_v39 = vld [vmem:[%s3598_s10 + $0x18] sm:$0xff] }
 0x37d   : > { %v1706_v32 = vpop.f32.mrf.mxu0  ;;  %v1915_v10 = vpop.f32.mrf.mxu1 }
 0x37e   : > { %2823 = vst [vmem:[%s4526_s16 + $0x10] sm:$0xff] %v2759_v34  ;;  %v1707_v61 = vadd.f32 %v1706_v32, %v4371_v30  ;;  %2621 = vmatmul.f32.gmra.mxu3 %v2214_v11  ;;  %v5235_v32 = vld [vmem:[#allocation71_spill] sm:$0xff] }
 0x37f   : > { %v2365_v3 = vpop.f32.mrf.mxu2 }
 0x380   : > { %v1916_v63 = vadd.f32 %v1915_v10, %v1707_v61  ;;  %v2366_v0 = vadd.f32 %v4514_v57, %v2365_v3  ;;  %1753 = vmatmul.f32.gmra.mxu0 %v5233_v4  ;;  %1962 = vmatmul.f32.gmra.mxu1 %v5234_v43  ;;  %v2089_v10 = vmul.f32 0.01, %v5235_v32 }
 0x381   : > { %v2574_v5 = vpop.f32.mrf.mxu3 }
 0x382   : > { %v2088_v42 = vmul.f32 0.01, %v1916_v63  ;;  %v2575_v36 = vadd.f32 %v2574_v5, %v2366_v0  ;;  %v2217_v43 = vmax.f32 %v5235_v32, %v2089_v10  ;;  %v5239_v10 = vld [vmem:[#allocation69_spill] sm:$0xff] }
 0x384   : > { %v2216_v35 = vmax.f32 %v1916_v63, %v2088_v42  ;;  %v2760_v62 = vadd.f32 %v3134_v39, %v2575_v36  ;;  %2415 = vmatmul.f32.gmra.mxu2 %v2215_v23  ;;  %v5237_v63 = vld [vmem:[#allocation67_spill] sm:$0xff] }
 0x385   : > { %v1709_v34 = vpop.f32.mrf.mxu0  ;;  %v1918_v11 = vpop.f32.mrf.mxu1  ;;  %v3135_v36 = vld [vmem:[%s3598_s10 + $0x20] sm:$0xff] }
 0x386   : > { %2824 = vst [vmem:[%s4526_s16 + $0x18] sm:$0xff] %v2760_v62  ;;  %v1710_v61 = vadd.f32 %v1709_v34, %v4371_v30  ;;  %2624 = vmatmul.f32.gmra.mxu3 %v2216_v35  ;;  %v5238_v34 = vld [vmem:[#allocation74_spill] sm:$0xff] }
 0x387   : > { %v2368_v3 = vpop.f32.mrf.mxu2 }
 0x388   : > { %v1919_v4 = vadd.f32 %v1918_v11, %v1710_v61  ;;  %v2369_v2 = vadd.f32 %v4514_v57, %v2368_v3  ;;  %1756 = vmatmul.f32.gmra.mxu0 %v5236_v14  ;;  %1965 = vmatmul.f32.gmra.mxu1 %v5237_v63  ;;  %v2091_v11 = vmul.f32 0.01, %v5238_v34 }
 0x389   : > { %v2577_v0 = vpop.f32.mrf.mxu3 }
 0x38a   : > { %v2090_v5 = vmul.f32 0.01, %v1919_v4  ;;  %v2578_v23 = vadd.f32 %v2577_v0, %v2369_v2  ;;  %v2219_v63 = vmax.f32 %v5238_v34, %v2091_v11  ;;  %v5242_v11 = vld [vmem:[#allocation72_spill] sm:$0xff] }
 0x38c   : > { %v2218_v42 = vmax.f32 %v1919_v4, %v2090_v5  ;;  %v2761_v39 = vadd.f32 %v3135_v36, %v2578_v23  ;;  %2418 = vmatmul.f32.gmra.mxu2 %v2217_v43  ;;  %v5240_v4 = vld [vmem:[#allocation70_spill] sm:$0xff]  ;;  %v3136_v23 = vld [vmem:[%s3598_s10 + $0x28] sm:$0xff] }
 0x38d   : > { %v1712_v62 = vpop.f32.mrf.mxu0  ;;  %v1921_v35 = vpop.f32.mrf.mxu1 }
 0x38e   : > { %2825 = vst [vmem:[%s4526_s16 + $0x20] sm:$0xff] %v2761_v39  ;;  %v1713_v61 = vadd.f32 %v1712_v62, %v4371_v30  ;;  %2627 = vmatmul.f32.gmra.mxu3 %v2218_v42  ;;  %v5241_v62 = vld [vmem:[#allocation77_spill] sm:$0xff] }
 0x38f   : > { %v2371_v3 = vpop.f32.mrf.mxu2 }
 0x390   : > { %v1922_v14 = vadd.f32 %v1921_v35, %v1713_v61  ;;  %v2372_v32 = vadd.f32 %v4514_v57, %v2371_v3  ;;  %1759 = vmatmul.f32.gmra.mxu0 %v5239_v10  ;;  %1968 = vmatmul.f32.gmra.mxu1 %v5240_v4  ;;  %v2093_v35 = vmul.f32 0.01, %v5241_v62 }
 0x391   : > { %v2580_v2 = vpop.f32.mrf.mxu3 }
 0x392   : > { %v2092_v0 = vmul.f32 0.01, %v1922_v14  ;;  %v2581_v43 = vadd.f32 %v2580_v2, %v2372_v32  ;;  %v2221_v4 = vmax.f32 %v5241_v62, %v2093_v35  ;;  %v5245_v35 = vld [vmem:[#allocation75_spill] sm:$0xff] }
 0x394   : > { %v2220_v5 = vmax.f32 %v1922_v14, %v2092_v0  ;;  %v2762_v36 = vadd.f32 %v3136_v23, %v2581_v43  ;;  %2421 = vmatmul.f32.gmra.mxu2 %v2219_v63  ;;  %v5243_v14 = vld [vmem:[#allocation73_spill] sm:$0xff] }
 0x395   : > { %v1715_v39 = vpop.f32.mrf.mxu0  ;;  %v1924_v42 = vpop.f32.mrf.mxu1  ;;  %v3137_v43 = vld [vmem:[%s3598_s10 + $0x30] sm:$0xff] }
 0x396   : > { %2826 = vst [vmem:[%s4526_s16 + $0x28] sm:$0xff] %v2762_v36  ;;  %v1716_v61 = vadd.f32 %v1715_v39, %v4371_v30  ;;  %2630 = vmatmul.f32.gmra.mxu3 %v2220_v5  ;;  %v5244_v39 = vld [vmem:[#allocation80_spill] sm:$0xff] }
 0x397   : > { %v2374_v3 = vpop.f32.mrf.mxu2 }
 0x398   : > { %v1925_v10 = vadd.f32 %v1924_v42, %v1716_v61  ;;  %v2375_v34 = vadd.f32 %v4514_v57, %v2374_v3  ;;  %1762 = vmatmul.f32.gmra.mxu0 %v5242_v11  ;;  %1971 = vmatmul.f32.gmra.mxu1 %v5243_v14  ;;  %v2095_v42 = vmul.f32 0.01, %v5244_v39 }
 0x399   : > { %v2583_v32 = vpop.f32.mrf.mxu3 }
 0x39a   : > { %v2094_v2 = vmul.f32 0.01, %v1925_v10  ;;  %v2584_v63 = vadd.f32 %v2583_v32, %v2375_v34  ;;  %v2223_v14 = vmax.f32 %v5244_v39, %v2095_v42  ;;  %v5248_v42 = vld [vmem:[#allocation78_spill] sm:$0xff] }
 0x39c   : > { %v2222_v0 = vmax.f32 %v1925_v10, %v2094_v2  ;;  %v2763_v23 = vadd.f32 %v3137_v43, %v2584_v63  ;;  %2424 = vmatmul.f32.gmra.mxu2 %v2221_v4  ;;  %v5246_v10 = vld [vmem:[#allocation76_spill] sm:$0xff]  ;;  %v3138_v63 = vld [vmem:[%s3598_s10 + $0x38] sm:$0xff] }
 0x39d   : > { %v1718_v36 = vpop.f32.mrf.mxu0  ;;  %v1927_v5 = vpop.f32.mrf.mxu1 }
 0x39e   : > { %2827 = vst [vmem:[%s4526_s16 + $0x30] sm:$0xff] %v2763_v23  ;;  %v1719_v61 = vadd.f32 %v1718_v36, %v4371_v30  ;;  %2633 = vmatmul.f32.gmra.mxu3 %v2222_v0  ;;  %v5247_v36 = vld [vmem:[#allocation83_spill] sm:$0xff] }
 0x39f   : > { %v2377_v3 = vpop.f32.mrf.mxu2 }
 0x3a0   : > { %v1928_v11 = vadd.f32 %v1927_v5, %v1719_v61  ;;  %v2378_v62 = vadd.f32 %v4514_v57, %v2377_v3  ;;  %1765 = vmatmul.f32.gmra.mxu0 %v5245_v35  ;;  %1974 = vmatmul.f32.gmra.mxu1 %v5246_v10  ;;  %v2097_v5 = vmul.f32 0.01, %v5247_v36 }
 0x3a1   : > { %v2586_v34 = vpop.f32.mrf.mxu3 }
 0x3a2   : > { %v2096_v32 = vmul.f32 0.01, %v1928_v11  ;;  %v2587_v4 = vadd.f32 %v2586_v34, %v2378_v62  ;;  %v2225_v10 = vmax.f32 %v5247_v36, %v2097_v5  ;;  %v5251_v5 = vld [vmem:[#allocation81_spill] sm:$0xff] }
 0x3a4   : > { %v2224_v2 = vmax.f32 %v1928_v11, %v2096_v32  ;;  %v2764_v43 = vadd.f32 %v3138_v63, %v2587_v4  ;;  %2427 = vmatmul.f32.gmra.mxu2 %v2223_v14  ;;  %v5249_v11 = vld [vmem:[#allocation79_spill] sm:$0xff] }
 0x3a5   : > { %v1721_v23 = vpop.f32.mrf.mxu0  ;;  %v1930_v0 = vpop.f32.mrf.mxu1  ;;  %v3139_v4 = vld [vmem:[%s3598_s10 + $0x40] sm:$0xff] }
 0x3a6   : > { %2828 = vst [vmem:[%s4526_s16 + $0x38] sm:$0xff] %v2764_v43  ;;  %v1722_v61 = vadd.f32 %v1721_v23, %v4371_v30  ;;  %2636 = vmatmul.f32.gmra.mxu3 %v2224_v2  ;;  %v5250_v23 = vld [vmem:[#allocation86_spill] sm:$0xff] }
 0x3a7   : > { %v2380_v3 = vpop.f32.mrf.mxu2 }
 0x3a8   : > { %v1931_v35 = vadd.f32 %v1930_v0, %v1722_v61  ;;  %v2381_v39 = vadd.f32 %v4514_v57, %v2380_v3  ;;  %1768 = vmatmul.f32.gmra.mxu0 %v5248_v42  ;;  %1977 = vmatmul.f32.gmra.mxu1 %v5249_v11  ;;  %v2099_v0 = vmul.f32 0.01, %v5250_v23 }
 0x3a9   : > { %v2589_v62 = vpop.f32.mrf.mxu3 }
 0x3aa   : > { %v2098_v34 = vmul.f32 0.01, %v1931_v35  ;;  %v2590_v14 = vadd.f32 %v2589_v62, %v2381_v39  ;;  %v2227_v11 = vmax.f32 %v5250_v23, %v2099_v0  ;;  %v5254_v0 = vld [vmem:[#allocation84_spill] sm:$0xff] }
 0x3ac   : > { %v2226_v32 = vmax.f32 %v1931_v35, %v2098_v34  ;;  %v2765_v63 = vadd.f32 %v3139_v4, %v2590_v14  ;;  %2430 = vmatmul.f32.gmra.mxu2 %v2225_v10  ;;  %v5252_v35 = vld [vmem:[#allocation82_spill] sm:$0xff]  ;;  %v3140_v14 = vld [vmem:[%s3598_s10 + $0x48] sm:$0xff] }
 0x3ad   : > { %v1724_v43 = vpop.f32.mrf.mxu0  ;;  %v1933_v2 = vpop.f32.mrf.mxu1 }
 0x3ae   : > { %2829 = vst [vmem:[%s4526_s16 + $0x40] sm:$0xff] %v2765_v63  ;;  %v1725_v61 = vadd.f32 %v1724_v43, %v4371_v30  ;;  %2639 = vmatmul.f32.gmra.mxu3 %v2226_v32  ;;  %v5253_v43 = vld [vmem:[#allocation89_spill] sm:$0xff] }
 0x3af   : > { %v2383_v3 = vpop.f32.mrf.mxu2 }
 0x3b0   : > { %v1934_v42 = vadd.f32 %v1933_v2, %v1725_v61  ;;  %v2384_v36 = vadd.f32 %v4514_v57, %v2383_v3  ;;  %1771 = vmatmul.f32.gmra.mxu0 %v5251_v5  ;;  %1980 = vmatmul.f32.gmra.mxu1 %v5252_v35  ;;  %v2101_v2 = vmul.f32 0.01, %v5253_v43 }
 0x3b1   : > { %v2592_v39 = vpop.f32.mrf.mxu3 }
 0x3b2   : > { %v2100_v62 = vmul.f32 0.01, %v1934_v42  ;;  %v2593_v10 = vadd.f32 %v2592_v39, %v2384_v36  ;;  %v2229_v35 = vmax.f32 %v5253_v43, %v2101_v2  ;;  %v5257_v2 = vld [vmem:[#allocation87_spill] sm:$0xff] }
 0x3b4   : > { %v2228_v34 = vmax.f32 %v1934_v42, %v2100_v62  ;;  %v2766_v4 = vadd.f32 %v3140_v14, %v2593_v10  ;;  %2433 = vmatmul.f32.gmra.mxu2 %v2227_v11  ;;  %v5255_v42 = vld [vmem:[#allocation85_spill] sm:$0xff] }
 0x3b5   : > { %v1727_v63 = vpop.f32.mrf.mxu0  ;;  %v1936_v32 = vpop.f32.mrf.mxu1  ;;  %v3141_v10 = vld [vmem:[%s3598_s10 + $0x50] sm:$0xff] }
 0x3b6   : > { %2830 = vst [vmem:[%s4526_s16 + $0x48] sm:$0xff] %v2766_v4  ;;  %v1728_v61 = vadd.f32 %v1727_v63, %v4371_v30  ;;  %2642 = vmatmul.f32.gmra.mxu3 %v2228_v34  ;;  %v5256_v63 = vld [vmem:[#allocation92_spill] sm:$0xff] }
 0x3b7   : > { %v2386_v3 = vpop.f32.mrf.mxu2 }
 0x3b8   : > { %v1937_v5 = vadd.f32 %v1936_v32, %v1728_v61  ;;  %v2387_v23 = vadd.f32 %v4514_v57, %v2386_v3  ;;  %1774 = vmatmul.f32.gmra.mxu0 %v5254_v0  ;;  %1983 = vmatmul.f32.gmra.mxu1 %v5255_v42  ;;  %v2103_v32 = vmul.f32 0.01, %v5256_v63 }
 0x3b9   : > { %v2595_v36 = vpop.f32.mrf.mxu3 }
 0x3ba   : > { %v2102_v39 = vmul.f32 0.01, %v1937_v5  ;;  %v2596_v11 = vadd.f32 %v2595_v36, %v2387_v23  ;;  %v2231_v42 = vmax.f32 %v5256_v63, %v2103_v32  ;;  %v5260_v32 = vld [vmem:[#allocation90_spill] sm:$0xff] }
 0x3bc   : > { %v2230_v62 = vmax.f32 %v1937_v5, %v2102_v39  ;;  %v2767_v14 = vadd.f32 %v3141_v10, %v2596_v11  ;;  %2436 = vmatmul.f32.gmra.mxu2 %v2229_v35  ;;  %v5258_v5 = vld [vmem:[#allocation88_spill] sm:$0xff]  ;;  %v3142_v11 = vld [vmem:[%s3598_s10 + $0x58] sm:$0xff] }
 0x3bd   : > { %v1730_v4 = vpop.f32.mrf.mxu0  ;;  %v1939_v34 = vpop.f32.mrf.mxu1 }
 0x3be   : > { %2831 = vst [vmem:[%s4526_s16 + $0x50] sm:$0xff] %v2767_v14  ;;  %v1731_v61 = vadd.f32 %v1730_v4, %v4371_v30  ;;  %2645 = vmatmul.f32.gmra.mxu3 %v2230_v62  ;;  %v5259_v4 = vld [vmem:[#allocation95_spill] sm:$0xff] }
 0x3bf   : > { %v2389_v3 = vpop.f32.mrf.mxu2 }
 0x3c0   : > { %v1940_v0 = vadd.f32 %v1939_v34, %v1731_v61  ;;  %v2390_v43 = vadd.f32 %v4514_v57, %v2389_v3  ;;  %1777 = vmatmul.f32.gmra.mxu0 %v5257_v2  ;;  %1986 = vmatmul.f32.gmra.mxu1 %v5258_v5  ;;  %v2105_v34 = vmul.f32 0.01, %v5259_v4 }
 0x3c1   : > { %v2598_v23 = vpop.f32.mrf.mxu3 }
 0x3c2   : > { %v2104_v36 = vmul.f32 0.01, %v1940_v0  ;;  %v2599_v35 = vadd.f32 %v2598_v23, %v2390_v43  ;;  %v2233_v5 = vmax.f32 %v5259_v4, %v2105_v34  ;;  %v5262_v34 = vld [vmem:[#allocation93_spill] sm:$0xff] }
 0x3c4   : > { %v2232_v39 = vmax.f32 %v1940_v0, %v2104_v36  ;;  %v2768_v10 = vadd.f32 %v3142_v11, %v2599_v35  ;;  %2439 = vmatmul.f32.gmra.mxu2 %v2231_v42  ;;  %v5261_v0 = vld [vmem:[#allocation91_spill] sm:$0xff] }
 0x3c5   : > { %v1733_v14 = vpop.f32.mrf.mxu0  ;;  %v1942_v62 = vpop.f32.mrf.mxu1  ;;  %v3143_v35 = vld [vmem:[%s3598_s10 + $0x60] sm:$0xff] }
 0x3c6   : > { %2832 = vst [vmem:[%s4526_s16 + $0x58] sm:$0xff] %v2768_v10  ;;  %v1734_v61 = vadd.f32 %v1733_v14, %v4371_v30  ;;  %2648 = vmatmul.f32.gmra.mxu3 %v2232_v39  ;;  %v2107_v14 = vmul.f32 0.01, %v4158_v26 }
 0x3c7   : > { %v2392_v3 = vpop.f32.mrf.mxu2 }
 0x3c8   : > { %v1943_v2 = vadd.f32 %v1942_v62, %v1734_v61  ;;  %v2393_v63 = vadd.f32 %v4514_v57, %v2392_v3  ;;  %1780 = vmatmul.f32.gmra.mxu0 %v5260_v32  ;;  %1989 = vmatmul.f32.gmra.mxu1 %v5261_v0  ;;  %v2235_v32 = vmax.f32 %v4158_v26, %v2107_v14  ;;  %v5264_v14 = vld [vmem:[#allocation96_spill] sm:$0xff] }
 0x3c9   : > { %v2601_v43 = vpop.f32.mrf.mxu3 }
 0x3ca   : > { %v2106_v23 = vmul.f32 0.01, %v1943_v2  ;;  %v2602_v42 = vadd.f32 %v2601_v43, %v2393_v63 }
 0x3cc   : > { %v2234_v36 = vmax.f32 %v1943_v2, %v2106_v23  ;;  %v2769_v11 = vadd.f32 %v3143_v35, %v2602_v42  ;;  %2442 = vmatmul.f32.gmra.mxu2 %v2233_v5  ;;  %v5263_v2 = vld [vmem:[#allocation94_spill] sm:$0xff]  ;;  %v3144_v23 = vld [vmem:[%s3598_s10 + $0x68] sm:$0xff] }
 0x3cd   : > { %v1736_v10 = vpop.f32.mrf.mxu0  ;;  %v1945_v39 = vpop.f32.mrf.mxu1 }
 0x3ce   : > { %2833 = vst [vmem:[%s4526_s16 + $0x60] sm:$0xff] %v2769_v11  ;;  %v1737_v62 = vadd.f32 %v1736_v10, %v4371_v30  ;;  %2651 = vmatmul.f32.gmra.mxu3 %v2234_v36  ;;  %v2109_v11 = vmul.f32 0.01, %v4171_v18 }
 0x3cf   : > { %v2395_v61 = vpop.f32.mrf.mxu2 }
 0x3d0   : > { %v1946_v3 = vadd.f32 %v1945_v39, %v1737_v62  ;;  %v2396_v4 = vadd.f32 %v4514_v57, %v2395_v61  ;;  %1783 = vmatmul.f32.gmra.mxu0 %v5262_v34  ;;  %1992 = vmatmul.f32.gmra.mxu1 %v5263_v2 }
 0x3d1   : > { %v2604_v63 = vpop.f32.mrf.mxu3 }
 0x3d2   : > { %v2108_v0 = vmul.f32 0.01, %v1946_v3  ;;  %v2605_v43 = vadd.f32 %v2604_v63, %v2396_v4  ;;  %v3145_v63 = vld [vmem:[%s3598_s10 + $0x70] sm:$0xff] }
 0x3d4   : > { %v2236_v5 = vmax.f32 %v1946_v3, %v2108_v0  ;;  %v2770_v42 = vadd.f32 %v3144_v23, %v2605_v43  ;;  %2445 = vmatmul.f32.gmra.mxu2 %v2235_v32  ;;  %v2237_v3 = vmax.f32 %v4171_v18, %v2109_v11 }
 0x3d5   : > { %v1739_v35 = vpop.f32.mrf.mxu0  ;;  %v1948_v36 = vpop.f32.mrf.mxu1 }
 0x3d6   : > { %2834 = vst [vmem:[%s4526_s16 + $0x68] sm:$0xff] %v2770_v42  ;;  %v1740_v10 = vadd.f32 %v1739_v35, %v4371_v30  ;;  %2654 = vmatmul.f32.gmra.mxu3 %v2236_v5  ;;  %v2111_v5 = vmul.f32 0.01, %v4184_v15 }
 0x3d7   : > { %v2398_v39 = vpop.f32.mrf.mxu2 }
 0x3d8   : > { %v1949_v62 = vadd.f32 %v1948_v36, %v1740_v10  ;;  %v2399_v26 = vadd.f32 %v4514_v57, %v2398_v39  ;;  %1786 = vmatmul.f32.gmra.mxu0 %v4154_v19  ;;  %1995 = vmatmul.f32.gmra.mxu1 %v5264_v14  ;;  %v2239_v36 = vmax.f32 %v4184_v15, %v2111_v5 }
 0x3d9   : > { %v2607_v61 = vpop.f32.mrf.mxu3 }
 0x3da   : > { %v2110_v4 = vmul.f32 0.01, %v1949_v62  ;;  %v2608_v34 = vadd.f32 %v2607_v61, %v2399_v26 }
 0x3dc   : > { %v2238_v2 = vmax.f32 %v1949_v62, %v2110_v4  ;;  %v2771_v32 = vadd.f32 %v3145_v63, %v2608_v34  ;;  %2448 = vmatmul.f32.gmra.mxu2 %v2237_v3  ;;  %v3146_v62 = vld [vmem:[%s3598_s10 + $0x78] sm:$0xff]  ;;  %v2113_v3 = vmul.f32 0.01, %v4197_v58  ;;  %v5265_v34 = vld [vmem:[#allocation97_spill] sm:$0xff] }
 0x3dd   : > { %v1742_v0 = vpop.f32.mrf.mxu0  ;;  %v1951_v43 = vpop.f32.mrf.mxu1 }
 0x3de   : > { %2835 = vst [vmem:[%s4526_s16 + $0x70] sm:$0xff] %v2771_v32  ;;  %v1743_v23 = vadd.f32 %v1742_v0, %v4371_v30  ;;  %2657 = vmatmul.f32.gmra.mxu3 %v2238_v2  ;;  %v5266_v2 = vld [vmem:[#allocation98_spill] sm:$0xff]  ;;  %v2241_v32 = vmax.f32 %v4197_v58, %v2113_v3 }
 0x3df   : > { %v2401_v19 = vpop.f32.mrf.mxu2 }
 0x3e0   : > { %v1952_v42 = vadd.f32 %v1951_v43, %v1743_v23  ;;  %v2402_v18 = vadd.f32 %v4514_v57, %v2401_v19  ;;  %1789 = vmatmul.f32.gmra.mxu0 %v4167_v48  ;;  %1998 = vmatmul.f32.gmra.mxu1 %v4169_v7  ;;  %v3147_v23 = vld [vmem:[%s3598_s10 + $0x80] sm:$0xff] }
 0x3e1   : > { %v2610_v35 = vpop.f32.mrf.mxu3 }
 0x3e2   : > { %v2112_v11 = vmul.f32 0.01, %v1952_v42  ;;  %v2611_v10 = vadd.f32 %v2610_v35, %v2402_v18  ;;  %v2115_v35 = vmul.f32 0.01, %v4210_v53 }
 0x3e4   : > { %v2240_v39 = vmax.f32 %v1952_v42, %v2112_v11  ;;  %v2772_v26 = vadd.f32 %v3146_v62, %v2611_v10  ;;  %2451 = vmatmul.f32.gmra.mxu2 %v2239_v36 }
 0x3e5   : > { %v1745_v14 = vpop.f32.mrf.mxu0  ;;  %v1954_v61 = vpop.f32.mrf.mxu1 }
 0x3e6   : > { %2836 = vst [vmem:[%s4526_s16 + $0x78] sm:$0xff] %v2772_v26  ;;  %v1746_v4 = vadd.f32 %v1745_v14, %v4371_v30  ;;  %2660 = vmatmul.f32.gmra.mxu3 %v2240_v39  ;;  %v5267_v39 = vld [vmem:[#allocation99_spill] sm:$0xff]  ;;  %v2243_v26 = vmax.f32 %v4210_v53, %v2115_v35 }
 0x3e7   : > { %v2404_v48 = vpop.f32.mrf.mxu2 }
 0x3e8   : > { %v1955_v7 = vadd.f32 %v1954_v61, %v1746_v4  ;;  %v2405_v15 = vadd.f32 %v4514_v57, %v2404_v48  ;;  %1792 = vmatmul.f32.gmra.mxu0 %v5265_v34  ;;  %2001 = vmatmul.f32.gmra.mxu1 %v5266_v2  ;;  %v3148_v4 = vld [vmem:[%s3598_s10 + $0x88] sm:$0xff]  ;;  %v2117_v34 = vmul.f32 0.01, %v4223_v60 }
 0x3e9   : > { %v2613_v63 = vpop.f32.mrf.mxu3 }
 0x3ea   : > { %v2114_v0 = vmul.f32 0.01, %v1955_v7  ;;  %v2614_v43 = vadd.f32 %v2613_v63, %v2405_v15 }
 0x3ec   : > { %v2242_v5 = vmax.f32 %v1955_v7, %v2114_v0  ;;  %v2773_v19 = vadd.f32 %v3147_v23, %v2614_v43  ;;  %2454 = vmatmul.f32.gmra.mxu2 %v2241_v32  ;;  %v5268_v32 = vld [vmem:[#allocation100_spill] sm:$0xff]  ;;  %v2245_v43 = vmax.f32 %v4223_v60, %v2117_v34 }
 0x3ed   : > { %v1748_v42 = vpop.f32.mrf.mxu0  ;;  %v1957_v18 = vpop.f32.mrf.mxu1 }
 0x3ee   : > { %2837 = vst [vmem:[%s4526_s16 + $0x80] sm:$0xff] %v2773_v19  ;;  %v1749_v36 = vadd.f32 %v1748_v42, %v4371_v30  ;;  %2663 = vmatmul.f32.gmra.mxu3 %v2242_v5  ;;  %v3149_v42 = vld [vmem:[%s3598_s10 + $0x90] sm:$0xff] }
 0x3ef   : > { %v2407_v11 = vpop.f32.mrf.mxu2 }
 0x3f0   : > { %v1958_v10 = vadd.f32 %v1957_v18, %v1749_v36  ;;  %v2408_v58 = vadd.f32 %v4514_v57, %v2407_v11  ;;  %1795 = vmatmul.f32.gmra.mxu0 %v4193_v8  ;;  %2004 = vmatmul.f32.gmra.mxu1 %v5267_v39  ;;  %v2119_v11 = vmul.f32 0.01, %v4236_v6 }
 0x3f1   : > { %v2616_v62 = vpop.f32.mrf.mxu3 }
 0x3f2   : > { %v2116_v14 = vmul.f32 0.01, %v1958_v10  ;;  %v2617_v61 = vadd.f32 %v2616_v62, %v2408_v58  ;;  %v2247_v62 = vmax.f32 %v4236_v6, %v2119_v11 }
 0x3f4   : > { %v2244_v3 = vmax.f32 %v1958_v10, %v2116_v14  ;;  %v2774_v48 = vadd.f32 %v3148_v4, %v2617_v61  ;;  %2457 = vmatmul.f32.gmra.mxu2 %v2243_v26 }
 0x3f5   : > { %v1751_v7 = vpop.f32.mrf.mxu0  ;;  %v1960_v15 = vpop.f32.mrf.mxu1 }
 0x3f6   : > { %2838 = vst [vmem:[%s4526_s16 + $0x88] sm:$0xff] %v2774_v48  ;;  %v1752_v2 = vadd.f32 %v1751_v7, %v4371_v30  ;;  %2666 = vmatmul.f32.gmra.mxu3 %v2244_v3  ;;  %v3150_v3 = vld [vmem:[%s3598_s10 + $0x98] sm:$0xff] }
 0x3f7   : > { %v2410_v8 = vpop.f32.mrf.mxu2 }
 0x3f8   : > { %v1961_v63 = vadd.f32 %v1960_v15, %v1752_v2  ;;  %v2411_v53 = vadd.f32 %v4514_v57, %v2410_v8  ;;  %1798 = vmatmul.f32.gmra.mxu0 %v4206_v51  ;;  %2007 = vmatmul.f32.gmra.mxu1 %v5268_v32  ;;  %v2121_v15 = vmul.f32 0.01, %v4249_v45  ;;  %v5269_v2 = vld [vmem:[#allocation101_spill] sm:$0xff]  ;;  %v5270_v8 = vld [vmem:[#allocation102_spill] sm:$0xff] }
 0x3f9   : > { %v2619_v0 = vpop.f32.mrf.mxu3 }
 0x3fa   : > { %v2118_v5 = vmul.f32 0.01, %v1961_v63  ;;  %v2620_v23 = vadd.f32 %v2619_v0, %v2411_v53  ;;  %v2249_v53 = vmax.f32 %v4249_v45, %v2121_v15  ;;  %v5272_v15 = vld [vmem:[#allocation104_spill] sm:$0xff] }
 0x3fc   : > { %v2246_v19 = vmax.f32 %v1961_v63, %v2118_v5  ;;  %v2775_v18 = vadd.f32 %v3149_v42, %v2620_v23  ;;  %2460 = vmatmul.f32.gmra.mxu2 %v2245_v43  ;;  %v3151_v5 = vld [vmem:[%s3598_s10 + $0xa0] sm:$0xff] }
 0x3fd   : > { %v1754_v35 = vpop.f32.mrf.mxu0  ;;  %v1963_v36 = vpop.f32.mrf.mxu1 }
 0x3fe   : > { %2839 = vst [vmem:[%s4526_s16 + $0x90] sm:$0xff] %v2775_v18  ;;  %v1755_v10 = vadd.f32 %v1754_v35, %v4371_v30  ;;  %2669 = vmatmul.f32.gmra.mxu3 %v2246_v19  ;;  %v2123_v18 = vmul.f32 0.01, %v4262_v41 }
 0x3ff   : > { %v2413_v51 = vpop.f32.mrf.mxu2 }
 0x400   : > { %v1964_v58 = vadd.f32 %v1963_v36, %v1755_v10  ;;  %v2414_v60 = vadd.f32 %v4514_v57, %v2413_v51  ;;  %1801 = vmatmul.f32.gmra.mxu0 %v4219_v55  ;;  %2010 = vmatmul.f32.gmra.mxu1 %v4221_v40  ;;  %v5271_v10 = vld [vmem:[#allocation103_spill] sm:$0xff] }
 0x401   : > { %v2622_v39 = vpop.f32.mrf.mxu3 }
 0x402   : > { %v2120_v26 = vmul.f32 0.01, %v1964_v58  ;;  %v2623_v14 = vadd.f32 %v2622_v39, %v2414_v60 }
 0x404   : > { %v2248_v61 = vmax.f32 %v1964_v58, %v2120_v26  ;;  %v2776_v4 = vadd.f32 %v3150_v3, %v2623_v14  ;;  %2463 = vmatmul.f32.gmra.mxu2 %v2247_v62  ;;  %v2251_v58 = vmax.f32 %v4262_v41, %v2123_v18  ;;  %v3152_v26 = vld [vmem:[%s3598_s10 + $0xa8] sm:$0xff] }
 0x405   : > { %v1757_v48 = vpop.f32.mrf.mxu0  ;;  %v1966_v7 = vpop.f32.mrf.mxu1 }
 0x406   : > { %2840 = vst [vmem:[%s4526_s16 + $0x98] sm:$0xff] %v2776_v4  ;;  %v1758_v34 = vadd.f32 %v1757_v48, %v4371_v30  ;;  %2672 = vmatmul.f32.gmra.mxu3 %v2248_v61  ;;  %v2125_v4 = vmul.f32 0.01, %v4275_v38 }
 0x407   : > { %v2416_v55 = vpop.f32.mrf.mxu2 }
 0x408   : > { %v1967_v40 = vadd.f32 %v1966_v7, %v1758_v34  ;;  %v2417_v6 = vadd.f32 %v4514_v57, %v2416_v55  ;;  %1804 = vmatmul.f32.gmra.mxu0 %v5269_v2  ;;  %2013 = vmatmul.f32.gmra.mxu1 %v5270_v8  ;;  %v2253_v55 = vmax.f32 %v4275_v38, %v2125_v4  ;;  %v3153_v8 = vld [vmem:[%s3598_s10 + $0xb0] sm:$0xff]  ;;  %v3155_v4 = vld [vmem:[%s3598_s10 + $0xc0] sm:$0xff] }
 0x409   : > { %v2625_v63 = vpop.f32.mrf.mxu3 }
 0x40a   : > { %v2122_v32 = vmul.f32 0.01, %v1967_v40  ;;  %v2626_v0 = vadd.f32 %v2625_v63, %v2417_v6 }
 0x40c   : > { %v2250_v43 = vmax.f32 %v1967_v40, %v2122_v32  ;;  %v2777_v23 = vadd.f32 %v3151_v5, %v2626_v0  ;;  %2466 = vmatmul.f32.gmra.mxu2 %v2249_v53  ;;  %v2127_v0 = vmul.f32 0.01, %v4288_v50 }
 0x40d   : > { %v1760_v19 = vpop.f32.mrf.mxu0  ;;  %v1969_v42 = vpop.f32.mrf.mxu1 }
 0x40e   : > { %2841 = vst [vmem:[%s4526_s16 + $0xa0] sm:$0xff] %v2777_v23  ;;  %v1761_v35 = vadd.f32 %v1760_v19, %v4371_v30  ;;  %2675 = vmatmul.f32.gmra.mxu3 %v2250_v43  ;;  %v2255_v19 = vmax.f32 %v4288_v50, %v2127_v0 }
 0x40f   : > { %v2419_v36 = vpop.f32.mrf.mxu2 }
 0x410   : > { %v1970_v11 = vadd.f32 %v1969_v42, %v1761_v35  ;;  %v2420_v45 = vadd.f32 %v4514_v57, %v2419_v36  ;;  %1807 = vmatmul.f32.gmra.mxu0 %v4245_v52  ;;  %2016 = vmatmul.f32.gmra.mxu1 %v5271_v10  ;;  %v3154_v36 = vld [vmem:[%s3598_s10 + $0xb8] sm:$0xff] }
 0x411   : > { %v2628_v51 = vpop.f32.mrf.mxu3 }
 0x412   : > { %v2124_v60 = vmul.f32 0.01, %v1970_v11  ;;  %v2629_v39 = vadd.f32 %v2628_v51, %v2420_v45  ;;  %v2129_v51 = vmul.f32 0.01, %v4301_v12 }
 0x414   : > { %v2252_v62 = vmax.f32 %v1970_v11, %v2124_v60  ;;  %v2778_v14 = vadd.f32 %v3152_v26, %v2629_v39  ;;  %2469 = vmatmul.f32.gmra.mxu2 %v2251_v58  ;;  %v5273_v60 = vld [vmem:[#allocation105_spill] sm:$0xff]  ;;  %v5274_v39 = vld [vmem:[#allocation106_spill] sm:$0xff]  ;;  %v2257_v26 = vmax.f32 %v4301_v12, %v2129_v51 }
 0x415   : > { %v1763_v61 = vpop.f32.mrf.mxu0  ;;  %v1972_v3 = vpop.f32.mrf.mxu1 }
 0x416   : > { %2842 = vst [vmem:[%s4526_s16 + $0xa8] sm:$0xff] %v2778_v14  ;;  %v1764_v48 = vadd.f32 %v1763_v61, %v4371_v30  ;;  %2678 = vmatmul.f32.gmra.mxu3 %v2252_v62 }
 0x417   : > { %v2422_v52 = vpop.f32.mrf.mxu2 }
 0x418   : > { %v1973_v7 = vadd.f32 %v1972_v3, %v1764_v48  ;;  %v2423_v41 = vadd.f32 %v4514_v57, %v2422_v52  ;;  %1810 = vmatmul.f32.gmra.mxu0 %v4258_v27  ;;  %2019 = vmatmul.f32.gmra.mxu1 %v5272_v15 }
 0x419   : > { %v2631_v34 = vpop.f32.mrf.mxu3 }
 0x41a   : > { %v2126_v40 = vmul.f32 0.01, %v1973_v7  ;;  %v2632_v6 = vadd.f32 %v2631_v34, %v2423_v41  ;;  %v2131_v41 = vmul.f32 0.01, %v4314_v17 }
 0x41c   : > { %v2254_v2 = vmax.f32 %v1973_v7, %v2126_v40  ;;  %v2779_v63 = vadd.f32 %v3153_v8, %v2632_v6  ;;  %2472 = vmatmul.f32.gmra.mxu2 %v2253_v55  ;;  %v5275_v40 = vld [vmem:[#allocation107_spill] sm:$0xff] }
 0x41d   : > { %v1766_v53 = vpop.f32.mrf.mxu0  ;;  %v1975_v32 = vpop.f32.mrf.mxu1 }
 0x41e   : > { %2843 = vst [vmem:[%s4526_s16 + $0xb0] sm:$0xff] %v2779_v63  ;;  %v1767_v43 = vadd.f32 %v1766_v53, %v4371_v30  ;;  %2681 = vmatmul.f32.gmra.mxu3 %v2254_v2  ;;  %v2259_v2 = vmax.f32 %v4314_v17, %v2131_v41 }
 0x41f   : > { %v2425_v27 = vpop.f32.mrf.mxu2 }
 0x420   : > { %v1976_v5 = vadd.f32 %v1975_v32, %v1767_v43  ;;  %v2426_v38 = vadd.f32 %v4514_v57, %v2425_v27  ;;  %1813 = vmatmul.f32.gmra.mxu0 %v4271_v21  ;;  %2022 = vmatmul.f32.gmra.mxu1 %v4273_v16  ;;  %v3156_v32 = vld [vmem:[%s3598_s10 + $0xc8] sm:$0xff] }
 0x421   : > { %v2634_v23 = vpop.f32.mrf.mxu3 }
 0x422   : > { %v2128_v42 = vmul.f32 0.01, %v1976_v5  ;;  %v2635_v18 = vadd.f32 %v2634_v23, %v2426_v38 }
 0x424   : > { %v2256_v35 = vmax.f32 %v1976_v5, %v2128_v42  ;;  %v2780_v11 = vadd.f32 %v3154_v36, %v2635_v18  ;;  %2475 = vmatmul.f32.gmra.mxu2 %v2255_v19  ;;  %v2133_v5 = vmul.f32 0.01, %v4327_v24  ;;  %v5276_v19 = vld [vmem:[#allocation108_spill] sm:$0xff] }
 0x425   : > { %v1769_v45 = vpop.f32.mrf.mxu0  ;;  %v1978_v10 = vpop.f32.mrf.mxu1 }
 0x426   : > { %2844 = vst [vmem:[%s4526_s16 + $0xb8] sm:$0xff] %v2780_v11  ;;  %v1770_v58 = vadd.f32 %v1769_v45, %v4371_v30  ;;  %2684 = vmatmul.f32.gmra.mxu3 %v2256_v35  ;;  %v2261_v18 = vmax.f32 %v4327_v24, %v2133_v5  ;;  %v3157_v45 = vld [vmem:[%s3598_s10 + $0xd0] sm:$0xff] }
 0x427   : > { %v2428_v21 = vpop.f32.mrf.mxu2 }
 0x428   : > { %v1979_v16 = vadd.f32 %v1978_v10, %v1770_v58  ;;  %v2429_v50 = vadd.f32 %v4514_v57, %v2428_v21  ;;  %1816 = vmatmul.f32.gmra.mxu0 %v5273_v60  ;;  %2025 = vmatmul.f32.gmra.mxu1 %v5274_v39  ;;  %v2135_v21 = vmul.f32 0.01, %v4340_v37  ;;  %v5277_v60 = vld [vmem:[#allocation109_spill] sm:$0xff] }
 0x429   : > { %v2637_v62 = vpop.f32.mrf.mxu3 }
 0x42a   : > { %v2130_v14 = vmul.f32 0.01, %v1979_v16  ;;  %v2638_v61 = vadd.f32 %v2637_v62, %v2429_v50  ;;  %v2263_v62 = vmax.f32 %v4340_v37, %v2135_v21  ;;  %v4749_v37 = vld [vmem:[%s4960_s6] ss:$0 sm:$0xff] }
 0x42c   : > { %v2258_v3 = vmax.f32 %v1979_v16, %v2130_v14  ;;  %v2781_v48 = vadd.f32 %v3155_v4, %v2638_v61  ;;  %2478 = vmatmul.f32.gmra.mxu2 %v2257_v26 }
 0x42d   : > { %v1772_v52 = vpop.f32.mrf.mxu0  ;;  %v1981_v7 = vpop.f32.mrf.mxu1 }
 0x42e   : > { %2845 = vst [vmem:[%s4526_s16 + $0xc0] sm:$0xff] %v2781_v48  ;;  %v1773_v15 = vadd.f32 %v1772_v52, %v4371_v30  ;;  %2687 = vmatmul.f32.gmra.mxu3 %v2258_v3  ;;  %v3158_v3 = vld [vmem:[%s3598_s10 + $0xd8] sm:$0xff] }
 0x42f   : > { %v2431_v34 = vpop.f32.mrf.mxu2 }
 0x430   : > { %v1982_v55 = vadd.f32 %v1981_v7, %v1773_v15  ;;  %v2432_v12 = vadd.f32 %v4514_v57, %v2431_v34  ;;  %1819 = vmatmul.f32.gmra.mxu0 %v4297_v28  ;;  %2028 = vmatmul.f32.gmra.mxu1 %v5275_v40  ;;  %v2137_v7 = vmul.f32 0.01, %v4353_v56  ;;  %v5278_v34 = vld [vmem:[#allocation110_spill] sm:$0xff] }
 0x431   : > { %v2640_v6 = vpop.f32.mrf.mxu3 }
 0x432   : > { %v2132_v8 = vmul.f32 0.01, %v1982_v55  ;;  %v2641_v63 = vadd.f32 %v2640_v6, %v2432_v12  ;;  %v2265_v12 = vmax.f32 %v4353_v56, %v2137_v7 }
 0x434   : > { %v2260_v53 = vmax.f32 %v1982_v55, %v2132_v8  ;;  %v2782_v0 = vadd.f32 %v3156_v32, %v2641_v63  ;;  %2481 = vmatmul.f32.gmra.mxu2 %v2259_v2  ;;  %v3160_v8 = vld [vmem:[%s3598_s10 + $0xe0] sm:$0xff] }
 0x435   : > { %v1775_v43 = vpop.f32.mrf.mxu0  ;;  %v1984_v27 = vpop.f32.mrf.mxu1 }
 0x436   : > { %2846 = vst [vmem:[%s4526_s16 + $0xc8] sm:$0xff] %v2782_v0  ;;  %v1776_v38 = vadd.f32 %v1775_v43, %v4371_v30  ;;  %2690 = vmatmul.f32.gmra.mxu3 %v2260_v53  ;;  %v2139_v0 = vmul.f32 0.01, %v4366_v9 }
 0x437   : > { %v2434_v28 = vpop.f32.mrf.mxu2 }
 0x438   : > { %v1985_v23 = vadd.f32 %v1984_v27, %v1776_v38  ;;  %v2435_v17 = vadd.f32 %v4514_v57, %v2434_v28  ;;  %1822 = vmatmul.f32.gmra.mxu0 %v4310_v13  ;;  %2031 = vmatmul.f32.gmra.mxu1 %v5276_v19  ;;  %v2267_v38 = vmax.f32 %v4366_v9, %v2139_v0  ;;  %v3161_v19 = vld [vmem:[%s3598_s10 + $0xe8] sm:$0xff] }
 0x439   : > { %v2643_v42 = vpop.f32.mrf.mxu3 }
 0x43a   : > { %v2134_v35 = vmul.f32 0.01, %v1985_v23  ;;  %v2644_v36 = vadd.f32 %v2643_v42, %v2435_v17 }
 0x43c   : > { %v2262_v11 = vmax.f32 %v1985_v23, %v2134_v35  ;;  %v2783_v10 = vadd.f32 %v3157_v45, %v2644_v36  ;;  %2484 = vmatmul.f32.gmra.mxu2 %v2261_v18  ;;  %v2141_v36 = vmul.f32 0.01, %v4381_v22  ;;  %v5279_v45 = vld [vmem:[#allocation111_spill] sm:$0xff] }
 0x43d   : > { %v1778_v51 = vpop.f32.mrf.mxu0  ;;  %v1987_v58 = vpop.f32.mrf.mxu1 }
 0x43e   : > { %2847 = vst [vmem:[%s4526_s16 + $0xd0] sm:$0xff] %v2783_v10  ;;  %v1779_v16 = vadd.f32 %v1778_v51, %v4371_v30  ;;  %2693 = vmatmul.f32.gmra.mxu3 %v2262_v11  ;;  %v2269_v51 = vmax.f32 %v4381_v22, %v2141_v36  ;;  %v2149_v36 = vmul.f32 0.01, %v4413_v49 }
 0x43f   : > { %v2437_v13 = vpop.f32.mrf.mxu2 }
 0x440   : > { %v1988_v50 = vadd.f32 %v1987_v58, %v1779_v16  ;;  %v2438_v24 = vadd.f32 %v4514_v57, %v2437_v13  ;;  %1825 = vmatmul.f32.gmra.mxu0 %v4323_v54  ;;  %2034 = vmatmul.f32.gmra.mxu1 %v5277_v60  ;;  %v3162_v13 = vld [vmem:[%s3598_s10 + $0xf0] sm:$0xff] }
 0x441   : > { %v2646_v39 = vpop.f32.mrf.mxu3 }
 0x442   : > { %v2136_v26 = vmul.f32 0.01, %v1988_v50  ;;  %v2647_v14 = vadd.f32 %v2646_v39, %v2438_v24  ;;  %v2143_v39 = vmul.f32 0.01, %v4389_v44 }
 0x444   : > { %v2264_v61 = vmax.f32 %v1988_v50, %v2136_v26  ;;  %v2784_v4 = vadd.f32 %v3158_v3, %v2647_v14  ;;  %2487 = vmatmul.f32.gmra.mxu2 %v2263_v62 }
 0x445   : > { %v1781_v48 = vpop.f32.mrf.mxu0  ;;  %v1990_v52 = vpop.f32.mrf.mxu1 }
 0x446   : > { %2848 = vst [vmem:[%s4526_s16 + $0xd8] sm:$0xff] %v2784_v4  ;;  %v1782_v57 = vadd.f32 %v1781_v48, %v4371_v30  ;;  %2696 = vmatmul.f32.gmra.mxu3 %v2264_v61  ;;  %v2271_v61 = vmax.f32 %v4389_v44, %v2143_v39 }
 0x447   : > { %v2440_v54 = vpop.f32.mrf.mxu2 }
 0x448   : > { %v1991_v41 = vadd.f32 %v1990_v52, %v1782_v57  ;;  %v2441_v15 = vadd.f32 %v4749_v37, %v2440_v54  ;;  %1828 = vmatmul.f32.gmra.mxu0 %v4336_v47  ;;  %2037 = vmatmul.f32.gmra.mxu1 %v5278_v34  ;;  %v3163_v52 = vld [vmem:[%s3598_s10 + $0xf8] sm:$0xff] }
 0x449   : > { %v2649_v55 = vpop.f32.mrf.mxu3 }
 0x44a   : > { %v2138_v40 = vmul.f32 0.01, %v1991_v41  ;;  %v2650_v6 = vadd.f32 %v2649_v55, %v2441_v15 }
 0x44c   : > { %v2266_v2 = vmax.f32 %v1991_v41, %v2138_v40  ;;  %v2785_v63 = vadd.f32 %v3160_v8, %v2650_v6  ;;  %2490 = vmatmul.f32.gmra.mxu2 %v2265_v12  ;;  %v2145_v41 = vmul.f32 0.01, %v4397_v29 }
 0x44d   : > { %v1784_v53 = vpop.f32.mrf.mxu0  ;;  %v1993_v32 = vpop.f32.mrf.mxu1 }
 0x44e   : > { %2849 = vst [vmem:[%s4526_s16 + $0xe0] sm:$0xff] %v2785_v63  ;;  %v1785_v43 = vadd.f32 %v1784_v53, %v4371_v30  ;;  %2699 = vmatmul.f32.gmra.mxu3 %v2266_v2  ;;  %v2273_v40 = vmax.f32 %v4397_v29, %v2145_v41  ;;  %v3164_v63 = vld [vmem:[%s3598_s10 + $0x100] sm:$0xff] }
 0x44f   : > { %v2443_v47 = vpop.f32.mrf.mxu2 }
 0x450   : > { %v1994_v27 = vadd.f32 %v1993_v32, %v1785_v43  ;;  %v2444_v56 = vadd.f32 %v4749_v37, %v2443_v47  ;;  %1831 = vmatmul.f32.gmra.mxu0 %v4349_v1  ;;  %2040 = vmatmul.f32.gmra.mxu1 %v4351_v20  ;;  %v2147_v43 = vmul.f32 0.01, %v4405_v46 }
 0x451   : > { %v2652_v5 = vpop.f32.mrf.mxu3 }
 0x452   : > { %v2140_v28 = vmul.f32 0.01, %v1994_v27  ;;  %v2653_v23 = vadd.f32 %v2652_v5, %v2444_v56 }
 0x454   : > { %v2268_v17 = vmax.f32 %v1994_v27, %v2140_v28  ;;  %v2786_v42 = vadd.f32 %v3161_v19, %v2653_v23  ;;  %2493 = vmatmul.f32.gmra.mxu2 %v2267_v38  ;;  %v2275_v38 = vmax.f32 %v4405_v46, %v2147_v43  ;;  %v3165_v19 = vld [vmem:[%s3598_s10 + $0x108] sm:$0xff] }
 0x455   : > { %v1787_v18 = vpop.f32.mrf.mxu0  ;;  %v1996_v35 = vpop.f32.mrf.mxu1 }
 0x456   : > { %2850 = vst [vmem:[%s4526_s16 + $0xe8] sm:$0xff] %v2786_v42  ;;  %v1788_v11 = vadd.f32 %v1787_v18, %v4371_v30  ;;  %2702 = vmatmul.f32.gmra.mxu3 %v2268_v17 }
 0x457   : > { %v2446_v1 = vpop.f32.mrf.mxu2 }
 0x458   : > { %v1997_v20 = vadd.f32 %v1996_v35, %v1788_v11  ;;  %v2447_v9 = vadd.f32 %v4749_v37, %v2446_v1  ;;  %1834 = vmatmul.f32.gmra.mxu0 %v4362_v25  ;;  %2043 = vmatmul.f32.gmra.mxu1 %v5279_v45  ;;  %v2277_v45 = vmax.f32 %v4413_v49, %v2149_v36 }
 0x459   : > { %v2655_v10 = vpop.f32.mrf.mxu3 }
 0x45a   : > { %v2142_v58 = vmul.f32 0.01, %v1997_v20  ;;  %v2656_v21 = vadd.f32 %v2655_v10, %v2447_v9 }
 0x45c   : > { %v2270_v16 = vmax.f32 %v1997_v20, %v2142_v58  ;;  %v2787_v50 = vadd.f32 %v3162_v13, %v2656_v21  ;;  %2496 = vmatmul.f32.gmra.mxu2 %v2269_v51  ;;  %v3166_v21 = vld [vmem:[%s3598_s10 + $0x110] sm:$0xff] }
 0x45d   : > { %v1790_v24 = vpop.f32.mrf.mxu0  ;;  %v1999_v60 = vpop.f32.mrf.mxu1 }
 0x45e   : > { %2851 = vst [vmem:[%s4526_s16 + $0xf0] sm:$0xff] %v2787_v50  ;;  %v1791_v62 = vadd.f32 %v1790_v24, %v4371_v30  ;;  %2705 = vmatmul.f32.gmra.mxu3 %v2270_v16  ;;  %v2151_v24 = vmul.f32 0.01, %v4421_v33 }
 0x45f   : > { %v2449_v25 = vpop.f32.mrf.mxu2 }
 0x460   : > { %v2000_v26 = vadd.f32 %v1999_v60, %v1791_v62  ;;  %v2450_v22 = vadd.f32 %v4749_v37, %v2449_v25 }
 0x461   : > { %v2658_v14 = vpop.f32.mrf.mxu3 }
 0x462   : > { %v2144_v3 = vmul.f32 0.01, %v2000_v26  ;;  %v2659_v4 = vadd.f32 %v2658_v14, %v2450_v22 }
 0x464   : > { %v2272_v48 = vmax.f32 %v2000_v26, %v2144_v3  ;;  %v2788_v7 = vadd.f32 %v3163_v52, %v2659_v4  ;;  %2499 = vmatmul.f32.gmra.mxu2 %v2271_v61  ;;  %v2279_v26 = vmax.f32 %v4421_v33, %v2151_v24  ;;  %v3167_v3 = vld [vmem:[%s3598_s10 + $0x118] sm:$0xff] }
 0x465   : > { %v1793_v57 = vpop.f32.mrf.mxu0  ;;  %v2002_v54 = vpop.f32.mrf.mxu1 }
 0x466   : > { %2852 = vst [vmem:[%s4526_s16 + $0xf8] sm:$0xff] %v2788_v7  ;;  %v1794_v15 = vadd.f32 %v1793_v57, %v4371_v30  ;;  %2708 = vmatmul.f32.gmra.mxu3 %v2272_v48  ;;  %v2153_v7 = vmul.f32 0.01, %v4429_v31 }
 0x467   : > { %v2452_v34 = vpop.f32.mrf.mxu2 }
 0x468   : > { %v2003_v55 = vadd.f32 %v2002_v54, %v1794_v15  ;;  %v2453_v44 = vadd.f32 %v4749_v37, %v2452_v34  ;;  %v2281_v34 = vmax.f32 %v4429_v31, %v2153_v7 }
 0x469   : > { %v2661_v12 = vpop.f32.mrf.mxu3 }
 0x46a   : > { %v2146_v6 = vmul.f32 0.01, %v2003_v55  ;;  %v2662_v2 = vadd.f32 %v2661_v12, %v2453_v44 }
 0x46c   : > { %v2274_v8 = vmax.f32 %v2003_v55, %v2146_v6  ;;  %v2789_v53 = vadd.f32 %v3164_v63, %v2662_v2  ;;  %2502 = vmatmul.f32.gmra.mxu2 %v2273_v40  ;;  %v3168_v40 = vld [vmem:[%s3598_s10 + $0x120] sm:$0xff]  ;;  %v2155_v63 = vmul.f32 0.01, %v4437_v59 }
 0x46d   : > { %v1796_v32 = vpop.f32.mrf.mxu0  ;;  %v2005_v0 = vpop.f32.mrf.mxu1 }
 0x46e   : > { %2853 = vst [vmem:[%s4526_s16 + $0x100] sm:$0xff] %v2789_v53  ;;  %v1797_v47 = vadd.f32 %v1796_v32, %v4371_v30  ;;  %2711 = vmatmul.f32.gmra.mxu3 %v2274_v8 }
 0x46f   : > { %v2455_v27 = vpop.f32.mrf.mxu2 }
 0x470   : > { %v2006_v56 = vadd.f32 %v2005_v0, %v1797_v47  ;;  %v2456_v29 = vadd.f32 %v4749_v37, %v2455_v27  ;;  %v2283_v47 = vmax.f32 %v4437_v59, %v2155_v63 }
 0x471   : > { %v2664_v5 = vpop.f32.mrf.mxu3 }
 0x472   : > { %v2148_v28 = vmul.f32 0.01, %v2006_v56  ;;  %v2665_v23 = vadd.f32 %v2664_v5, %v2456_v29  ;;  %v3169_v5 = vld [vmem:[%s3598_s10 + $0x128] sm:$0xff] }
 0x474   : > { %v2276_v17 = vmax.f32 %v2006_v56, %v2148_v28  ;;  %v2790_v42 = vadd.f32 %v3165_v19, %v2665_v23  ;;  %2505 = vmatmul.f32.gmra.mxu2 %v2275_v38 }
 0x475   : > { %v1799_v18 = vpop.f32.mrf.mxu0  ;;  %v2008_v35 = vpop.f32.mrf.mxu1 }
 0x476   : > { %2854 = vst [vmem:[%s4526_s16 + $0x108] sm:$0xff] %v2790_v42  ;;  %v1800_v11 = vadd.f32 %v1799_v18, %v4371_v30  ;;  %2714 = vmatmul.f32.gmra.mxu3 %v2276_v17  ;;  %v5280_v17 = vld [vmem:[#allocation18_spill] sm:$0xff] }
 0x477   : > { %v2458_v1 = vpop.f32.mrf.mxu2  ;;  %v2157_v19 = vmul.f32 0.01, %v5280_v17 }
 0x478   : > { %v2009_v20 = vadd.f32 %v2008_v35, %v1800_v11  ;;  %v2459_v46 = vadd.f32 %v4749_v37, %v2458_v1 }
 0x479   : > { %v2667_v9 = vpop.f32.mrf.mxu3  ;;  %v2285_v11 = vmax.f32 %v5280_v17, %v2157_v19 }
 0x47a   : > { %v2150_v10 = vmul.f32 0.01, %v2009_v20  ;;  %v2668_v51 = vadd.f32 %v2667_v9, %v2459_v46  ;;  %v3170_v9 = vld [vmem:[%s3598_s10 + $0x130] sm:$0xff] }
 0x47c   : > { %v2278_v58 = vmax.f32 %v2009_v20, %v2150_v10  ;;  %v2791_v16 = vadd.f32 %v3166_v21, %v2668_v51  ;;  %2508 = vmatmul.f32.gmra.mxu2 %v2277_v45 }
 0x47d   : > { %v1802_v13 = vpop.f32.mrf.mxu0  ;;  %v2011_v50 = vpop.f32.mrf.mxu1 }
 0x47e   : > { %2855 = vst [vmem:[%s4526_s16 + $0x110] sm:$0xff] %v2791_v16  ;;  %v1803_v60 = vadd.f32 %v1802_v13, %v4371_v30  ;;  %2717 = vmatmul.f32.gmra.mxu3 %v2278_v58  ;;  %v5281_v58 = vld [vmem:[#allocation16_spill] sm:$0xff] }
 0x47f   : > { %v2461_v39 = vpop.f32.mrf.mxu2  ;;  %v2159_v21 = vmul.f32 0.01, %v5281_v58 }
 0x480   : > { %v2012_v62 = vadd.f32 %v2011_v50, %v1803_v60  ;;  %v2462_v49 = vadd.f32 %v4749_v37, %v2461_v39 }
 0x481   : > { %v2670_v25 = vpop.f32.mrf.mxu3  ;;  %v2287_v39 = vmax.f32 %v5281_v58, %v2159_v21 }
 0x482   : > { %v2152_v22 = vmul.f32 0.01, %v2012_v62  ;;  %v2671_v14 = vadd.f32 %v2670_v25, %v2462_v49 }
 0x484   : > { %v2280_v61 = vmax.f32 %v2012_v62, %v2152_v22  ;;  %v2792_v4 = vadd.f32 %v3167_v3, %v2671_v14  ;;  %2511 = vmatmul.f32.gmra.mxu2 %v2279_v26  ;;  %v3171_v26 = vld [vmem:[%s3598_s10 + $0x138] sm:$0xff]  ;;  %v5282_v3 = vld [vmem:[#allocation17_spill] sm:$0xff] }
 0x485   : > { %v1805_v48 = vpop.f32.mrf.mxu0  ;;  %v2014_v52 = vpop.f32.mrf.mxu1 }
 0x486   : > { %2856 = vst [vmem:[%s4526_s16 + $0x118] sm:$0xff] %v2792_v4  ;;  %v1806_v57 = vadd.f32 %v1805_v48, %v4371_v30  ;;  %2720 = vmatmul.f32.gmra.mxu3 %v2280_v61  ;;  %v2161_v4 = vmul.f32 0.01, %v5282_v3 }
 0x487   : > { %v2464_v54 = vpop.f32.mrf.mxu2 }
 0x488   : > { %v2015_v41 = vadd.f32 %v2014_v52, %v1806_v57  ;;  %v2465_v33 = vadd.f32 %v4749_v37, %v2464_v54 }
 0x489   : > { %v2673_v15 = vpop.f32.mrf.mxu3 }
 0x48a   : > { %v2154_v55 = vmul.f32 0.01, %v2015_v41  ;;  %v2674_v44 = vadd.f32 %v2673_v15, %v2465_v33 }
 0x48c   : > { %v2282_v12 = vmax.f32 %v2015_v41, %v2154_v55  ;;  %v2793_v6 = vadd.f32 %v3168_v40, %v2674_v44  ;;  %2514 = vmatmul.f32.gmra.mxu2 %v2281_v34  ;;  %v2289_v41 = vmax.f32 %v5282_v3, %v2161_v4  ;;  %v3172_v55 = vld [vmem:[%s3598_s10 + $0x140] sm:$0xff] }
 0x48d   : > { %v1808_v2 = vpop.f32.mrf.mxu0  ;;  %v2017_v8 = vpop.f32.mrf.mxu1 }
 0x48e   : > { %2857 = vst [vmem:[%s4526_s16 + $0x120] sm:$0xff] %v2793_v6  ;;  %v1809_v53 = vadd.f32 %v1808_v2, %v4371_v30  ;;  %2723 = vmatmul.f32.gmra.mxu3 %v2282_v12  ;;  %v5283_v6 = vld [vmem:[#allocation21_spill] sm:$0xff] }
 0x48f   : > { %v2467_v32 = vpop.f32.mrf.mxu2  ;;  %v2163_v2 = vmul.f32 0.01, %v5283_v6 }
 0x490   : > { %v2018_v0 = vadd.f32 %v2017_v8, %v1809_v53  ;;  %v2468_v31 = vadd.f32 %v4749_v37, %v2467_v32 }
 0x491   : > { %v2676_v43 = vpop.f32.mrf.mxu3 }
 0x492   : > { %v2156_v27 = vmul.f32 0.01, %v2018_v0  ;;  %v2677_v56 = vadd.f32 %v2676_v43, %v2468_v31  ;;  %v2291_v31 = vmax.f32 %v5283_v6, %v2163_v2 }
 0x494   : > { %v2284_v29 = vmax.f32 %v2018_v0, %v2156_v27  ;;  %v2794_v38 = vadd.f32 %v3169_v5, %v2677_v56  ;;  %2517 = vmatmul.f32.gmra.mxu2 %v2283_v47  ;;  %v3173_v56 = vld [vmem:[%s3598_s10 + $0x148] sm:$0xff] }
 0x495   : > { %v1811_v28 = vpop.f32.mrf.mxu0  ;;  %v2020_v23 = vpop.f32.mrf.mxu1 }
 0x496   : > { %2858 = vst [vmem:[%s4526_s16 + $0x128] sm:$0xff] %v2794_v38  ;;  %v1812_v42 = vadd.f32 %v1811_v28, %v4371_v30  ;;  %2726 = vmatmul.f32.gmra.mxu3 %v2284_v29  ;;  %v5284_v28 = vld [vmem:[#allocation19_spill] sm:$0xff] }
 0x497   : > { %v2470_v18 = vpop.f32.mrf.mxu2 }
 0x498   : > { %v2021_v35 = vadd.f32 %v2020_v23, %v1812_v42  ;;  %v2471_v59 = vadd.f32 %v4749_v37, %v2470_v18  ;;  %v2165_v23 = vmul.f32 0.01, %v5284_v28 }
 0x499   : > { %v2679_v36 = vpop.f32.mrf.mxu3 }
 0x49a   : > { %v2158_v1 = vmul.f32 0.01, %v2021_v35  ;;  %v2680_v20 = vadd.f32 %v2679_v36, %v2471_v59  ;;  %v2293_v59 = vmax.f32 %v5284_v28, %v2165_v23 }
 0x49c   : > { %v2286_v46 = vmax.f32 %v2021_v35, %v2158_v1  ;;  %v2795_v45 = vadd.f32 %v3170_v9, %v2680_v20  ;;  %2520 = vmatmul.f32.gmra.mxu2 %v2285_v11  ;;  %v3174_v20 = vld [vmem:[%s3598_s10 + $0x150] sm:$0xff] }
 0x49d   : > { %v1814_v10 = vpop.f32.mrf.mxu0  ;;  %v2023_v51 = vpop.f32.mrf.mxu1 }
 0x49e   : > { %2859 = vst [vmem:[%s4526_s16 + $0x130] sm:$0xff] %v2795_v45  ;;  %v1815_v16 = vadd.f32 %v1814_v10, %v4371_v30  ;;  %2729 = vmatmul.f32.gmra.mxu3 %v2286_v46  ;;  %v5285_v10 = vld [vmem:[#allocation20_spill] sm:$0xff] }
 0x49f   : > { %v2473_v13 = vpop.f32.mrf.mxu2 }
 0x4a0   : > { %v2024_v50 = vadd.f32 %v2023_v51, %v1815_v16  ;;  %v2474_v24 = vadd.f32 %v4749_v37, %v2473_v13  ;;  %v2167_v51 = vmul.f32 0.01, %v5285_v10 }
 0x4a1   : > { %v2682_v60 = vpop.f32.mrf.mxu3 }
 0x4a2   : > { %v2160_v62 = vmul.f32 0.01, %v2024_v50  ;;  %v2683_v49 = vadd.f32 %v2682_v60, %v2474_v24  ;;  %v2295_v24 = vmax.f32 %v5285_v10, %v2167_v51 }
 0x4a4   : > { %v2288_v25 = vmax.f32 %v2024_v50, %v2160_v62  ;;  %v2796_v22 = vadd.f32 %v3171_v26, %v2683_v49  ;;  %2523 = vmatmul.f32.gmra.mxu2 %v2287_v39  ;;  %v3175_v49 = vld [vmem:[%s3598_s10 + $0x158] sm:$0xff] }
 0x4a5   : > { %v1817_v14 = vpop.f32.mrf.mxu0  ;;  %v2026_v61 = vpop.f32.mrf.mxu1 }
 0x4a6   : > { %2860 = vst [vmem:[%s4526_s16 + $0x138] sm:$0xff] %v2796_v22  ;;  %v1818_v48 = vadd.f32 %v1817_v14, %v4371_v30  ;;  %2732 = vmatmul.f32.gmra.mxu3 %v2288_v25  ;;  %v5286_v14 = vld [vmem:[#allocation24_spill] sm:$0xff] }
 0x4a7   : > { %v2476_v52 = vpop.f32.mrf.mxu2 }
 0x4a8   : > { %v2027_v7 = vadd.f32 %v2026_v61, %v1818_v48  ;;  %v2477_v57 = vadd.f32 %v4749_v37, %v2476_v52  ;;  %v2169_v61 = vmul.f32 0.01, %v5286_v14 }
 0x4a9   : > { %v2685_v54 = vpop.f32.mrf.mxu3 }
 0x4aa   : > { %v2162_v33 = vmul.f32 0.01, %v2027_v7  ;;  %v2686_v15 = vadd.f32 %v2685_v54, %v2477_v57  ;;  %v2297_v57 = vmax.f32 %v5286_v14, %v2169_v61 }
 0x4ac   : > { %v2290_v34 = vmax.f32 %v2027_v7, %v2162_v33  ;;  %v2797_v44 = vadd.f32 %v3172_v55, %v2686_v15  ;;  %2526 = vmatmul.f32.gmra.mxu2 %v2289_v41  ;;  %v3176_v15 = vld [vmem:[%s3598_s10 + $0x160] sm:$0xff] }
 0x4ad   : > { %v1820_v12 = vpop.f32.mrf.mxu0  ;;  %v2029_v40 = vpop.f32.mrf.mxu1 }
 0x4ae   : > { %2861 = vst [vmem:[%s4526_s16 + $0x140] sm:$0xff] %v2797_v44  ;;  %v1821_v8 = vadd.f32 %v1820_v12, %v4371_v30  ;;  %2735 = vmatmul.f32.gmra.mxu3 %v2290_v34  ;;  %v5287_v12 = vld [vmem:[#allocation22_spill] sm:$0xff] }
 0x4af   : > { %v2479_v63 = vpop.f32.mrf.mxu2 }
 0x4b0   : > { %v2030_v53 = vadd.f32 %v2029_v40, %v1821_v8  ;;  %v2480_v32 = vadd.f32 %v4749_v37, %v2479_v63  ;;  %v2171_v40 = vmul.f32 0.01, %v5287_v12 }
 0x4b1   : > { %v2688_v0 = vpop.f32.mrf.mxu3 }
 0x4b2   : > { %v2164_v43 = vmul.f32 0.01, %v2030_v53  ;;  %v2689_v47 = vadd.f32 %v2688_v0, %v2480_v32  ;;  %v2299_v32 = vmax.f32 %v5287_v12, %v2171_v40 }
 0x4b4   : > { %v2292_v27 = vmax.f32 %v2030_v53, %v2164_v43  ;;  %v2798_v29 = vadd.f32 %v3173_v56, %v2689_v47  ;;  %2529 = vmatmul.f32.gmra.mxu2 %v2291_v31  ;;  %v3177_v47 = vld [vmem:[%s3598_s10 + $0x168] sm:$0xff] }
 0x4b5   : > { %v1823_v5 = vpop.f32.mrf.mxu0  ;;  %v2032_v38 = vpop.f32.mrf.mxu1 }
 0x4b6   : > { %2862 = vst [vmem:[%s4526_s16 + $0x148] sm:$0xff] %v2798_v29  ;;  %v1824_v17 = vadd.f32 %v1823_v5, %v4371_v30  ;;  %2738 = vmatmul.f32.gmra.mxu3 %v2292_v27  ;;  %v5288_v29 = vld [vmem:[#allocation23_spill] sm:$0xff] }
 0x4b7   : > { %v2482_v19 = vpop.f32.mrf.mxu2  ;;  %v2173_v5 = vmul.f32 0.01, %v5288_v29 }
 0x4b8   : > { %v2033_v42 = vadd.f32 %v2032_v38, %v1824_v17  ;;  %v2483_v18 = vadd.f32 %v4749_v37, %v2482_v19 }
 0x4b9   : > { %v2691_v35 = vpop.f32.mrf.mxu3 }
 0x4ba   : > { %v2166_v36 = vmul.f32 0.01, %v2033_v42  ;;  %v2692_v11 = vadd.f32 %v2691_v35, %v2483_v18  ;;  %v2301_v18 = vmax.f32 %v5288_v29, %v2173_v5 }
 0x4bc   : > { %v2294_v1 = vmax.f32 %v2033_v42, %v2166_v36  ;;  %v2799_v46 = vadd.f32 %v3174_v20, %v2692_v11  ;;  %2532 = vmatmul.f32.gmra.mxu2 %v2293_v59  ;;  %v3178_v11 = vld [vmem:[%s3598_s10 + $0x170] sm:$0xff] }
 0x4bd   : > { %v1826_v9 = vpop.f32.mrf.mxu0  ;;  %v2035_v45 = vpop.f32.mrf.mxu1 }
 0x4be   : > { %2863 = vst [vmem:[%s4526_s16 + $0x150] sm:$0xff] %v2799_v46  ;;  %v1827_v58 = vadd.f32 %v1826_v9, %v4371_v30  ;;  %2741 = vmatmul.f32.gmra.mxu3 %v2294_v1 }
 0x4bf   : > { %v2485_v21 = vpop.f32.mrf.mxu2 }
 0x4c0   : > { %v2036_v16 = vadd.f32 %v2035_v45, %v1827_v58  ;;  %v2486_v13 = vadd.f32 %v4749_v37, %v2485_v21  ;;  %v3179_v45 = vld [vmem:[%s3598_s10 + $0x178] sm:$0xff] }
 0x4c1   : > { %v2694_v50 = vpop.f32.mrf.mxu3 }
 0x4c2   : > { %v2168_v60 = vmul.f32 0.01, %v2036_v16  ;;  %v2695_v39 = vadd.f32 %v2694_v50, %v2486_v13  ;;  %v3180_v13 = vld [vmem:[%s3598_s10 + $0x180] sm:$0xff] }
 0x4c4   : > { %v2296_v62 = vmax.f32 %v2036_v16, %v2168_v60  ;;  %v2800_v25 = vadd.f32 %v3175_v49, %v2695_v39  ;;  %2535 = vmatmul.f32.gmra.mxu2 %v2295_v24  ;;  %v3181_v49 = vld [vmem:[%s3598_s10 + $0x188] sm:$0xff] }
 0x4c5   : > { %v1829_v26 = vpop.f32.mrf.mxu0  ;;  %v2038_v22 = vpop.f32.mrf.mxu1 }
 0x4c6   : > { %2864 = vst [vmem:[%s4526_s16 + $0x158] sm:$0xff] %v2800_v25  ;;  %v1830_v3 = vadd.f32 %v1829_v26, %v4371_v30  ;;  %2744 = vmatmul.f32.gmra.mxu3 %v2296_v62 }
 0x4c7   : > { %v2488_v4 = vpop.f32.mrf.mxu2 }
 0x4c8   : > { %v2039_v48 = vadd.f32 %v2038_v22, %v1830_v3  ;;  %v2489_v52 = vadd.f32 %v4749_v37, %v2488_v4  ;;  %v3182_v3 = vld [vmem:[%s3598_s10 + $0x190] sm:$0xff] }
 0x4c9   : > { %v2697_v7 = vpop.f32.mrf.mxu3 }
 0x4ca   : > { %v2170_v54 = vmul.f32 0.01, %v2039_v48  ;;  %v2698_v41 = vadd.f32 %v2697_v7, %v2489_v52 }
 0x4cc   : > { %v2298_v33 = vmax.f32 %v2039_v48, %v2170_v54  ;;  %v2801_v34 = vadd.f32 %v3176_v15, %v2698_v41  ;;  %2538 = vmatmul.f32.gmra.mxu2 %v2297_v57  ;;  %v3183_v54 = vld [vmem:[%s3598_s10 + $0x198] sm:$0xff] }
 0x4cd   : > { %v1832_v55 = vpop.f32.mrf.mxu0  ;;  %v2041_v44 = vpop.f32.mrf.mxu1 }
 0x4ce   : > { %2865 = vst [vmem:[%s4526_s16 + $0x160] sm:$0xff] %v2801_v34  ;;  %v1833_v6 = vadd.f32 %v1832_v55, %v4371_v30  ;;  %2747 = vmatmul.f32.gmra.mxu3 %v2298_v33 }
 0x4cf   : > { %v2491_v2 = vpop.f32.mrf.mxu2 }
 0x4d0   : > { %v2042_v8 = vadd.f32 %v2041_v44, %v1833_v6  ;;  %v2492_v63 = vadd.f32 %v4749_v37, %v2491_v2  ;;  %v3184_v44 = vld [vmem:[%s3598_s10 + $0x1a0] sm:$0xff] }
 0x4d1   : > { %v2700_v53 = vpop.f32.mrf.mxu3 }
 0x4d2   : > { %v2172_v0 = vmul.f32 0.01, %v2042_v8  ;;  %v2701_v31 = vadd.f32 %v2700_v53, %v2492_v63  ;;  %v3185_v63 = vld [vmem:[%s3598_s10 + $0x1a8] sm:$0xff] }
 0x4d4   : > { %v2300_v43 = vmax.f32 %v2042_v8, %v2172_v0  ;;  %v2802_v27 = vadd.f32 %v3177_v47, %v2701_v31  ;;  %2541 = vmatmul.f32.gmra.mxu2 %v2299_v32  ;;  %v3186_v47 = vld [vmem:[%s3598_s10 + $0x1b0] sm:$0xff] }
 0x4d5   : > { %v1835_v56 = vpop.f32.mrf.mxu0  ;;  %v2044_v28 = vpop.f32.mrf.mxu1 }
 0x4d6   : > { %2866 = vst [vmem:[%s4526_s16 + $0x168] sm:$0xff] %v2802_v27  ;;  %v1836_v38 = vadd.f32 %v1835_v56, %v4371_v30  ;;  %2750 = vmatmul.f32.gmra.mxu3 %v2300_v43 }
 0x4d7   : > { %v2494_v23 = vpop.f32.mrf.mxu2 }
 0x4d8   : > { %v2045_v17 = vadd.f32 %v2044_v28, %v1836_v38  ;;  %v2495_v19 = vadd.f32 %v4749_v37, %v2494_v23  ;;  %v3187_v28 = vld [vmem:[%s3598_s10 + $0x1b8] sm:$0xff] }
 0x4d9   : > { %v2703_v42 = vpop.f32.mrf.mxu3 }
 0x4da   : > { %v2174_v35 = vmul.f32 0.01, %v2045_v17  ;;  %v2704_v59 = vadd.f32 %v2703_v42, %v2495_v19 }
 0x4dc   : > { %v2302_v36 = vmax.f32 %v2045_v17, %v2174_v35  ;;  %v2803_v1 = vadd.f32 %v3178_v11, %v2704_v59  ;;  %2544 = vmatmul.f32.gmra.mxu2 %v2301_v18  ;;  %v3188_v35 = vld [vmem:[%s3598_s10 + $0x1c0] sm:$0xff] }
 0x4de   : > { %2867 = vst [vmem:[%s4526_s16 + $0x170] sm:$0xff] %v2803_v1  ;;  %2753 = vmatmul.f32.gmra.mxu3 %v2302_v36 }
 0x4df   : > { %v2497_v30 = vpop.f32.mrf.mxu2 }
 0x4e0   : > { %v2498_v20 = vadd.f32 %v4749_v37, %v2497_v30 }
 0x4e1   : > { %v2706_v46 = vpop.f32.mrf.mxu3 }
 0x4e2   : > { %v2707_v9 = vadd.f32 %v2706_v46, %v2498_v20  ;;  %v3189_v20 = vld [vmem:[%s3598_s10 + $0x1c8] sm:$0xff] }
 0x4e4   : > { %v2804_v10 = vadd.f32 %v3179_v45, %v2707_v9 }
 0x4e6   : > { %2868 = vst [vmem:[%s4526_s16 + $0x178] sm:$0xff] %v2804_v10 }
 0x4e7   : > { %v2500_v51 = vpop.f32.mrf.mxu2 }
 0x4e8   : > { %v2501_v58 = vadd.f32 %v4749_v37, %v2500_v51 }
 0x4e9   : > { %v2709_v21 = vpop.f32.mrf.mxu3 }
 0x4ea   : > { %v2710_v16 = vadd.f32 %v2709_v21, %v2501_v58  ;;  %v3190_v58 = vld [vmem:[%s3598_s10 + $0x1d0] sm:$0xff] }
 0x4ec   : > { %v2805_v50 = vadd.f32 %v3180_v13, %v2710_v16 }
 0x4ee   : > { %2869 = vst [vmem:[%s4526_s16 + $0x180] sm:$0xff] %v2805_v50 }
 0x4ef   : > { %v2503_v24 = vpop.f32.mrf.mxu2 }
 0x4f0   : > { %v2504_v60 = vadd.f32 %v4749_v37, %v2503_v24 }
 0x4f1   : > { %v2712_v39 = vpop.f32.mrf.mxu3 }
 0x4f2   : > { %v2713_v62 = vadd.f32 %v2712_v39, %v2504_v60  ;;  %v3191_v60 = vld [vmem:[%s3598_s10 + $0x1d8] sm:$0xff] }
 0x4f4   : > { %v2806_v25 = vadd.f32 %v3181_v49, %v2713_v62 }
 0x4f6   : > { %2870 = vst [vmem:[%s4526_s16 + $0x188] sm:$0xff] %v2806_v25 }
 0x4f7   : > { %v2506_v26 = vpop.f32.mrf.mxu2 }
 0x4f8   : > { %v2507_v22 = vadd.f32 %v4749_v37, %v2506_v26 }
 0x4f9   : > { %v2715_v14 = vpop.f32.mrf.mxu3 }
 0x4fa   : > { %v2716_v61 = vadd.f32 %v2715_v14, %v2507_v22  ;;  %v3192_v22 = vld [vmem:[%s3598_s10 + $0x1e0] sm:$0xff] }
 0x4fc   : > { %v2807_v4 = vadd.f32 %v3182_v3, %v2716_v61 }
 0x4fe   : > { %2871 = vst [vmem:[%s4526_s16 + $0x190] sm:$0xff] %v2807_v4 }
 0x4ff   : > { %v2509_v48 = vpop.f32.mrf.mxu2 }
 0x500   : > { %v2510_v52 = vadd.f32 %v4749_v37, %v2509_v48 }
 0x501   : > { %v2718_v7 = vpop.f32.mrf.mxu3 }
 0x502   : > { %v2719_v57 = vadd.f32 %v2718_v7, %v2510_v52  ;;  %v3193_v52 = vld [vmem:[%s3598_s10 + $0x1e8] sm:$0xff] }
 0x504   : > { %v2808_v41 = vadd.f32 %v3183_v54, %v2719_v57 }
 0x506   : > { %2872 = vst [vmem:[%s4526_s16 + $0x198] sm:$0xff] %v2808_v41 }
 0x507   : > { %v2512_v33 = vpop.f32.mrf.mxu2 }
 0x508   : > { %v2513_v15 = vadd.f32 %v4749_v37, %v2512_v33 }
 0x509   : > { %v2721_v34 = vpop.f32.mrf.mxu3 }
 0x50a   : > { %v2722_v55 = vadd.f32 %v2721_v34, %v2513_v15  ;;  %v3194_v15 = vld [vmem:[%s3598_s10 + $0x1f0] sm:$0xff] }
 0x50c   : > { %v2809_v12 = vadd.f32 %v3184_v44, %v2722_v55 }
 0x50e   : > { %2873 = vst [vmem:[%s4526_s16 + $0x1a0] sm:$0xff] %v2809_v12 }
 0x50f   : > { %v2515_v40 = vpop.f32.mrf.mxu2 }
 0x510   : > { %v2516_v6 = vadd.f32 %v4749_v37, %v2515_v40 }
 0x511   : > { %v2724_v2 = vpop.f32.mrf.mxu3 }
 0x512   : > { %v2725_v8 = vadd.f32 %v2724_v2, %v2516_v6  ;;  %v3195_v6 = vld [vmem:[%s3598_s10 + $0x1f8] sm:$0xff] }
 0x514   : > { %v2810_v53 = vadd.f32 %v3185_v63, %v2725_v8 }
 0x516   : > { %2874 = vst [vmem:[%s4526_s16 + $0x1a8] sm:$0xff] %v2810_v53 }
 0x517   : > { %v2518_v32 = vpop.f32.mrf.mxu2 }
 0x518   : > { %v2519_v0 = vadd.f32 %v4749_v37, %v2518_v32 }
 0x519   : > { %v2727_v31 = vpop.f32.mrf.mxu3 }
 0x51a   : > { %v2728_v43 = vadd.f32 %v2727_v31, %v2519_v0 }
 0x51c   : > { %v2811_v27 = vadd.f32 %v3186_v47, %v2728_v43 }
 0x51e   : > { %2875 = vst [vmem:[%s4526_s16 + $0x1b0] sm:$0xff] %v2811_v27 }
 0x51f   : > { %v2521_v56 = vpop.f32.mrf.mxu2 }
 0x520   : > { %v2522_v29 = vadd.f32 %v4749_v37, %v2521_v56 }
 0x521   : > { %v2730_v5 = vpop.f32.mrf.mxu3 }
 0x522   : > { %v2731_v38 = vadd.f32 %v2730_v5, %v2522_v29 }
 0x524   : > { %v2812_v23 = vadd.f32 %v3187_v28, %v2731_v38 }
 0x526   : > { %2876 = vst [vmem:[%s4526_s16 + $0x1b8] sm:$0xff] %v2812_v23 }
 0x527   : > { %v2524_v17 = vpop.f32.mrf.mxu2 }
 0x528   : > { %v2525_v19 = vadd.f32 %v4749_v37, %v2524_v17 }
 0x529   : > { %v2733_v42 = vpop.f32.mrf.mxu3 }
 0x52a   : > { %v2734_v18 = vadd.f32 %v2733_v42, %v2525_v19 }
 0x52c   : > { %v2813_v59 = vadd.f32 %v3188_v35, %v2734_v18 }
 0x52e   : > { %2877 = vst [vmem:[%s4526_s16 + $0x1c0] sm:$0xff] %v2813_v59 }
 0x52f   : > { %v2527_v36 = vpop.f32.mrf.mxu2 }
 0x530   : > { %v2528_v11 = vadd.f32 %v4749_v37, %v2527_v36 }
 0x531   : > { %v2736_v1 = vpop.f32.mrf.mxu3 }
 0x532   : > { %v2737_v30 = vadd.f32 %v2736_v1, %v2528_v11 }
 0x534   : > { %v2814_v46 = vadd.f32 %v3189_v20, %v2737_v30 }
 0x536   : > { %2878 = vst [vmem:[%s4526_s16 + $0x1c8] sm:$0xff] %v2814_v46 }
 0x537   : > { %v2530_v9 = vpop.f32.mrf.mxu2 }
 0x538   : > { %v2531_v45 = vadd.f32 %v4749_v37, %v2530_v9 }
 0x539   : > { %v2739_v10 = vpop.f32.mrf.mxu3 }
 0x53a   : > { %v2740_v51 = vadd.f32 %v2739_v10, %v2531_v45 }
 0x53c   : > { %v2815_v21 = vadd.f32 %v3190_v58, %v2740_v51 }
 0x53e   : > { %2879 = vst [vmem:[%s4526_s16 + $0x1d0] sm:$0xff] %v2815_v21 }
 0x53f   : > { %v2533_v16 = vpop.f32.mrf.mxu2 }
 0x540   : > { %v2534_v13 = vadd.f32 %v4749_v37, %v2533_v16 }
 0x541   : > { %v2742_v50 = vpop.f32.mrf.mxu3 }
 0x542   : > { %v2743_v24 = vadd.f32 %v2742_v50, %v2534_v13 }
 0x544   : > { %v2816_v39 = vadd.f32 %v3191_v60, %v2743_v24 }
 0x546   : > { %2880 = vst [vmem:[%s4526_s16 + $0x1d8] sm:$0xff] %v2816_v39 }
 0x547   : > { %v2536_v62 = vpop.f32.mrf.mxu2 }
 0x548   : > { %v2537_v49 = vadd.f32 %v4749_v37, %v2536_v62 }
 0x549   : > { %v2745_v25 = vpop.f32.mrf.mxu3 }
 0x54a   : > { %v2746_v26 = vadd.f32 %v2745_v25, %v2537_v49 }
 0x54c   : > { %v2817_v14 = vadd.f32 %v3192_v22, %v2746_v26 }
 0x54e   : > { %2881 = vst [vmem:[%s4526_s16 + $0x1e0] sm:$0xff] %v2817_v14 }
 0x54f   : > { %v2539_v61 = vpop.f32.mrf.mxu2 }
 0x550   : > { %v2540_v3 = vadd.f32 %v4749_v37, %v2539_v61 }
 0x551   : > { %v2748_v4 = vpop.f32.mrf.mxu3 }
 0x552   : > { %v2749_v48 = vadd.f32 %v2748_v4, %v2540_v3 }
 0x554   : > { %v2818_v7 = vadd.f32 %v3193_v52, %v2749_v48 }
 0x556   : > { %2882 = vst [vmem:[%s4526_s16 + $0x1e8] sm:$0xff] %v2818_v7 }
 0x557   : > { %v2542_v57 = vpop.f32.mrf.mxu2 }
 0x558   : > { %v2543_v54 = vadd.f32 %v4749_v37, %v2542_v57 }
 0x559   : > { %v2751_v41 = vpop.f32.mrf.mxu3 }
 0x55a   : > { %v2752_v33 = vadd.f32 %v2751_v41, %v2543_v54 }
 0x55c   : > { %v2819_v34 = vadd.f32 %v3194_v15, %v2752_v33 }
 0x55e   : > { %2883 = vst [vmem:[%s4526_s16 + $0x1f0] sm:$0xff] %v2819_v34 }
 0x55f   : > { %v2545_v55 = vpop.f32.mrf.mxu2 }
 0x560   : > { %v2546_v44 = vadd.f32 %v4749_v37, %v2545_v55 }
 0x561   : > { %v2754_v12 = vpop.f32.mrf.mxu3 }
 0x562   : > { %v2755_v40 = vadd.f32 %v2754_v12, %v2546_v44 }
 0x564   : > { %v2820_v2 = vadd.f32 %v3195_v6, %v2755_v40 }
 0x566   : > { %2884 = vst [vmem:[%s4526_s16 + $0x1f8] sm:$0xff] %v2820_v2 }
 0x567   : > { %3373 = shalt.err (!%p3370_p10)
}
 0x568   : > { %s3430_s13 = smov 128   ;;  %s3431_s10 = smov 8  }
 0x569   : > { %3054 = dma.vmem_to_hbm [thread:$0]  (%p3562_p5), %s2899_s30, 8192, %s2901_s12, %s2886_s28, %s3430_s13, %s3430_s13, %s3431_s10  }
 0x56a PF: > { %s2915_s16 = sand.u32 1, %s3408_s24   ;;  %p5289_p12 = scmp.ge.s32.totalorder %s3420_s27, 2 }
 0x56b   : > { %s2916_s17 = scalar_lea.sflag [#allocation4], %s2915_s16 }
 0x56c   : > { %p3074_p13 = pnand %p5289_p12, %p3507_p6 }
 0x56e   : > { %p3075_p0 = pneg %p3074_p13 }
 0x570   : > { %3403 = dma.done.wait (%p3075_p0), %s2916_s17, 8192  }
 0x571   : > { %3405 = vsyncadd (%p3075_p0), %s2916_s17, 4294959104  ;;  %p22_p3 = scmp.ge.s32.totalorder %s3549_s21, 4   ;;  %s5290_s24 = smov %s3412_s25 }
 0x572   : > { %s5291_s25 = smov %s3416_s26  ;;  %s5292_s26 = smov %s3558_s29 }
 0x573   : > { %s5293_s27 = smov %s3549_s21  ;;  %24 = sbr.rel (!%p22_p3) target bundleno = 9 (0x9), region = 109 }
 0x578   :  { %2922 = vsyncpa [#allocation3], 1 }
 0x579   :  { %2924 = vsyncpa [#allocation3 + $0x1], 1 }
 0x57a   :  { %2925 = vsyncpa [#allocation6], 1 }
 0x57b   :  { %2926 = vsyncpa [#allocation9], 1 }
 0x57c   :  { %2927 = vsyncpa [#allocation4], 1 }
 0x57d   :  { %2929 = vsyncpa [#allocation4 + $0x1], 1 }

</bundles_post_ra>
